<compile_context>
chip_gen: v7x
topology: tpu7x:2x2x1
jax: 0.10.0
libtpu: 0.0.40
codegen_flags: <defaults>
</compile_context>

<pallas_src>
import functools
import math

import jax
import jax.numpy as jnp
from jax.experimental import pallas as pl
from jax.experimental.pallas import tpu as pltpu

MATMUL_DTYPE = jnp.bfloat16   # MXU-native input dtype on v6e/v7x; accumulation stays f32


def _round_up(x, m):
    return ((x + m - 1) // m) * m


# ----------------------------- Fused kernel builder -----------------------------
def _make_fused_kernel(num_layers, T, bB, DHP, mm_dtype):
    """Fused (conv-folded) K-parallel multi-layer GRU + head kernel for one batch tile.

    Refs (in order): cols (T*bB, K*F); per layer [w_in, b_in, w_hh, b_hn]; w_head; b_head;
    out (bB, 1); scratch gi (T*bB, 3*DHP) f32; scratch hs (T*bB or 8, DHP) f32.
    """

    def kernel(cols_ref, *rest):
        nlw = 4 * num_layers
        layer_refs = rest[:nlw]
        w_head_ref = rest[nlw]
        b_head_ref = rest[nlw + 1]
        out_ref = rest[nlw + 2]
        gi_ref = rest[nlw + 3]
        hs_ref = rest[nlw + 4]

        h = None
        for l in range(num_layers):
            w_in, b_in, w_hh, b_hn = layer_refs[4 * l:4 * (l + 1)]

            # Hoisted, gate-fused input projection: ONE wide matmul per layer.
            # (conv1d is already folded into layer-0's w_in / b_in at pack time)
            xin = cols_ref[...] if l == 0 else hs_ref[...]
            gi_ref[...] = (jnp.dot(xin.astype(mm_dtype), w_in[...],
                                   preferred_element_type=jnp.float32)
                           + b_in[...])          # b_in already contains folded b_hr / b_hz

            whh = w_hh[...]                      # (DHP, 3*DHP), fused r|z|n, bf16
            bhn = b_hn[...]                      # (1, DHP) f32, must stay inside r*(...)

            h = jnp.zeros((bB, DHP), jnp.float32)
            # Static unroll: T is small & static here.
            # TODO(synk): for large T switch to lax.fori_loop(..., unroll=2..4) over gi/hs.
            for t in range(T):
                gi = gi_ref[t * bB:(t + 1) * bB, :]        # static row slice -> free view
                gi_r = gi[:, :DHP]
                gi_z = gi[:, DHP:2 * DHP]
                gi_n = gi[:, 2 * DHP:]
                if t == 0:
                    # h == 0: skip the hidden matmul (gh_r = gh_z = 0, gh_n = b_hn).
                    r = jax.nn.sigmoid(gi_r)
                    z = jax.nn.sigmoid(gi_z)
                    n = jnp.tanh(gi_n + r * bhn)
                else:
                    # ONE fused hidden matmul per step (serial critical path).
                    gh = jnp.dot(h.astype(mm_dtype), whh,
                                 preferred_element_type=jnp.float32)
                    r = jax.nn.sigmoid(gi_r + gh[:, :DHP])
                    z = jax.nn.sigmoid(gi_z + gh[:, DHP:2 * DHP])
                    n = jnp.tanh(gi_n + r * (gh[:, 2 * DHP:] + bhn))
                h = (1.0 - z) * n + z * h
                if l < num_layers - 1:
                    hs_ref[t * bB:(t + 1) * bB, :] = h     # stage next layer's input in VMEM
            # TODO(synk): training-time dropout between GRU layers not implemented (eval).

        # Head: out_fc(mean over dups of last hidden) folded into one matvec at pack time.
        out_ref[...] = (jnp.dot(h.astype(mm_dtype), w_head_ref[...],
                                preferred_element_type=jnp.float32) + b_head_ref[...])

    return kernel


# ----------------------------- Forward wrapper -----------------------------
@functools.partial(jax.jit,
                   static_argnames=("fea_dim", "kernel_size", "rnn_dim", "rnn_dups",
                                    "rnn_layers", "batch_tile"))
def krnn_forward(x, params, *, fea_dim, kernel_size, rnn_dim, rnn_dups, rnn_layers,
                 batch_tile=None):
    del rnn_dim, rnn_dups                      # layouts are baked into params
    num_layers = len(params["layers"])
    assert num_layers == rnn_layers
    B = x.shape[0]
    x = x.reshape(B, -1, fea_dim).astype(jnp.float32)   # mirrors x.view(B, -1, input_dim)
    T = x.shape[1]
    K = kernel_size
    pad = (K - 1) // 2
    T_out = T + 2 * pad - K + 1
    KF = K * fea_dim
    DHP = params["w_head"].shape[0]            # dup*H rounded up to 128 lanes

    # ---- layout plumbing (fused by XLA): time-major im2col, batch pad + pre-block ----
    x_tm = jnp.transpose(x, (1, 0, 2))                                  # (T, B, F)
    x_tm = jnp.pad(x_tm, ((pad, pad), (0, 0), (0, 0)))
    cols = jnp.concatenate([x_tm[k:k + T_out] for k in range(K)], axis=-1)  # (T_out, B, K*F)

    bB = batch_tile if batch_tile is not None else min(256, _round_up(B, 8))
    bB = max(8, _round_up(bB, 8))
    B_pad = _round_up(B, bB)
    nb = B_pad // bB
    cols = jnp.pad(cols, ((0, 0), (0, B_pad - B), (0, 0)))
    # Pre-block over batch: rows inside a block stay time-major (row = t*bB + b).
    cols = cols.reshape(T_out, nb, bB, KF).transpose(1, 0, 2, 3).reshape(nb, T_out * bB, KF)
    cols = cols.astype(MATMUL_DTYPE)

    flat = []
    for layer in params["layers"]:
        flat.extend(layer)
    flat.extend([params["w_head"], params["b_head"]])

    def _const_spec(a):                        # full-array block, VMEM-resident across grid
        nd = a.ndim
        return pl.BlockSpec(a.shape, lambda i, _nd=nd: (0,) * _nd)

    in_specs = [pl.BlockSpec((None, T_out * bB, KF), lambda i: (i, 0, 0))]
    in_specs += [_const_spec(a) for a in flat]
    out_specs = pl.BlockSpec((bB, 1), lambda i: (i, 0))

    hs_rows = T_out * bB if num_layers > 1 else 8
    scratch_shapes = [pltpu.VMEM((T_out * bB, 3 * DHP), jnp.float32),
                      pltpu.VMEM((hs_rows, DHP), jnp.float32)]

    # Explicit VMEM budget (double-buffered inputs + scratch), capped for v7x's 64 MiB.
    est = 2 * T_out * bB * KF * cols.dtype.itemsize
    est += sum(2 * math.prod(a.shape) * a.dtype.itemsize for a in flat)
    est += 2 * bB * 4
    est += (T_out * bB * 3 * DHP + hs_rows * DHP) * 4
    vmem_limit = int(min(64 << 20, max(16 << 20, 2 * est)))

    kernel = _make_fused_kernel(num_layers, T_out, bB, DHP, MATMUL_DTYPE)

    out = pl.pallas_call(
        kernel,
        out_shape=jax.ShapeDtypeStruct((B_pad, 1), jnp.float32),
        grid_spec=pltpu.PrefetchScalarGridSpec(
            num_scalar_prefetch=0,
            grid=(nb,),
            in_specs=in_specs,
            out_specs=out_specs,
            scratch_shapes=scratch_shapes),
        compiler_params=pltpu.CompilerParams(
            dimension_semantics=("parallel",),
            vmem_limit_bytes=vmem_limit),
    )(cols, *flat)
    return out[:B, 0]                          # .squeeze() -> (B,)


# ----------------------------- Deterministic PyTorch-layout init -----------------------------
def init_params(key, fea_dim, cnn_dim, kernel_size, rnn_dim, rnn_dups, rnn_layers):
    """Raw parameters in PyTorch layouts (nn.Conv1d / nn.GRU / nn.Linear defaults)."""
    keys = iter(jax.random.split(key, 4 + 4 * rnn_layers * rnn_dups))

    def unif(k, shape, bound):
        return jax.random.uniform(k, shape, jnp.float32, -bound, bound)

    conv_bound = 1.0 / math.sqrt(fea_dim * kernel_size)
    conv_w = unif(next(keys), (cnn_dim, fea_dim, kernel_size), conv_bound)   # (O, F, K)
    conv_b = unif(next(keys), (cnn_dim,), conv_bound)

    H = rnn_dim
    g_bound = 1.0 / math.sqrt(H)
    gru = []
    for l in range(rnn_layers):
        din = cnn_dim if l == 0 else H
        per_dup = []
        for _ in range(rnn_dups):
            w_ih = unif(next(keys), (3 * H, din), g_bound)   # rows: [r; z; n]
            w_hh = unif(next(keys), (3 * H, H), g_bound)
            b_ih = unif(next(keys), (3 * H,), g_bound)
            b_hh = unif(next(keys), (3 * H,), g_bound)
            per_dup.append((w_ih, w_hh, b_ih, b_hh))
        gru.append(per_dup)

    fc_bound = 1.0 / math.sqrt(H)
    w_fc = unif(next(keys), (1, H), fc_bound)                # nn.Linear(rnn_dim, 1).weight
    b_fc = unif(next(keys), (1,), fc_bound)

    return dict(conv_w=conv_w, conv_b=conv_b, gru=gru, w_fc=w_fc, b_fc=b_fc)


def pack_params(raw, fea_dim, cnn_dim, kernel_size, rnn_dim, rnn_dups, rnn_layers,
                mm_dtype=MATMUL_DTYPE):
    """Repack PyTorch-layout weights into the fused-kernel layouts.

    Per layer the kernel consumes:
      w_in : (Din, 3*DHP) gate-fused [r|z|n] input->hidden weights; dups concatenated
             (layer 0, conv folded in, Din=K*F) or block-diagonal (layers >= 1, Din=DHP).
      b_in : (1, 3*DHP)   input biases with b_hr / b_hz folded in (sigmoid gates).
      w_hh : (DHP, 3*DHP) gate-fused hidden->hidden weights, block-diagonal over dups.
      b_hn : (1, DHP)     hidden bias of the n-gate (stays inside r*(...)).
    DHP = dup*H rounded up to 128 so every gate slice is lane-tile aligned.
    NOTE(v5e): the block-diag trick assumes DHP fits one MXU tile; for dup*H >> 128 on
    v5e prefer a small static per-dup loop of (B,H)@(H,H) matmuls instead.
    """
    H, dup = rnn_dim, rnn_dups
    DH = dup * H
    DHP = _round_up(DH, 128)
    K, F, C = kernel_size, fea_dim, cnn_dim

    conv_w_km = jnp.transpose(raw["conv_w"], (2, 1, 0)).reshape(K * F, C)   # (K*F, C)
    conv_b = raw["conv_b"].reshape(1, C)

    def gate_rows(mat, g):        # rows [gH:(g+1)H] of a PyTorch (3H, Din) weight
        return mat[g * H:(g + 1) * H]

    def pad_lanes(m):
        return jnp.pad(m, ((0, 0), (0, DHP - m.shape[1])))

    layers = []
    for l in range(rnn_layers):
        per_dup = raw["gru"][l]
        w_in_g, b_in_g, w_hh_g = [], [], []
        b_hn = None
        for g in range(3):                          # 0=r, 1=z, 2=n (PyTorch gate order)
            if l == 0:
                # Shared conv output feeds every dup: concat along output lanes -> (C, DH)
                wih = jnp.concatenate([gate_rows(per_dup[d][0], g).T for d in range(dup)],
                                      axis=1)
            else:
                # Per-dup input: block-diagonal so dup d only reads dup d's columns
                wih = jnp.zeros((DH, DH), jnp.float32)
                for d in range(dup):
                    wih = wih.at[d * H:(d + 1) * H, d * H:(d + 1) * H].set(
                        gate_rows(per_dup[d][0], g).T)
            whh = jnp.zeros((DH, DH), jnp.float32)
            for d in range(dup):
                whh = whh.at[d * H:(d + 1) * H, d * H:(d + 1) * H].set(
                    gate_rows(per_dup[d][1], g).T)
            bih = jnp.concatenate([per_dup[d][2][g * H:(g + 1) * H]
                                   for d in range(dup)]).reshape(1, DH)
            bhh = jnp.concatenate([per_dup[d][3][g * H:(g + 1) * H]
                                   for d in range(dup)]).reshape(1, DH)

            if l == 0:
                # Fold the conv (affine) into layer-0's input projection (affine).
                w_full = conv_w_km @ wih                        # (K*F, DH)
                b_full = conv_b @ wih + bih
            else:
                w_full = jnp.pad(wih, ((0, DHP - DH), (0, 0)))  # pad input rows DH -> DHP
                b_full = bih
            if g in (0, 1):
                b_full = b_full + bhh      # sigmoid gates: fold b_hr / b_hz into input bias
            else:
                b_hn = pad_lanes(bhh)      # n-gate hidden bias stays separate
            w_in_g.append(pad_lanes(w_full))
            b_in_g.append(pad_lanes(b_full))
            w_hh_g.append(pad_lanes(jnp.pad(whh, ((0, DHP - DH), (0, 0)))))

        layers.append((jnp.concatenate(w_in_g, axis=1).astype(mm_dtype),   # (Din, 3*DHP)
                       jnp.concatenate(b_in_g, axis=1),                    # (1, 3*DHP) f32
                       jnp.concatenate(w_hh_g, axis=1).astype(mm_dtype),   # (DHP, 3*DHP)
                       b_hn))                                              # (1, DHP)   f32

    # Head: out_fc(mean over dups) == h_cat @ (tile(w_fc.T, dup) / dup) + b_fc
    w_head = jnp.tile(raw["w_fc"].T, (dup, 1)) / float(dup)                # (DH, 1)
    w_head = jnp.pad(w_head, ((0, DHP - DH), (0, 0))).astype(mm_dtype)     # (DHP, 1)
    b_head = raw["b_fc"].reshape(1, 1)

    return dict(layers=layers, w_head=w_head, b_head=b_head)


# ----------------------------- Pure-JAX f32 reference (for sanity) -----------------------------
def krnn_reference(x, raw, *, fea_dim, kernel_size, rnn_dim, rnn_dups, rnn_layers):
    B = x.shape[0]
    x = x.reshape(B, -1, fea_dim)
    T = x.shape[1]
    K = kernel_size
    pad = (K - 1) // 2
    T_out = T + 2 * pad - K + 1
    x_tm = jnp.transpose(x, (1, 0, 2))
    x_tm = jnp.pad(x_tm, ((pad, pad), (0, 0), (0, 0)))
    cols = jnp.concatenate([x_tm[k:k + T_out] for k in range(K)], axis=-1)   # (T_out, B, K*F)
    w_km = jnp.transpose(raw["conv_w"], (2, 1, 0)).reshape(K * fea_dim, -1)
    seq = cols @ w_km + raw["conv_b"]                                        # (T_out, B, C)

    H = rnn_dim
    h_last_sum = 0.0
    for d in range(rnn_dups):
        inp = seq
        for l in range(rnn_layers):
            w_ih, w_hh, b_ih, b_hh = raw["gru"][l][d]
            h = jnp.zeros((B, H), jnp.float32)
            outs = []
            for t in range(T_out):
                gi = inp[t] @ w_ih.T + b_ih
                gh = h @ w_hh.T + b_hh
                r = jax.nn.sigmoid(gi[:, :H] + gh[:, :H])
                z = jax.nn.sigmoid(gi[:, H:2 * H] + gh[:, H:2 * H])
                n = jnp.tanh(gi[:, 2 * H:] + r * gh[:, 2 * H:])
                h = (1.0 - z) * n + z * h
                outs.append(h)
            inp = jnp.stack(outs, axis=0)
        h_last_sum = h_last_sum + inp[-1]
    h_mean = h_last_sum / rnn_dups
    return (h_mean @ raw["w_fc"].T + raw["b_fc"])[:, 0]


if __name__ == "__main__":
    # Small shapes consistent with the module.
    B, T, fea_dim = 8, 8, 8
    cnn_dim, cnn_kernel_size = 16, 3
    rnn_dim, rnn_dups, rnn_layers = 32, 2, 2

    key = jax.random.PRNGKey(0)
    kx, kp = jax.random.split(key)
    x = jax.random.normal(kx, (B, T, fea_dim), jnp.float32)

    raw = init_params(kp, fea_dim, cnn_dim, cnn_kernel_size, rnn_dim, rnn_dups, rnn_layers)
    params = pack_params(raw, fea_dim, cnn_dim, cnn_kernel_size, rnn_dim, rnn_dups, rnn_layers)

    out = krnn_forward(x, params, fea_dim=fea_dim, kernel_size=cnn_kernel_size,
                       rnn_dim=rnn_dim, rnn_dups=rnn_dups, rnn_layers=rnn_layers)
    out = jax.block_until_ready(out)
    assert out.shape == (B,)

    ref = jax.block_until_ready(
        krnn_reference(x, raw, fea_dim=fea_dim, kernel_size=cnn_kernel_size,
                       rnn_dim=rnn_dim, rnn_dups=rnn_dups, rnn_layers=rnn_layers))
    max_err = float(jnp.max(jnp.abs(out - ref)))
    # bf16 MXU inputs with f32 accumulation -> small deviation vs the f32 reference.
    assert max_err < 5e-2, f"mismatch vs f32 reference: max_err={max_err}"
    print("KERNEL_OK")
</pallas_src>

<mosaic_0001>
module attributes {stable_mosaic.version = 11 : i64} {
  func.func @kernel(%arg0: i32, %arg1: memref<1x64x24xbf16, #tpu.memory_space<vmem>>, %arg2: memref<24x384xbf16, #tpu.memory_space<vmem>>, %arg3: memref<1x384xf32, #tpu.memory_space<vmem>>, %arg4: memref<128x384xbf16, #tpu.memory_space<vmem>>, %arg5: memref<1x128xf32, #tpu.memory_space<vmem>>, %arg6: memref<128x384xbf16, #tpu.memory_space<vmem>>, %arg7: memref<1x384xf32, #tpu.memory_space<vmem>>, %arg8: memref<128x384xbf16, #tpu.memory_space<vmem>>, %arg9: memref<1x128xf32, #tpu.memory_space<vmem>>, %arg10: memref<128x1xbf16, #tpu.memory_space<vmem>>, %arg11: memref<1x1xf32, #tpu.memory_space<vmem>>, %arg12: memref<8x1xf32, #tpu.memory_space<vmem>>, %arg13: memref<64x384xf32, #tpu.memory_space<vmem>>, %arg14: memref<64x128xf32, #tpu.memory_space<vmem>>) attributes {dimension_semantics = [#tpu.dimension_semantics<parallel>], iteration_bounds = array<i64: 1>, scalar_prefetch = 0 : i64, scratch_operands = 2 : i64, tpu.core_type = #tpu.core_type<tc>, window_params = [{transform_indices = @transform_0, window_bounds = array<i64: 1, 64, 24>}, {pipeline_mode = #tpu.pipeline_mode<synchronous>, transform_indices = @transform_1, window_bounds = array<i64: 24, 384>}, {pipeline_mode = #tpu.pipeline_mode<synchronous>, transform_indices = @transform_2, window_bounds = array<i64: 1, 384>}, {pipeline_mode = #tpu.pipeline_mode<synchronous>, transform_indices = @transform_3, window_bounds = array<i64: 128, 384>}, {pipeline_mode = #tpu.pipeline_mode<synchronous>, transform_indices = @transform_4, window_bounds = array<i64: 1, 128>}, {pipeline_mode = #tpu.pipeline_mode<synchronous>, transform_indices = @transform_5, window_bounds = array<i64: 128, 384>}, {pipeline_mode = #tpu.pipeline_mode<synchronous>, transform_indices = @transform_6, window_bounds = array<i64: 1, 384>}, {pipeline_mode = #tpu.pipeline_mode<synchronous>, transform_indices = @transform_7, window_bounds = array<i64: 128, 384>}, {pipeline_mode = #tpu.pipeline_mode<synchronous>, transform_indices = @transform_8, window_bounds = array<i64: 1, 128>}, {pipeline_mode = #tpu.pipeline_mode<synchronous>, transform_indices = @transform_9, window_bounds = array<i64: 128, 1>}, {pipeline_mode = #tpu.pipeline_mode<synchronous>, transform_indices = @transform_10, window_bounds = array<i64: 1, 1>}, {transform_indices = @transform_11, window_bounds = array<i64: 8, 1>}]} {
    %c0 = arith.constant 0 : index
    %c0_0 = arith.constant 0 : index
    %c0_1 = arith.constant 0 : index
    %0 = vector.load %arg1[%c0, %c0_0, %c0_1] : memref<1x64x24xbf16, #tpu.memory_space<vmem>>, vector<1x64x24xbf16>
    %1 = vector.shape_cast %0 : vector<1x64x24xbf16> to vector<64x24xbf16>
    %c0_2 = arith.constant 0 : index
    %c0_3 = arith.constant 0 : index
    %2 = vector.load %arg2[%c0_2, %c0_3] : memref<24x384xbf16, #tpu.memory_space<vmem>>, vector<24x384xbf16>
    %cst = arith.constant dense<0.000000e+00> : vector<64x384xf32>
    %3 = tpu.matmul %1, %2, %cst {dimension_numbers = #tpu.dot_dimension_numbers<[1], [0], [0], [1], [0, 0, 1, 1], [], []>} : vector<64x24xbf16>, vector<24x384xbf16>, vector<64x384xf32> -> vector<64x384xf32>
    %c0_4 = arith.constant 0 : index
    %c0_5 = arith.constant 0 : index
    %4 = vector.load %arg3[%c0_4, %c0_5] : memref<1x384xf32, #tpu.memory_space<vmem>>, vector<1x384xf32>
    %5 = vector.broadcast %4 : vector<1x384xf32> to vector<64x384xf32>
    %6 = arith.addf %3, %5 : vector<64x384xf32>
    %c0_6 = arith.constant 0 : index
    %c0_7 = arith.constant 0 : index
    %7 = vector.load %arg13[%c0_6, %c0_7] : memref<64x384xf32, #tpu.memory_space<vmem>>, vector<64x384xf32>
    tpu.vector_store %arg13[%c0_6, %c0_7], %6 {strides = array<i32>} : memref<64x384xf32, #tpu.memory_space<vmem>>, vector<64x384xf32>,
    %c0_8 = arith.constant 0 : index
    %c0_9 = arith.constant 0 : index
    %8 = vector.load %arg4[%c0_8, %c0_9] : memref<128x384xbf16, #tpu.memory_space<vmem>>, vector<128x384xbf16>
    %c0_10 = arith.constant 0 : index
    %c0_11 = arith.constant 0 : index
    %9 = vector.load %arg5[%c0_10, %c0_11] : memref<1x128xf32, #tpu.memory_space<vmem>>, vector<1x128xf32>
    %cst_12 = arith.constant 0.000000e+00 : f32
    %10 = vector.broadcast %cst_12 : f32 to vector<8x128xf32>
    %c0_13 = arith.constant 0 : index
    %c0_14 = arith.constant 0 : index
    %11 = vector.load %arg13[%c0_13, %c0_14] : memref<64x384xf32, #tpu.memory_space<vmem>>, vector<8x384xf32>
    %12 = vector.extract_strided_slice %11 {offsets = [0, 0], sizes = [8, 128], strides = [1, 1]} : vector<8x384xf32> to vector<8x128xf32>
    %13 = vector.extract_strided_slice %11 {offsets = [0, 128], sizes = [8, 128], strides = [1, 1]} : vector<8x384xf32> to vector<8x128xf32>
    %14 = vector.extract_strided_slice %11 {offsets = [0, 256], sizes = [8, 128], strides = [1, 1]} : vector<8x384xf32> to vector<8x128xf32>
    %15 = arith.negf %12 : vector<8x128xf32>
    %16 = math.exp %15 : vector<8x128xf32>
    %cst_15 = arith.constant 1.000000e+00 : f32
    %17 = vector.broadcast %cst_15 : f32 to vector<8x128xf32>
    %18 = arith.addf %17, %16 : vector<8x128xf32>
    %19 = arith.divf %17, %18 : vector<8x128xf32>
    %20 = arith.negf %13 : vector<8x128xf32>
    %21 = math.exp %20 : vector<8x128xf32>
    %cst_16 = arith.constant 1.000000e+00 : f32
    %22 = vector.broadcast %cst_16 : f32 to vector<8x128xf32>
    %23 = arith.addf %22, %21 : vector<8x128xf32>
    %24 = arith.divf %22, %23 : vector<8x128xf32>
    %25 = vector.broadcast %9 : vector<1x128xf32> to vector<8x128xf32>
    %26 = arith.mulf %19, %25 : vector<8x128xf32>
    %27 = arith.addf %14, %26 : vector<8x128xf32>
    %28 = math.tanh %27 : vector<8x128xf32>
    %cst_17 = arith.constant 1.000000e+00 : f32
    %29 = vector.broadcast %cst_17 : f32 to vector<8x128xf32>
    %30 = arith.subf %29, %24 : vector<8x128xf32>
    %31 = arith.mulf %30, %28 : vector<8x128xf32>
    %32 = arith.mulf %24, %10 : vector<8x128xf32>
    %33 = arith.addf %31, %32 : vector<8x128xf32>
    %c0_18 = arith.constant 0 : index
    %c0_19 = arith.constant 0 : index
    %34 = vector.load %arg14[%c0_18, %c0_19] : memref<64x128xf32, #tpu.memory_space<vmem>>, vector<8x128xf32>
    tpu.vector_store %arg14[%c0_18, %c0_19], %33 {strides = array<i32>} : memref<64x128xf32, #tpu.memory_space<vmem>>, vector<8x128xf32>,
    %c8 = arith.constant 8 : index
    %c0_20 = arith.constant 0 : index
    %35 = vector.load %arg13[%c8, %c0_20] : memref<64x384xf32, #tpu.memory_space<vmem>>, vector<8x384xf32>
    %36 = vector.extract_strided_slice %35 {offsets = [0, 0], sizes = [8, 128], strides = [1, 1]} : vector<8x384xf32> to vector<8x128xf32>
    %37 = vector.extract_strided_slice %35 {offsets = [0, 128], sizes = [8, 128], strides = [1, 1]} : vector<8x384xf32> to vector<8x128xf32>
    %38 = vector.extract_strided_slice %35 {offsets = [0, 256], sizes = [8, 128], strides = [1, 1]} : vector<8x384xf32> to vector<8x128xf32>
    %39 = arith.truncf %33 : vector<8x128xf32> to vector<8x128xbf16>
    %cst_21 = arith.constant dense<0.000000e+00> : vector<8x384xf32>
    %40 = tpu.matmul %39, %8, %cst_21 {dimension_numbers = #tpu.dot_dimension_numbers<[1], [0], [0], [1], [0, 0, 1, 1], [], []>} : vector<8x128xbf16>, vector<128x384xbf16>, vector<8x384xf32> -> vector<8x384xf32>
    %41 = vector.extract_strided_slice %40 {offsets = [0, 0], sizes = [8, 128], strides = [1, 1]} : vector<8x384xf32> to vector<8x128xf32>
    %42 = arith.addf %36, %41 : vector<8x128xf32>
    %43 = arith.negf %42 : vector<8x128xf32>
    %44 = math.exp %43 : vector<8x128xf32>
    %cst_22 = arith.constant 1.000000e+00 : f32
    %45 = vector.broadcast %cst_22 : f32 to vector<8x128xf32>
    %46 = arith.addf %45, %44 : vector<8x128xf32>
    %47 = arith.divf %45, %46 : vector<8x128xf32>
    %48 = vector.extract_strided_slice %40 {offsets = [0, 128], sizes = [8, 128], strides = [1, 1]} : vector<8x384xf32> to vector<8x128xf32>
    %49 = arith.addf %37, %48 : vector<8x128xf32>
    %50 = arith.negf %49 : vector<8x128xf32>
    %51 = math.exp %50 : vector<8x128xf32>
    %cst_23 = arith.constant 1.000000e+00 : f32
    %52 = vector.broadcast %cst_23 : f32 to vector<8x128xf32>
    %53 = arith.addf %52, %51 : vector<8x128xf32>
    %54 = arith.divf %52, %53 : vector<8x128xf32>
    %55 = vector.extract_strided_slice %40 {offsets = [0, 256], sizes = [8, 128], strides = [1, 1]} : vector<8x384xf32> to vector<8x128xf32>
    %56 = vector.broadcast %9 : vector<1x128xf32> to vector<8x128xf32>
    %57 = arith.addf %55, %56 : vector<8x128xf32>
    %58 = arith.mulf %47, %57 : vector<8x128xf32>
    %59 = arith.addf %38, %58 : vector<8x128xf32>
    %60 = math.tanh %59 : vector<8x128xf32>
    %cst_24 = arith.constant 1.000000e+00 : f32
    %61 = vector.broadcast %cst_24 : f32 to vector<8x128xf32>
    %62 = arith.subf %61, %54 : vector<8x128xf32>
    %63 = arith.mulf %62, %60 : vector<8x128xf32>
    %64 = arith.mulf %54, %33 : vector<8x128xf32>
    %65 = arith.addf %63, %64 : vector<8x128xf32>
    %c8_25 = arith.constant 8 : index
    %c0_26 = arith.constant 0 : index
    %66 = vector.load %arg14[%c8_25, %c0_26] : memref<64x128xf32, #tpu.memory_space<vmem>>, vector<8x128xf32>
    tpu.vector_store %arg14[%c8_25, %c0_26], %65 {strides = array<i32>} : memref<64x128xf32, #tpu.memory_space<vmem>>, vector<8x128xf32>,
    %c16 = arith.constant 16 : index
    %c0_27 = arith.constant 0 : index
    %67 = vector.load %arg13[%c16, %c0_27] : memref<64x384xf32, #tpu.memory_space<vmem>>, vector<8x384xf32>
    %68 = vector.extract_strided_slice %67 {offsets = [0, 0], sizes = [8, 128], strides = [1, 1]} : vector<8x384xf32> to vector<8x128xf32>
    %69 = vector.extract_strided_slice %67 {offsets = [0, 128], sizes = [8, 128], strides = [1, 1]} : vector<8x384xf32> to vector<8x128xf32>
    %70 = vector.extract_strided_slice %67 {offsets = [0, 256], sizes = [8, 128], strides = [1, 1]} : vector<8x384xf32> to vector<8x128xf32>
    %71 = arith.truncf %65 : vector<8x128xf32> to vector<8x128xbf16>
    %cst_28 = arith.constant dense<0.000000e+00> : vector<8x384xf32>
    %72 = tpu.matmul %71, %8, %cst_28 {dimension_numbers = #tpu.dot_dimension_numbers<[1], [0], [0], [1], [0, 0, 1, 1], [], []>} : vector<8x128xbf16>, vector<128x384xbf16>, vector<8x384xf32> -> vector<8x384xf32>
    %73 = vector.extract_strided_slice %72 {offsets = [0, 0], sizes = [8, 128], strides = [1, 1]} : vector<8x384xf32> to vector<8x128xf32>
    %74 = arith.addf %68, %73 : vector<8x128xf32>
    %75 = arith.negf %74 : vector<8x128xf32>
    %76 = math.exp %75 : vector<8x128xf32>
    %cst_29 = arith.constant 1.000000e+00 : f32
    %77 = vector.broadcast %cst_29 : f32 to vector<8x128xf32>
    %78 = arith.addf %77, %76 : vector<8x128xf32>
    %79 = arith.divf %77, %78 : vector<8x128xf32>
    %80 = vector.extract_strided_slice %72 {offsets = [0, 128], sizes = [8, 128], strides = [1, 1]} : vector<8x384xf32> to vector<8x128xf32>
    %81 = arith.addf %69, %80 : vector<8x128xf32>
    %82 = arith.negf %81 : vector<8x128xf32>
    %83 = math.exp %82 : vector<8x128xf32>
    %cst_30 = arith.constant 1.000000e+00 : f32
    %84 = vector.broadcast %cst_30 : f32 to vector<8x128xf32>
    %85 = arith.addf %84, %83 : vector<8x128xf32>
    %86 = arith.divf %84, %85 : vector<8x128xf32>
    %87 = vector.extract_strided_slice %72 {offsets = [0, 256], sizes = [8, 128], strides = [1, 1]} : vector<8x384xf32> to vector<8x128xf32>
    %88 = vector.broadcast %9 : vector<1x128xf32> to vector<8x128xf32>
    %89 = arith.addf %87, %88 : vector<8x128xf32>
    %90 = arith.mulf %79, %89 : vector<8x128xf32>
    %91 = arith.addf %70, %90 : vector<8x128xf32>
    %92 = math.tanh %91 : vector<8x128xf32>
    %cst_31 = arith.constant 1.000000e+00 : f32
    %93 = vector.broadcast %cst_31 : f32 to vector<8x128xf32>
    %94 = arith.subf %93, %86 : vector<8x128xf32>
    %95 = arith.mulf %94, %92 : vector<8x128xf32>
    %96 = arith.mulf %86, %65 : vector<8x128xf32>
    %97 = arith.addf %95, %96 : vector<8x128xf32>
    %c16_32 = arith.constant 16 : index
    %c0_33 = arith.constant 0 : index
    %98 = vector.load %arg14[%c16_32, %c0_33] : memref<64x128xf32, #tpu.memory_space<vmem>>, vector<8x128xf32>
    tpu.vector_store %arg14[%c16_32, %c0_33], %97 {strides = array<i32>} : memref<64x128xf32, #tpu.memory_space<vmem>>, vector<8x128xf32>,
    %c24 = arith.constant 24 : index
    %c0_34 = arith.constant 0 : index
    %99 = vector.load %arg13[%c24, %c0_34] : memref<64x384xf32, #tpu.memory_space<vmem>>, vector<8x384xf32>
    %100 = vector.extract_strided_slice %99 {offsets = [0, 0], sizes = [8, 128], strides = [1, 1]} : vector<8x384xf32> to vector<8x128xf32>
    %101 = vector.extract_strided_slice %99 {offsets = [0, 128], sizes = [8, 128], strides = [1, 1]} : vector<8x384xf32> to vector<8x128xf32>
    %102 = vector.extract_strided_slice %99 {offsets = [0, 256], sizes = [8, 128], strides = [1, 1]} : vector<8x384xf32> to vector<8x128xf32>
    %103 = arith.truncf %97 : vector<8x128xf32> to vector<8x128xbf16>
    %cst_35 = arith.constant dense<0.000000e+00> : vector<8x384xf32>
    %104 = tpu.matmul %103, %8, %cst_35 {dimension_numbers = #tpu.dot_dimension_numbers<[1], [0], [0], [1], [0, 0, 1, 1], [], []>} : vector<8x128xbf16>, vector<128x384xbf16>, vector<8x384xf32> -> vector<8x384xf32>
    %105 = vector.extract_strided_slice %104 {offsets = [0, 0], sizes = [8, 128], strides = [1, 1]} : vector<8x384xf32> to vector<8x128xf32>
    %106 = arith.addf %100, %105 : vector<8x128xf32>
    %107 = arith.negf %106 : vector<8x128xf32>
    %108 = math.exp %107 : vector<8x128xf32>
    %cst_36 = arith.constant 1.000000e+00 : f32
    %109 = vector.broadcast %cst_36 : f32 to vector<8x128xf32>
    %110 = arith.addf %109, %108 : vector<8x128xf32>
    %111 = arith.divf %109, %110 : vector<8x128xf32>
    %112 = vector.extract_strided_slice %104 {offsets = [0, 128], sizes = [8, 128], strides = [1, 1]} : vector<8x384xf32> to vector<8x128xf32>
    %113 = arith.addf %101, %112 : vector<8x128xf32>
    %114 = arith.negf %113 : vector<8x128xf32>
    %115 = math.exp %114 : vector<8x128xf32>
    %cst_37 = arith.constant 1.000000e+00 : f32
    %116 = vector.broadcast %cst_37 : f32 to vector<8x128xf32>
    %117 = arith.addf %116, %115 : vector<8x128xf32>
    %118 = arith.divf %116, %117 : vector<8x128xf32>
    %119 = vector.extract_strided_slice %104 {offsets = [0, 256], sizes = [8, 128], strides = [1, 1]} : vector<8x384xf32> to vector<8x128xf32>
    %120 = vector.broadcast %9 : vector<1x128xf32> to vector<8x128xf32>
    %121 = arith.addf %119, %120 : vector<8x128xf32>
    %122 = arith.mulf %111, %121 : vector<8x128xf32>
    %123 = arith.addf %102, %122 : vector<8x128xf32>
    %124 = math.tanh %123 : vector<8x128xf32>
    %cst_38 = arith.constant 1.000000e+00 : f32
    %125 = vector.broadcast %cst_38 : f32 to vector<8x128xf32>
    %126 = arith.subf %125, %118 : vector<8x128xf32>
    %127 = arith.mulf %126, %124 : vector<8x128xf32>
    %128 = arith.mulf %118, %97 : vector<8x128xf32>
    %129 = arith.addf %127, %128 : vector<8x128xf32>
    %c24_39 = arith.constant 24 : index
    %c0_40 = arith.constant 0 : index
    %130 = vector.load %arg14[%c24_39, %c0_40] : memref<64x128xf32, #tpu.memory_space<vmem>>, vector<8x128xf32>
    tpu.vector_store %arg14[%c24_39, %c0_40], %129 {strides = array<i32>} : memref<64x128xf32, #tpu.memory_space<vmem>>, vector<8x128xf32>,
    %c32 = arith.constant 32 : index
    %c0_41 = arith.constant 0 : index
    %131 = vector.load %arg13[%c32, %c0_41] : memref<64x384xf32, #tpu.memory_space<vmem>>, vector<8x384xf32>
    %132 = vector.extract_strided_slice %131 {offsets = [0, 0], sizes = [8, 128], strides = [1, 1]} : vector<8x384xf32> to vector<8x128xf32>
    %133 = vector.extract_strided_slice %131 {offsets = [0, 128], sizes = [8, 128], strides = [1, 1]} : vector<8x384xf32> to vector<8x128xf32>
    %134 = vector.extract_strided_slice %131 {offsets = [0, 256], sizes = [8, 128], strides = [1, 1]} : vector<8x384xf32> to vector<8x128xf32>
    %135 = arith.truncf %129 : vector<8x128xf32> to vector<8x128xbf16>
    %cst_42 = arith.constant dense<0.000000e+00> : vector<8x384xf32>
    %136 = tpu.matmul %135, %8, %cst_42 {dimension_numbers = #tpu.dot_dimension_numbers<[1], [0], [0], [1], [0, 0, 1, 1], [], []>} : vector<8x128xbf16>, vector<128x384xbf16>, vector<8x384xf32> -> vector<8x384xf32>
    %137 = vector.extract_strided_slice %136 {offsets = [0, 0], sizes = [8, 128], strides = [1, 1]} : vector<8x384xf32> to vector<8x128xf32>
    %138 = arith.addf %132, %137 : vector<8x128xf32>
    %139 = arith.negf %138 : vector<8x128xf32>
    %140 = math.exp %139 : vector<8x128xf32>
    %cst_43 = arith.constant 1.000000e+00 : f32
    %141 = vector.broadcast %cst_43 : f32 to vector<8x128xf32>
    %142 = arith.addf %141, %140 : vector<8x128xf32>
    %143 = arith.divf %141, %142 : vector<8x128xf32>
    %144 = vector.extract_strided_slice %136 {offsets = [0, 128], sizes = [8, 128], strides = [1, 1]} : vector<8x384xf32> to vector<8x128xf32>
    %145 = arith.addf %133, %144 : vector<8x128xf32>
    %146 = arith.negf %145 : vector<8x128xf32>
    %147 = math.exp %146 : vector<8x128xf32>
    %cst_44 = arith.constant 1.000000e+00 : f32
    %148 = vector.broadcast %cst_44 : f32 to vector<8x128xf32>
    %149 = arith.addf %148, %147 : vector<8x128xf32>
    %150 = arith.divf %148, %149 : vector<8x128xf32>
    %151 = vector.extract_strided_slice %136 {offsets = [0, 256], sizes = [8, 128], strides = [1, 1]} : vector<8x384xf32> to vector<8x128xf32>
    %152 = vector.broadcast %9 : vector<1x128xf32> to vector<8x128xf32>
    %153 = arith.addf %151, %152 : vector<8x128xf32>
    %154 = arith.mulf %143, %153 : vector<8x128xf32>
    %155 = arith.addf %134, %154 : vector<8x128xf32>
    %156 = math.tanh %155 : vector<8x128xf32>
    %cst_45 = arith.constant 1.000000e+00 : f32
    %157 = vector.broadcast %cst_45 : f32 to vector<8x128xf32>
    %158 = arith.subf %157, %150 : vector<8x128xf32>
    %159 = arith.mulf %158, %156 : vector<8x128xf32>
    %160 = arith.mulf %150, %129 : vector<8x128xf32>
    %161 = arith.addf %159, %160 : vector<8x128xf32>
    %c32_46 = arith.constant 32 : index
    %c0_47 = arith.constant 0 : index
    %162 = vector.load %arg14[%c32_46, %c0_47] : memref<64x128xf32, #tpu.memory_space<vmem>>, vector<8x128xf32>
    tpu.vector_store %arg14[%c32_46, %c0_47], %161 {strides = array<i32>} : memref<64x128xf32, #tpu.memory_space<vmem>>, vector<8x128xf32>,
    %c40 = arith.constant 40 : index
    %c0_48 = arith.constant 0 : index
    %163 = vector.load %arg13[%c40, %c0_48] : memref<64x384xf32, #tpu.memory_space<vmem>>, vector<8x384xf32>
    %164 = vector.extract_strided_slice %163 {offsets = [0, 0], sizes = [8, 128], strides = [1, 1]} : vector<8x384xf32> to vector<8x128xf32>
    %165 = vector.extract_strided_slice %163 {offsets = [0, 128], sizes = [8, 128], strides = [1, 1]} : vector<8x384xf32> to vector<8x128xf32>
    %166 = vector.extract_strided_slice %163 {offsets = [0, 256], sizes = [8, 128], strides = [1, 1]} : vector<8x384xf32> to vector<8x128xf32>
    %167 = arith.truncf %161 : vector<8x128xf32> to vector<8x128xbf16>
    %cst_49 = arith.constant dense<0.000000e+00> : vector<8x384xf32>
    %168 = tpu.matmul %167, %8, %cst_49 {dimension_numbers = #tpu.dot_dimension_numbers<[1], [0], [0], [1], [0, 0, 1, 1], [], []>} : vector<8x128xbf16>, vector<128x384xbf16>, vector<8x384xf32> -> vector<8x384xf32>
    %169 = vector.extract_strided_slice %168 {offsets = [0, 0], sizes = [8, 128], strides = [1, 1]} : vector<8x384xf32> to vector<8x128xf32>
    %170 = arith.addf %164, %169 : vector<8x128xf32>
    %171 = arith.negf %170 : vector<8x128xf32>
    %172 = math.exp %171 : vector<8x128xf32>
    %cst_50 = arith.constant 1.000000e+00 : f32
    %173 = vector.broadcast %cst_50 : f32 to vector<8x128xf32>
    %174 = arith.addf %173, %172 : vector<8x128xf32>
    %175 = arith.divf %173, %174 : vector<8x128xf32>
    %176 = vector.extract_strided_slice %168 {offsets = [0, 128], sizes = [8, 128], strides = [1, 1]} : vector<8x384xf32> to vector<8x128xf32>
    %177 = arith.addf %165, %176 : vector<8x128xf32>
    %178 = arith.negf %177 : vector<8x128xf32>
    %179 = math.exp %178 : vector<8x128xf32>
    %cst_51 = arith.constant 1.000000e+00 : f32
    %180 = vector.broadcast %cst_51 : f32 to vector<8x128xf32>
    %181 = arith.addf %180, %179 : vector<8x128xf32>
    %182 = arith.divf %180, %181 : vector<8x128xf32>
    %183 = vector.extract_strided_slice %168 {offsets = [0, 256], sizes = [8, 128], strides = [1, 1]} : vector<8x384xf32> to vector<8x128xf32>
    %184 = vector.broadcast %9 : vector<1x128xf32> to vector<8x128xf32>
    %185 = arith.addf %183, %184 : vector<8x128xf32>
    %186 = arith.mulf %175, %185 : vector<8x128xf32>
    %187 = arith.addf %166, %186 : vector<8x128xf32>
    %188 = math.tanh %187 : vector<8x128xf32>
    %cst_52 = arith.constant 1.000000e+00 : f32
    %189 = vector.broadcast %cst_52 : f32 to vector<8x128xf32>
    %190 = arith.subf %189, %182 : vector<8x128xf32>
    %191 = arith.mulf %190, %188 : vector<8x128xf32>
    %192 = arith.mulf %182, %161 : vector<8x128xf32>
    %193 = arith.addf %191, %192 : vector<8x128xf32>
    %c40_53 = arith.constant 40 : index
    %c0_54 = arith.constant 0 : index
    %194 = vector.load %arg14[%c40_53, %c0_54] : memref<64x128xf32, #tpu.memory_space<vmem>>, vector<8x128xf32>
    tpu.vector_store %arg14[%c40_53, %c0_54], %193 {strides = array<i32>} : memref<64x128xf32, #tpu.memory_space<vmem>>, vector<8x128xf32>,
    %c48 = arith.constant 48 : index
    %c0_55 = arith.constant 0 : index
    %195 = vector.load %arg13[%c48, %c0_55] : memref<64x384xf32, #tpu.memory_space<vmem>>, vector<8x384xf32>
    %196 = vector.extract_strided_slice %195 {offsets = [0, 0], sizes = [8, 128], strides = [1, 1]} : vector<8x384xf32> to vector<8x128xf32>
    %197 = vector.extract_strided_slice %195 {offsets = [0, 128], sizes = [8, 128], strides = [1, 1]} : vector<8x384xf32> to vector<8x128xf32>
    %198 = vector.extract_strided_slice %195 {offsets = [0, 256], sizes = [8, 128], strides = [1, 1]} : vector<8x384xf32> to vector<8x128xf32>
    %199 = arith.truncf %193 : vector<8x128xf32> to vector<8x128xbf16>
    %cst_56 = arith.constant dense<0.000000e+00> : vector<8x384xf32>
    %200 = tpu.matmul %199, %8, %cst_56 {dimension_numbers = #tpu.dot_dimension_numbers<[1], [0], [0], [1], [0, 0, 1, 1], [], []>} : vector<8x128xbf16>, vector<128x384xbf16>, vector<8x384xf32> -> vector<8x384xf32>
    %201 = vector.extract_strided_slice %200 {offsets = [0, 0], sizes = [8, 128], strides = [1, 1]} : vector<8x384xf32> to vector<8x128xf32>
    %202 = arith.addf %196, %201 : vector<8x128xf32>
    %203 = arith.negf %202 : vector<8x128xf32>
    %204 = math.exp %203 : vector<8x128xf32>
    %cst_57 = arith.constant 1.000000e+00 : f32
    %205 = vector.broadcast %cst_57 : f32 to vector<8x128xf32>
    %206 = arith.addf %205, %204 : vector<8x128xf32>
    %207 = arith.divf %205, %206 : vector<8x128xf32>
    %208 = vector.extract_strided_slice %200 {offsets = [0, 128], sizes = [8, 128], strides = [1, 1]} : vector<8x384xf32> to vector<8x128xf32>
    %209 = arith.addf %197, %208 : vector<8x128xf32>
    %210 = arith.negf %209 : vector<8x128xf32>
    %211 = math.exp %210 : vector<8x128xf32>
    %cst_58 = arith.constant 1.000000e+00 : f32
    %212 = vector.broadcast %cst_58 : f32 to vector<8x128xf32>
    %213 = arith.addf %212, %211 : vector<8x128xf32>
    %214 = arith.divf %212, %213 : vector<8x128xf32>
    %215 = vector.extract_strided_slice %200 {offsets = [0, 256], sizes = [8, 128], strides = [1, 1]} : vector<8x384xf32> to vector<8x128xf32>
    %216 = vector.broadcast %9 : vector<1x128xf32> to vector<8x128xf32>
    %217 = arith.addf %215, %216 : vector<8x128xf32>
    %218 = arith.mulf %207, %217 : vector<8x128xf32>
    %219 = arith.addf %198, %218 : vector<8x128xf32>
    %220 = math.tanh %219 : vector<8x128xf32>
    %cst_59 = arith.constant 1.000000e+00 : f32
    %221 = vector.broadcast %cst_59 : f32 to vector<8x128xf32>
    %222 = arith.subf %221, %214 : vector<8x128xf32>
    %223 = arith.mulf %222, %220 : vector<8x128xf32>
    %224 = arith.mulf %214, %193 : vector<8x128xf32>
    %225 = arith.addf %223, %224 : vector<8x128xf32>
    %c48_60 = arith.constant 48 : index
    %c0_61 = arith.constant 0 : index
    %226 = vector.load %arg14[%c48_60, %c0_61] : memref<64x128xf32, #tpu.memory_space<vmem>>, vector<8x128xf32>
    tpu.vector_store %arg14[%c48_60, %c0_61], %225 {strides = array<i32>} : memref<64x128xf32, #tpu.memory_space<vmem>>, vector<8x128xf32>,
    %c56 = arith.constant 56 : index
    %c0_62 = arith.constant 0 : index
    %227 = vector.load %arg13[%c56, %c0_62] : memref<64x384xf32, #tpu.memory_space<vmem>>, vector<8x384xf32>
    %228 = vector.extract_strided_slice %227 {offsets = [0, 0], sizes = [8, 128], strides = [1, 1]} : vector<8x384xf32> to vector<8x128xf32>
    %229 = vector.extract_strided_slice %227 {offsets = [0, 128], sizes = [8, 128], strides = [1, 1]} : vector<8x384xf32> to vector<8x128xf32>
    %230 = vector.extract_strided_slice %227 {offsets = [0, 256], sizes = [8, 128], strides = [1, 1]} : vector<8x384xf32> to vector<8x128xf32>
    %231 = arith.truncf %225 : vector<8x128xf32> to vector<8x128xbf16>
    %cst_63 = arith.constant dense<0.000000e+00> : vector<8x384xf32>
    %232 = tpu.matmul %231, %8, %cst_63 {dimension_numbers = #tpu.dot_dimension_numbers<[1], [0], [0], [1], [0, 0, 1, 1], [], []>} : vector<8x128xbf16>, vector<128x384xbf16>, vector<8x384xf32> -> vector<8x384xf32>
    %233 = vector.extract_strided_slice %232 {offsets = [0, 0], sizes = [8, 128], strides = [1, 1]} : vector<8x384xf32> to vector<8x128xf32>
    %234 = arith.addf %228, %233 : vector<8x128xf32>
    %235 = arith.negf %234 : vector<8x128xf32>
    %236 = math.exp %235 : vector<8x128xf32>
    %cst_64 = arith.constant 1.000000e+00 : f32
    %237 = vector.broadcast %cst_64 : f32 to vector<8x128xf32>
    %238 = arith.addf %237, %236 : vector<8x128xf32>
    %239 = arith.divf %237, %238 : vector<8x128xf32>
    %240 = vector.extract_strided_slice %232 {offsets = [0, 128], sizes = [8, 128], strides = [1, 1]} : vector<8x384xf32> to vector<8x128xf32>
    %241 = arith.addf %229, %240 : vector<8x128xf32>
    %242 = arith.negf %241 : vector<8x128xf32>
    %243 = math.exp %242 : vector<8x128xf32>
    %cst_65 = arith.constant 1.000000e+00 : f32
    %244 = vector.broadcast %cst_65 : f32 to vector<8x128xf32>
    %245 = arith.addf %244, %243 : vector<8x128xf32>
    %246 = arith.divf %244, %245 : vector<8x128xf32>
    %247 = vector.extract_strided_slice %232 {offsets = [0, 256], sizes = [8, 128], strides = [1, 1]} : vector<8x384xf32> to vector<8x128xf32>
    %248 = vector.broadcast %9 : vector<1x128xf32> to vector<8x128xf32>
    %249 = arith.addf %247, %248 : vector<8x128xf32>
    %250 = arith.mulf %239, %249 : vector<8x128xf32>
    %251 = arith.addf %230, %250 : vector<8x128xf32>
    %252 = math.tanh %251 : vector<8x128xf32>
    %cst_66 = arith.constant 1.000000e+00 : f32
    %253 = vector.broadcast %cst_66 : f32 to vector<8x128xf32>
    %254 = arith.subf %253, %246 : vector<8x128xf32>
    %255 = arith.mulf %254, %252 : vector<8x128xf32>
    %256 = arith.mulf %246, %225 : vector<8x128xf32>
    %257 = arith.addf %255, %256 : vector<8x128xf32>
    %c56_67 = arith.constant 56 : index
    %c0_68 = arith.constant 0 : index
    %258 = vector.load %arg14[%c56_67, %c0_68] : memref<64x128xf32, #tpu.memory_space<vmem>>, vector<8x128xf32>
    tpu.vector_store %arg14[%c56_67, %c0_68], %257 {strides = array<i32>} : memref<64x128xf32, #tpu.memory_space<vmem>>, vector<8x128xf32>,
    %c0_69 = arith.constant 0 : index
    %c0_70 = arith.constant 0 : index
    %259 = vector.load %arg14[%c0_69, %c0_70] : memref<64x128xf32, #tpu.memory_space<vmem>>, vector<64x128xf32>
    %260 = arith.truncf %259 : vector<64x128xf32> to vector<64x128xbf16>
    %c0_71 = arith.constant 0 : index
    %c0_72 = arith.constant 0 : index
    %261 = vector.load %arg6[%c0_71, %c0_72] : memref<128x384xbf16, #tpu.memory_space<vmem>>, vector<128x384xbf16>
    %cst_73 = arith.constant dense<0.000000e+00> : vector<64x384xf32>
    %262 = tpu.matmul %260, %261, %cst_73 {dimension_numbers = #tpu.dot_dimension_numbers<[1], [0], [0], [1], [0, 0, 1, 1], [], []>} : vector<64x128xbf16>, vector<128x384xbf16>, vector<64x384xf32> -> vector<64x384xf32>
    %c0_74 = arith.constant 0 : index
    %c0_75 = arith.constant 0 : index
    %263 = vector.load %arg7[%c0_74, %c0_75] : memref<1x384xf32, #tpu.memory_space<vmem>>, vector<1x384xf32>
    %264 = vector.broadcast %263 : vector<1x384xf32> to vector<64x384xf32>
    %265 = arith.addf %262, %264 : vector<64x384xf32>
    %c0_76 = arith.constant 0 : index
    %c0_77 = arith.constant 0 : index
    %266 = vector.load %arg13[%c0_76, %c0_77] : memref<64x384xf32, #tpu.memory_space<vmem>>, vector<64x384xf32>
    tpu.vector_store %arg13[%c0_76, %c0_77], %265 {strides = array<i32>} : memref<64x384xf32, #tpu.memory_space<vmem>>, vector<64x384xf32>,
    %c0_78 = arith.constant 0 : index
    %c0_79 = arith.constant 0 : index
    %267 = vector.load %arg8[%c0_78, %c0_79] : memref<128x384xbf16, #tpu.memory_space<vmem>>, vector<128x384xbf16>
    %c0_80 = arith.constant 0 : index
    %c0_81 = arith.constant 0 : index
    %268 = vector.load %arg9[%c0_80, %c0_81] : memref<1x128xf32, #tpu.memory_space<vmem>>, vector<1x128xf32>
    %cst_82 = arith.constant 0.000000e+00 : f32
    %269 = vector.broadcast %cst_82 : f32 to vector<8x128xf32>
    %c0_83 = arith.constant 0 : index
    %c0_84 = arith.constant 0 : index
    %270 = vector.load %arg13[%c0_83, %c0_84] : memref<64x384xf32, #tpu.memory_space<vmem>>, vector<8x384xf32>
    %271 = vector.extract_strided_slice %270 {offsets = [0, 0], sizes = [8, 128], strides = [1, 1]} : vector<8x384xf32> to vector<8x128xf32>
    %272 = vector.extract_strided_slice %270 {offsets = [0, 128], sizes = [8, 128], strides = [1, 1]} : vector<8x384xf32> to vector<8x128xf32>
    %273 = vector.extract_strided_slice %270 {offsets = [0, 256], sizes = [8, 128], strides = [1, 1]} : vector<8x384xf32> to vector<8x128xf32>
    %274 = arith.negf %271 : vector<8x128xf32>
    %275 = math.exp %274 : vector<8x128xf32>
    %cst_85 = arith.constant 1.000000e+00 : f32
    %276 = vector.broadcast %cst_85 : f32 to vector<8x128xf32>
    %277 = arith.addf %276, %275 : vector<8x128xf32>
    %278 = arith.divf %276, %277 : vector<8x128xf32>
    %279 = arith.negf %272 : vector<8x128xf32>
    %280 = math.exp %279 : vector<8x128xf32>
    %cst_86 = arith.constant 1.000000e+00 : f32
    %281 = vector.broadcast %cst_86 : f32 to vector<8x128xf32>
    %282 = arith.addf %281, %280 : vector<8x128xf32>
    %283 = arith.divf %281, %282 : vector<8x128xf32>
    %284 = vector.broadcast %268 : vector<1x128xf32> to vector<8x128xf32>
    %285 = arith.mulf %278, %284 : vector<8x128xf32>
    %286 = arith.addf %273, %285 : vector<8x128xf32>
    %287 = math.tanh %286 : vector<8x128xf32>
    %cst_87 = arith.constant 1.000000e+00 : f32
    %288 = vector.broadcast %cst_87 : f32 to vector<8x128xf32>
    %289 = arith.subf %288, %283 : vector<8x128xf32>
    %290 = arith.mulf %289, %287 : vector<8x128xf32>
    %291 = arith.mulf %283, %269 : vector<8x128xf32>
    %292 = arith.addf %290, %291 : vector<8x128xf32>
    %c8_88 = arith.constant 8 : index
    %c0_89 = arith.constant 0 : index
    %293 = vector.load %arg13[%c8_88, %c0_89] : memref<64x384xf32, #tpu.memory_space<vmem>>, vector<8x384xf32>
    %294 = vector.extract_strided_slice %293 {offsets = [0, 0], sizes = [8, 128], strides = [1, 1]} : vector<8x384xf32> to vector<8x128xf32>
    %295 = vector.extract_strided_slice %293 {offsets = [0, 128], sizes = [8, 128], strides = [1, 1]} : vector<8x384xf32> to vector<8x128xf32>
    %296 = vector.extract_strided_slice %293 {offsets = [0, 256], sizes = [8, 128], strides = [1, 1]} : vector<8x384xf32> to vector<8x128xf32>
    %297 = arith.truncf %292 : vector<8x128xf32> to vector<8x128xbf16>
    %cst_90 = arith.constant dense<0.000000e+00> : vector<8x384xf32>
    %298 = tpu.matmul %297, %267, %cst_90 {dimension_numbers = #tpu.dot_dimension_numbers<[1], [0], [0], [1], [0, 0, 1, 1], [], []>} : vector<8x128xbf16>, vector<128x384xbf16>, vector<8x384xf32> -> vector<8x384xf32>
    %299 = vector.extract_strided_slice %298 {offsets = [0, 0], sizes = [8, 128], strides = [1, 1]} : vector<8x384xf32> to vector<8x128xf32>
    %300 = arith.addf %294, %299 : vector<8x128xf32>
    %301 = arith.negf %300 : vector<8x128xf32>
    %302 = math.exp %301 : vector<8x128xf32>
    %cst_91 = arith.constant 1.000000e+00 : f32
    %303 = vector.broadcast %cst_91 : f32 to vector<8x128xf32>
    %304 = arith.addf %303, %302 : vector<8x128xf32>
    %305 = arith.divf %303, %304 : vector<8x128xf32>
    %306 = vector.extract_strided_slice %298 {offsets = [0, 128], sizes = [8, 128], strides = [1, 1]} : vector<8x384xf32> to vector<8x128xf32>
    %307 = arith.addf %295, %306 : vector<8x128xf32>
    %308 = arith.negf %307 : vector<8x128xf32>
    %309 = math.exp %308 : vector<8x128xf32>
    %cst_92 = arith.constant 1.000000e+00 : f32
    %310 = vector.broadcast %cst_92 : f32 to vector<8x128xf32>
    %311 = arith.addf %310, %309 : vector<8x128xf32>
    %312 = arith.divf %310, %311 : vector<8x128xf32>
    %313 = vector.extract_strided_slice %298 {offsets = [0, 256], sizes = [8, 128], strides = [1, 1]} : vector<8x384xf32> to vector<8x128xf32>
    %314 = vector.broadcast %268 : vector<1x128xf32> to vector<8x128xf32>
    %315 = arith.addf %313, %314 : vector<8x128xf32>
    %316 = arith.mulf %305, %315 : vector<8x128xf32>
    %317 = arith.addf %296, %316 : vector<8x128xf32>
    %318 = math.tanh %317 : vector<8x128xf32>
    %cst_93 = arith.constant 1.000000e+00 : f32
    %319 = vector.broadcast %cst_93 : f32 to vector<8x128xf32>
    %320 = arith.subf %319, %312 : vector<8x128xf32>
    %321 = arith.mulf %320, %318 : vector<8x128xf32>
    %322 = arith.mulf %312, %292 : vector<8x128xf32>
    %323 = arith.addf %321, %322 : vector<8x128xf32>
    %c16_94 = arith.constant 16 : index
    %c0_95 = arith.constant 0 : index
    %324 = vector.load %arg13[%c16_94, %c0_95] : memref<64x384xf32, #tpu.memory_space<vmem>>, vector<8x384xf32>
    %325 = vector.extract_strided_slice %324 {offsets = [0, 0], sizes = [8, 128], strides = [1, 1]} : vector<8x384xf32> to vector<8x128xf32>
    %326 = vector.extract_strided_slice %324 {offsets = [0, 128], sizes = [8, 128], strides = [1, 1]} : vector<8x384xf32> to vector<8x128xf32>
    %327 = vector.extract_strided_slice %324 {offsets = [0, 256], sizes = [8, 128], strides = [1, 1]} : vector<8x384xf32> to vector<8x128xf32>
    %328 = arith.truncf %323 : vector<8x128xf32> to vector<8x128xbf16>
    %cst_96 = arith.constant dense<0.000000e+00> : vector<8x384xf32>
    %329 = tpu.matmul %328, %267, %cst_96 {dimension_numbers = #tpu.dot_dimension_numbers<[1], [0], [0], [1], [0, 0, 1, 1], [], []>} : vector<8x128xbf16>, vector<128x384xbf16>, vector<8x384xf32> -> vector<8x384xf32>
    %330 = vector.extract_strided_slice %329 {offsets = [0, 0], sizes = [8, 128], strides = [1, 1]} : vector<8x384xf32> to vector<8x128xf32>
    %331 = arith.addf %325, %330 : vector<8x128xf32>
    %332 = arith.negf %331 : vector<8x128xf32>
    %333 = math.exp %332 : vector<8x128xf32>
    %cst_97 = arith.constant 1.000000e+00 : f32
    %334 = vector.broadcast %cst_97 : f32 to vector<8x128xf32>
    %335 = arith.addf %334, %333 : vector<8x128xf32>
    %336 = arith.divf %334, %335 : vector<8x128xf32>
    %337 = vector.extract_strided_slice %329 {offsets = [0, 128], sizes = [8, 128], strides = [1, 1]} : vector<8x384xf32> to vector<8x128xf32>
    %338 = arith.addf %326, %337 : vector<8x128xf32>
    %339 = arith.negf %338 : vector<8x128xf32>
    %340 = math.exp %339 : vector<8x128xf32>
    %cst_98 = arith.constant 1.000000e+00 : f32
    %341 = vector.broadcast %cst_98 : f32 to vector<8x128xf32>
    %342 = arith.addf %341, %340 : vector<8x128xf32>
    %343 = arith.divf %341, %342 : vector<8x128xf32>
    %344 = vector.extract_strided_slice %329 {offsets = [0, 256], sizes = [8, 128], strides = [1, 1]} : vector<8x384xf32> to vector<8x128xf32>
    %345 = vector.broadcast %268 : vector<1x128xf32> to vector<8x128xf32>
    %346 = arith.addf %344, %345 : vector<8x128xf32>
    %347 = arith.mulf %336, %346 : vector<8x128xf32>
    %348 = arith.addf %327, %347 : vector<8x128xf32>
    %349 = math.tanh %348 : vector<8x128xf32>
    %cst_99 = arith.constant 1.000000e+00 : f32
    %350 = vector.broadcast %cst_99 : f32 to vector<8x128xf32>
    %351 = arith.subf %350, %343 : vector<8x128xf32>
    %352 = arith.mulf %351, %349 : vector<8x128xf32>
    %353 = arith.mulf %343, %323 : vector<8x128xf32>
    %354 = arith.addf %352, %353 : vector<8x128xf32>
    %c24_100 = arith.constant 24 : index
    %c0_101 = arith.constant 0 : index
    %355 = vector.load %arg13[%c24_100, %c0_101] : memref<64x384xf32, #tpu.memory_space<vmem>>, vector<8x384xf32>
    %356 = vector.extract_strided_slice %355 {offsets = [0, 0], sizes = [8, 128], strides = [1, 1]} : vector<8x384xf32> to vector<8x128xf32>
    %357 = vector.extract_strided_slice %355 {offsets = [0, 128], sizes = [8, 128], strides = [1, 1]} : vector<8x384xf32> to vector<8x128xf32>
    %358 = vector.extract_strided_slice %355 {offsets = [0, 256], sizes = [8, 128], strides = [1, 1]} : vector<8x384xf32> to vector<8x128xf32>
    %359 = arith.truncf %354 : vector<8x128xf32> to vector<8x128xbf16>
    %cst_102 = arith.constant dense<0.000000e+00> : vector<8x384xf32>
    %360 = tpu.matmul %359, %267, %cst_102 {dimension_numbers = #tpu.dot_dimension_numbers<[1], [0], [0], [1], [0, 0, 1, 1], [], []>} : vector<8x128xbf16>, vector<128x384xbf16>, vector<8x384xf32> -> vector<8x384xf32>
    %361 = vector.extract_strided_slice %360 {offsets = [0, 0], sizes = [8, 128], strides = [1, 1]} : vector<8x384xf32> to vector<8x128xf32>
    %362 = arith.addf %356, %361 : vector<8x128xf32>
    %363 = arith.negf %362 : vector<8x128xf32>
    %364 = math.exp %363 : vector<8x128xf32>
    %cst_103 = arith.constant 1.000000e+00 : f32
    %365 = vector.broadcast %cst_103 : f32 to vector<8x128xf32>
    %366 = arith.addf %365, %364 : vector<8x128xf32>
    %367 = arith.divf %365, %366 : vector<8x128xf32>
    %368 = vector.extract_strided_slice %360 {offsets = [0, 128], sizes = [8, 128], strides = [1, 1]} : vector<8x384xf32> to vector<8x128xf32>
    %369 = arith.addf %357, %368 : vector<8x128xf32>
    %370 = arith.negf %369 : vector<8x128xf32>
    %371 = math.exp %370 : vector<8x128xf32>
    %cst_104 = arith.constant 1.000000e+00 : f32
    %372 = vector.broadcast %cst_104 : f32 to vector<8x128xf32>
    %373 = arith.addf %372, %371 : vector<8x128xf32>
    %374 = arith.divf %372, %373 : vector<8x128xf32>
    %375 = vector.extract_strided_slice %360 {offsets = [0, 256], sizes = [8, 128], strides = [1, 1]} : vector<8x384xf32> to vector<8x128xf32>
    %376 = vector.broadcast %268 : vector<1x128xf32> to vector<8x128xf32>
    %377 = arith.addf %375, %376 : vector<8x128xf32>
    %378 = arith.mulf %367, %377 : vector<8x128xf32>
    %379 = arith.addf %358, %378 : vector<8x128xf32>
    %380 = math.tanh %379 : vector<8x128xf32>
    %cst_105 = arith.constant 1.000000e+00 : f32
    %381 = vector.broadcast %cst_105 : f32 to vector<8x128xf32>
    %382 = arith.subf %381, %374 : vector<8x128xf32>
    %383 = arith.mulf %382, %380 : vector<8x128xf32>
    %384 = arith.mulf %374, %354 : vector<8x128xf32>
    %385 = arith.addf %383, %384 : vector<8x128xf32>
    %c32_106 = arith.constant 32 : index
    %c0_107 = arith.constant 0 : index
    %386 = vector.load %arg13[%c32_106, %c0_107] : memref<64x384xf32, #tpu.memory_space<vmem>>, vector<8x384xf32>
    %387 = vector.extract_strided_slice %386 {offsets = [0, 0], sizes = [8, 128], strides = [1, 1]} : vector<8x384xf32> to vector<8x128xf32>
    %388 = vector.extract_strided_slice %386 {offsets = [0, 128], sizes = [8, 128], strides = [1, 1]} : vector<8x384xf32> to vector<8x128xf32>
    %389 = vector.extract_strided_slice %386 {offsets = [0, 256], sizes = [8, 128], strides = [1, 1]} : vector<8x384xf32> to vector<8x128xf32>
    %390 = arith.truncf %385 : vector<8x128xf32> to vector<8x128xbf16>
    %cst_108 = arith.constant dense<0.000000e+00> : vector<8x384xf32>
    %391 = tpu.matmul %390, %267, %cst_108 {dimension_numbers = #tpu.dot_dimension_numbers<[1], [0], [0], [1], [0, 0, 1, 1], [], []>} : vector<8x128xbf16>, vector<128x384xbf16>, vector<8x384xf32> -> vector<8x384xf32>
    %392 = vector.extract_strided_slice %391 {offsets = [0, 0], sizes = [8, 128], strides = [1, 1]} : vector<8x384xf32> to vector<8x128xf32>
    %393 = arith.addf %387, %392 : vector<8x128xf32>
    %394 = arith.negf %393 : vector<8x128xf32>
    %395 = math.exp %394 : vector<8x128xf32>
    %cst_109 = arith.constant 1.000000e+00 : f32
    %396 = vector.broadcast %cst_109 : f32 to vector<8x128xf32>
    %397 = arith.addf %396, %395 : vector<8x128xf32>
    %398 = arith.divf %396, %397 : vector<8x128xf32>
    %399 = vector.extract_strided_slice %391 {offsets = [0, 128], sizes = [8, 128], strides = [1, 1]} : vector<8x384xf32> to vector<8x128xf32>
    %400 = arith.addf %388, %399 : vector<8x128xf32>
    %401 = arith.negf %400 : vector<8x128xf32>
    %402 = math.exp %401 : vector<8x128xf32>
    %cst_110 = arith.constant 1.000000e+00 : f32
    %403 = vector.broadcast %cst_110 : f32 to vector<8x128xf32>
    %404 = arith.addf %403, %402 : vector<8x128xf32>
    %405 = arith.divf %403, %404 : vector<8x128xf32>
    %406 = vector.extract_strided_slice %391 {offsets = [0, 256], sizes = [8, 128], strides = [1, 1]} : vector<8x384xf32> to vector<8x128xf32>
    %407 = vector.broadcast %268 : vector<1x128xf32> to vector<8x128xf32>
    %408 = arith.addf %406, %407 : vector<8x128xf32>
    %409 = arith.mulf %398, %408 : vector<8x128xf32>
    %410 = arith.addf %389, %409 : vector<8x128xf32>
    %411 = math.tanh %410 : vector<8x128xf32>
    %cst_111 = arith.constant 1.000000e+00 : f32
    %412 = vector.broadcast %cst_111 : f32 to vector<8x128xf32>
    %413 = arith.subf %412, %405 : vector<8x128xf32>
    %414 = arith.mulf %413, %411 : vector<8x128xf32>
    %415 = arith.mulf %405, %385 : vector<8x128xf32>
    %416 = arith.addf %414, %415 : vector<8x128xf32>
    %c40_112 = arith.constant 40 : index
    %c0_113 = arith.constant 0 : index
    %417 = vector.load %arg13[%c40_112, %c0_113] : memref<64x384xf32, #tpu.memory_space<vmem>>, vector<8x384xf32>
    %418 = vector.extract_strided_slice %417 {offsets = [0, 0], sizes = [8, 128], strides = [1, 1]} : vector<8x384xf32> to vector<8x128xf32>
    %419 = vector.extract_strided_slice %417 {offsets = [0, 128], sizes = [8, 128], strides = [1, 1]} : vector<8x384xf32> to vector<8x128xf32>
    %420 = vector.extract_strided_slice %417 {offsets = [0, 256], sizes = [8, 128], strides = [1, 1]} : vector<8x384xf32> to vector<8x128xf32>
    %421 = arith.truncf %416 : vector<8x128xf32> to vector<8x128xbf16>
    %cst_114 = arith.constant dense<0.000000e+00> : vector<8x384xf32>
    %422 = tpu.matmul %421, %267, %cst_114 {dimension_numbers = #tpu.dot_dimension_numbers<[1], [0], [0], [1], [0, 0, 1, 1], [], []>} : vector<8x128xbf16>, vector<128x384xbf16>, vector<8x384xf32> -> vector<8x384xf32>
    %423 = vector.extract_strided_slice %422 {offsets = [0, 0], sizes = [8, 128], strides = [1, 1]} : vector<8x384xf32> to vector<8x128xf32>
    %424 = arith.addf %418, %423 : vector<8x128xf32>
    %425 = arith.negf %424 : vector<8x128xf32>
    %426 = math.exp %425 : vector<8x128xf32>
    %cst_115 = arith.constant 1.000000e+00 : f32
    %427 = vector.broadcast %cst_115 : f32 to vector<8x128xf32>
    %428 = arith.addf %427, %426 : vector<8x128xf32>
    %429 = arith.divf %427, %428 : vector<8x128xf32>
    %430 = vector.extract_strided_slice %422 {offsets = [0, 128], sizes = [8, 128], strides = [1, 1]} : vector<8x384xf32> to vector<8x128xf32>
    %431 = arith.addf %419, %430 : vector<8x128xf32>
    %432 = arith.negf %431 : vector<8x128xf32>
    %433 = math.exp %432 : vector<8x128xf32>
    %cst_116 = arith.constant 1.000000e+00 : f32
    %434 = vector.broadcast %cst_116 : f32 to vector<8x128xf32>
    %435 = arith.addf %434, %433 : vector<8x128xf32>
    %436 = arith.divf %434, %435 : vector<8x128xf32>
    %437 = vector.extract_strided_slice %422 {offsets = [0, 256], sizes = [8, 128], strides = [1, 1]} : vector<8x384xf32> to vector<8x128xf32>
    %438 = vector.broadcast %268 : vector<1x128xf32> to vector<8x128xf32>
    %439 = arith.addf %437, %438 : vector<8x128xf32>
    %440 = arith.mulf %429, %439 : vector<8x128xf32>
    %441 = arith.addf %420, %440 : vector<8x128xf32>
    %442 = math.tanh %441 : vector<8x128xf32>
    %cst_117 = arith.constant 1.000000e+00 : f32
    %443 = vector.broadcast %cst_117 : f32 to vector<8x128xf32>
    %444 = arith.subf %443, %436 : vector<8x128xf32>
    %445 = arith.mulf %444, %442 : vector<8x128xf32>
    %446 = arith.mulf %436, %416 : vector<8x128xf32>
    %447 = arith.addf %445, %446 : vector<8x128xf32>
    %c48_118 = arith.constant 48 : index
    %c0_119 = arith.constant 0 : index
    %448 = vector.load %arg13[%c48_118, %c0_119] : memref<64x384xf32, #tpu.memory_space<vmem>>, vector<8x384xf32>
    %449 = vector.extract_strided_slice %448 {offsets = [0, 0], sizes = [8, 128], strides = [1, 1]} : vector<8x384xf32> to vector<8x128xf32>
    %450 = vector.extract_strided_slice %448 {offsets = [0, 128], sizes = [8, 128], strides = [1, 1]} : vector<8x384xf32> to vector<8x128xf32>
    %451 = vector.extract_strided_slice %448 {offsets = [0, 256], sizes = [8, 128], strides = [1, 1]} : vector<8x384xf32> to vector<8x128xf32>
    %452 = arith.truncf %447 : vector<8x128xf32> to vector<8x128xbf16>
    %cst_120 = arith.constant dense<0.000000e+00> : vector<8x384xf32>
    %453 = tpu.matmul %452, %267, %cst_120 {dimension_numbers = #tpu.dot_dimension_numbers<[1], [0], [0], [1], [0, 0, 1, 1], [], []>} : vector<8x128xbf16>, vector<128x384xbf16>, vector<8x384xf32> -> vector<8x384xf32>
    %454 = vector.extract_strided_slice %453 {offsets = [0, 0], sizes = [8, 128], strides = [1, 1]} : vector<8x384xf32> to vector<8x128xf32>
    %455 = arith.addf %449, %454 : vector<8x128xf32>
    %456 = arith.negf %455 : vector<8x128xf32>
    %457 = math.exp %456 : vector<8x128xf32>
    %cst_121 = arith.constant 1.000000e+00 : f32
    %458 = vector.broadcast %cst_121 : f32 to vector<8x128xf32>
    %459 = arith.addf %458, %457 : vector<8x128xf32>
    %460 = arith.divf %458, %459 : vector<8x128xf32>
    %461 = vector.extract_strided_slice %453 {offsets = [0, 128], sizes = [8, 128], strides = [1, 1]} : vector<8x384xf32> to vector<8x128xf32>
    %462 = arith.addf %450, %461 : vector<8x128xf32>
    %463 = arith.negf %462 : vector<8x128xf32>
    %464 = math.exp %463 : vector<8x128xf32>
    %cst_122 = arith.constant 1.000000e+00 : f32
    %465 = vector.broadcast %cst_122 : f32 to vector<8x128xf32>
    %466 = arith.addf %465, %464 : vector<8x128xf32>
    %467 = arith.divf %465, %466 : vector<8x128xf32>
    %468 = vector.extract_strided_slice %453 {offsets = [0, 256], sizes = [8, 128], strides = [1, 1]} : vector<8x384xf32> to vector<8x128xf32>
    %469 = vector.broadcast %268 : vector<1x128xf32> to vector<8x128xf32>
    %470 = arith.addf %468, %469 : vector<8x128xf32>
    %471 = arith.mulf %460, %470 : vector<8x128xf32>
    %472 = arith.addf %451, %471 : vector<8x128xf32>
    %473 = math.tanh %472 : vector<8x128xf32>
    %cst_123 = arith.constant 1.000000e+00 : f32
    %474 = vector.broadcast %cst_123 : f32 to vector<8x128xf32>
    %475 = arith.subf %474, %467 : vector<8x128xf32>
    %476 = arith.mulf %475, %473 : vector<8x128xf32>
    %477 = arith.mulf %467, %447 : vector<8x128xf32>
    %478 = arith.addf %476, %477 : vector<8x128xf32>
    %c56_124 = arith.constant 56 : index
    %c0_125 = arith.constant 0 : index
    %479 = vector.load %arg13[%c56_124, %c0_125] : memref<64x384xf32, #tpu.memory_space<vmem>>, vector<8x384xf32>
    %480 = vector.extract_strided_slice %479 {offsets = [0, 0], sizes = [8, 128], strides = [1, 1]} : vector<8x384xf32> to vector<8x128xf32>
    %481 = vector.extract_strided_slice %479 {offsets = [0, 128], sizes = [8, 128], strides = [1, 1]} : vector<8x384xf32> to vector<8x128xf32>
    %482 = vector.extract_strided_slice %479 {offsets = [0, 256], sizes = [8, 128], strides = [1, 1]} : vector<8x384xf32> to vector<8x128xf32>
    %483 = arith.truncf %478 : vector<8x128xf32> to vector<8x128xbf16>
    %cst_126 = arith.constant dense<0.000000e+00> : vector<8x384xf32>
    %484 = tpu.matmul %483, %267, %cst_126 {dimension_numbers = #tpu.dot_dimension_numbers<[1], [0], [0], [1], [0, 0, 1, 1], [], []>} : vector<8x128xbf16>, vector<128x384xbf16>, vector<8x384xf32> -> vector<8x384xf32>
    %485 = vector.extract_strided_slice %484 {offsets = [0, 0], sizes = [8, 128], strides = [1, 1]} : vector<8x384xf32> to vector<8x128xf32>
    %486 = arith.addf %480, %485 : vector<8x128xf32>
    %487 = arith.negf %486 : vector<8x128xf32>
    %488 = math.exp %487 : vector<8x128xf32>
    %cst_127 = arith.constant 1.000000e+00 : f32
    %489 = vector.broadcast %cst_127 : f32 to vector<8x128xf32>
    %490 = arith.addf %489, %488 : vector<8x128xf32>
    %491 = arith.divf %489, %490 : vector<8x128xf32>
    %492 = vector.extract_strided_slice %484 {offsets = [0, 128], sizes = [8, 128], strides = [1, 1]} : vector<8x384xf32> to vector<8x128xf32>
    %493 = arith.addf %481, %492 : vector<8x128xf32>
    %494 = arith.negf %493 : vector<8x128xf32>
    %495 = math.exp %494 : vector<8x128xf32>
    %cst_128 = arith.constant 1.000000e+00 : f32
    %496 = vector.broadcast %cst_128 : f32 to vector<8x128xf32>
    %497 = arith.addf %496, %495 : vector<8x128xf32>
    %498 = arith.divf %496, %497 : vector<8x128xf32>
    %499 = vector.extract_strided_slice %484 {offsets = [0, 256], sizes = [8, 128], strides = [1, 1]} : vector<8x384xf32> to vector<8x128xf32>
    %500 = vector.broadcast %268 : vector<1x128xf32> to vector<8x128xf32>
    %501 = arith.addf %499, %500 : vector<8x128xf32>
    %502 = arith.mulf %491, %501 : vector<8x128xf32>
    %503 = arith.addf %482, %502 : vector<8x128xf32>
    %504 = math.tanh %503 : vector<8x128xf32>
    %cst_129 = arith.constant 1.000000e+00 : f32
    %505 = vector.broadcast %cst_129 : f32 to vector<8x128xf32>
    %506 = arith.subf %505, %498 : vector<8x128xf32>
    %507 = arith.mulf %506, %504 : vector<8x128xf32>
    %508 = arith.mulf %498, %478 : vector<8x128xf32>
    %509 = arith.addf %507, %508 : vector<8x128xf32>
    %510 = arith.truncf %509 : vector<8x128xf32> to vector<8x128xbf16>
    %c0_130 = arith.constant 0 : index
    %c0_131 = arith.constant 0 : index
    %511 = vector.load %arg10[%c0_130, %c0_131] : memref<128x1xbf16, #tpu.memory_space<vmem>>, vector<128x1xbf16>
    %cst_132 = arith.constant dense<0.000000e+00> : vector<8x1xf32>
    %512 = tpu.matmul %510, %511, %cst_132 {dimension_numbers = #tpu.dot_dimension_numbers<[1], [0], [0], [1], [0, 0, 1, 1], [], []>} : vector<8x128xbf16>, vector<128x1xbf16>, vector<8x1xf32> -> vector<8x1xf32>
    %c0_133 = arith.constant 0 : index
    %c0_134 = arith.constant 0 : index
    %513 = vector.load %arg11[%c0_133, %c0_134] : memref<1x1xf32, #tpu.memory_space<vmem>>, vector<1x1xf32>
    %514 = vector.broadcast %513 : vector<1x1xf32> to vector<8x1xf32>
    %515 = arith.addf %512, %514 : vector<8x1xf32>
    %c0_135 = arith.constant 0 : index
    %c0_136 = arith.constant 0 : index
    %516 = vector.load %arg12[%c0_135, %c0_136] : memref<8x1xf32, #tpu.memory_space<vmem>>, vector<8x1xf32>
    tpu.vector_store %arg12[%c0_135, %c0_136], %515 {strides = array<i32>} : memref<8x1xf32, #tpu.memory_space<vmem>>, vector<8x1xf32>,
    return
  }
  func.func @transform_0(%arg0: i32) -> (i32, i32, i32) {
    %c0_i32 = arith.constant 0 : i32
    %c0_i32_0 = arith.constant 0 : i32
    %c0_i32_1 = arith.constant 0 : i32
    return %arg0, %c0_i32, %c0_i32_0 : i32, i32, i32
  }
  func.func @transform_1(%arg0: i32) -> (i32, i32) {
    %c0_i32 = arith.constant 0 : i32
    %c0_i32_0 = arith.constant 0 : i32
    %c0_i32_1 = arith.constant 0 : i32
    return %c0_i32, %c0_i32_0 : i32, i32
  }
  func.func @transform_2(%arg0: i32) -> (i32, i32) {
    %c0_i32 = arith.constant 0 : i32
    %c0_i32_0 = arith.constant 0 : i32
    %c0_i32_1 = arith.constant 0 : i32
    return %c0_i32, %c0_i32_0 : i32, i32
  }
  func.func @transform_3(%arg0: i32) -> (i32, i32) {
    %c0_i32 = arith.constant 0 : i32
    %c0_i32_0 = arith.constant 0 : i32
    %c0_i32_1 = arith.constant 0 : i32
    return %c0_i32, %c0_i32_0 : i32, i32
  }
  func.func @transform_4(%arg0: i32) -> (i32, i32) {
    %c0_i32 = arith.constant 0 : i32
    %c0_i32_0 = arith.constant 0 : i32
    %c0_i32_1 = arith.constant 0 : i32
    return %c0_i32, %c0_i32_0 : i32, i32
  }
  func.func @transform_5(%arg0: i32) -> (i32, i32) {
    %c0_i32 = arith.constant 0 : i32
    %c0_i32_0 = arith.constant 0 : i32
    %c0_i32_1 = arith.constant 0 : i32
    return %c0_i32, %c0_i32_0 : i32, i32
  }
  func.func @transform_6(%arg0: i32) -> (i32, i32) {
    %c0_i32 = arith.constant 0 : i32
    %c0_i32_0 = arith.constant 0 : i32
    %c0_i32_1 = arith.constant 0 : i32
    return %c0_i32, %c0_i32_0 : i32, i32
  }
  func.func @transform_7(%arg0: i32) -> (i32, i32) {
    %c0_i32 = arith.constant 0 : i32
    %c0_i32_0 = arith.constant 0 : i32
    %c0_i32_1 = arith.constant 0 : i32
    return %c0_i32, %c0_i32_0 : i32, i32
  }
  func.func @transform_8(%arg0: i32) -> (i32, i32) {
    %c0_i32 = arith.constant 0 : i32
    %c0_i32_0 = arith.constant 0 : i32
    %c0_i32_1 = arith.constant 0 : i32
    return %c0_i32, %c0_i32_0 : i32, i32
  }
  func.func @transform_9(%arg0: i32) -> (i32, i32) {
    %c0_i32 = arith.constant 0 : i32
    %c0_i32_0 = arith.constant 0 : i32
    %c0_i32_1 = arith.constant 0 : i32
    return %c0_i32, %c0_i32_0 : i32, i32
  }
  func.func @transform_10(%arg0: i32) -> (i32, i32) {
    %c0_i32 = arith.constant 0 : i32
    %c0_i32_0 = arith.constant 0 : i32
    %c0_i32_1 = arith.constant 0 : i32
    return %c0_i32, %c0_i32_0 : i32, i32
  }
  func.func @transform_11(%arg0: i32) -> (i32, i32) {
    %c0_i32 = arith.constant 0 : i32
    %c0_i32_0 = arith.constant 0 : i32
    return %arg0, %c0_i32 : i32, i32
  }
}

</mosaic_0001>

<bundles_post_ra>
// kernel: krnn_forward.1
= control target key start
LH: loop header
LB: loop body
LE: loop exit
PB: predicated region body
PF: predicated region fallthrough
CT: control target
= control target key end

     0   :  { %s4803_s0 = inlined_call_operand.vmem [shape: bf16[1,64,24], index: 0, kind: input, shape index: {}]   ;;  %s4804_s1 = inlined_call_operand.vmem [shape: bf16[24,384], index: 1, kind: input, shape index: {}]   ;;  %s4805_s2 = inlined_call_operand.vmem [shape: f32[1,384], index: 2, kind: input, shape index: {}]   ;;  %s4806_s3 = inlined_call_operand.vmem [shape: bf16[128,384], index: 3, kind: input, shape index: {}]   ;;  %s4807_s4 = inlined_call_operand.vmem [shape: f32[1,128], index: 4, kind: input, shape index: {}]   ;;  %s4808_s5 = inlined_call_operand.vmem [shape: bf16[128,384], index: 5, kind: input, shape index: {}]   ;;  %s4809_s6 = inlined_call_operand.vmem [shape: f32[1,384], index: 6, kind: input, shape index: {}]   ;;  %s4810_s7 = inlined_call_operand.hbm [shape: bf16[128,384], index: 7, kind: input, shape index: {}]   ;;  %s4811_s8 = inlined_call_operand.vmem [shape: f32[1,128], index: 8, kind: input, shape index: {}]   ;;  %s4812_s9 = inlined_call_operand.vmem [shape: bf16[128,1], index: 9, kind: input, shape index: {}]   ;;  %s4813_s10 = inlined_call_operand.<no memory space> [shape: f32[1,1], index: 10, kind: input, shape index: {}]   ;;  %s4814_s11 = inlined_call_operand.vmem [shape: f32[8,1], index: 11, kind: output, shape index: {}]  }
   0x1   :  { %v16_v0 = vstv %s4813_s10 }
   0x2   :  { %17 = vst [vmem:[#allocation4] sm:$0x1] %v16_v0 }
   0x3   :  { %18 = vsyncpa [#allocation6], 0  ;;  %s3599_s19 = smov [#allocation5]   ;;  %s3575_s23 = scalar_lea.hbm %s4810_s7, 3072 }
   0x4   :  { %s38_s20 = sshll.u32 %s3599_s19, 4  ;;  %p3576_p0 = scmp.ne.s32.totalorder %s4810_s7, %s3575_s23  ;;  %s39_s20 = int_to_ptr.vmem [resolvable:$true] %s38_s20 }
   0x5   :  { %p3579_p1 = scmp.lt.u32.totalorder %s3575_s23, %s4810_s7 }
   0x7   :  { %p3581_p2 = pnand %p3579_p1, %p3576_p0 }
   0x9   :  { %3584 = shalt.err (!%p3581_p2)
}
   0xa   :  { %s3585_s10 = scalar_lea.vmem %s39_s20, 3072  ;;  %p3590_p4 = scmp.lt.s32.totalorder %s39_s20, %s39_s20 }
   0xb   :  { %p3586_p3 = scmp.ne.s32.totalorder %s39_s20, %s3585_s10  ;;  %p3591_p5 = scmp.lt.s32.totalorder %s3585_s10, %s3585_s10 }
   0xd   :  { %p3592_p6 = por %p3591_p5, %p3590_p4 }
   0xf   :  { %p3593_p7 = pnand %p3592_p6, %p3586_p3 }
  0x11   :  { %3596 = shalt.err (!%p3593_p7)
}
  0x12   :  { %s3600_s28 = smov 192   ;;  %s3601_s29 = smov 12  }
  0x13   :  { %44 = dma.hbm_to_vmem [thread:$0]  %s4810_s7, 3072, %s39_s20, [#allocation6], %s3600_s28, %s3600_s28, %s3601_s29  }
  0x14   :  { %3597 = dma.done.wait [#allocation6], 3072  }
  0x15   :  { %3598 = vsyncadd [#allocation6], 4294964224  ;;  %v4818_v1 = vmov 0   ;;  %v3299_v2 = vld [vmem:[%s4804_s1 + $0x4] ss:$12 sps:$4 sm:$0xff]   ;;  %v67_v4 = vld [vmem:[%s4804_s1 + $0x18] sm:$0xff]  ;;  %v71_v40 = vlaneseq }
  0x16   :  { %185 = vmatprep.mubr.bf16.mxu0 %v4818_v1  ;;  %v3301_v3 = vld [vmem:[%s4804_s1] ss:$12 sps:$4 sm:$0xff]   ;;  %vm143_vm0 = vcmask 1043456   ;;  %153 = vmatprep.subr.bf16.mxu0 %v3299_v2  ;;  %v2677_v5 = vcombine.high %v67_v4, %v67_v4  ;;  %v2676_v6 = vcombine.low %v67_v4, %v67_v4  ;;  %vm130_vm1 = vcmask 195584   ;;  %v3305_v8 = vld [vmem:[%s4804_s1 + $0x8] ss:$12 sps:$4 sm:$0xff]  }
  0x17   :  { %v3304_v7 = vld [vmem:[%s4803_s0] sm:$0xff]   ;;  %154 = vmatpush1.bf16.msra.mxu0 %v3301_v3  ;;  %2956 = vmatprep.subr.bf16.mxu1 %v3305_v8  ;;  %v3307_v12 = vld [vmem:[%s4803_s0 + $0x8] sm:$0xff]   ;;  %v4820_v16 = vmov 0.0   ;;  %v3759_v21 = vld [vmem:[%s4806_s3 + $0x30] ss:$12 sps:$4 sm:$0xff]   ;;  %vm3604_vm2 = vmmov 0  }
  0x18   :  { %2679 = vmatprep.subr.msk.bf16.mxu0 %vm143_vm0, %v2677_v5  ;;  %v145_v9 = vsel %vm143_vm0, %v2676_v6, 0  ;;  %v3306_v10 = vld [vmem:[%s4804_s1 + $0x20] ss:$0 sps:$4 sm:$0xff]   ;;  %2960 = vmatprep.mubr.msk.bf16.mxu1 %vm130_vm1, %v3304_v7  ;;  %v3715_v13 = vld [vmem:[%s4806_s3 + $0x4] ss:$12 sps:$4 sm:$0xff]   ;;  %v3332_v32 = vld [vmem:[%s4803_s0 + $0x18] sm:$0xff]  }
  0x19   :  { %2957 = vmatpush3.bf16.msra.mxu1 %v3305_v8  ;;  %v151_v11 = vsel %vm143_vm0, %v3306_v10, 0  ;;  %v3720_v14 = vld [vmem:[%s4806_s3] ss:$12 sps:$4 sm:$0xff]   ;;  %v3725_v15 = vld [vmem:[%s4806_s3 + $0x8] ss:$12 sps:$4 sm:$0xff]   ;;  %v3880_v41 = vshrl.u32 %v71_v40, 7 }
  0x1a   :  { %3292 = vmatprep.subr.msk.bf16.mxu1 %vm143_vm0, %v3306_v10  ;;  %v3734_v17 = vld [vmem:[%s4806_s3 + $0x1c] ss:$12 sps:$4 sm:$0xff]   ;;  %v3740_v18 = vld [vmem:[%s4806_s3 + $0x18] ss:$12 sps:$4 sm:$0xff]   ;;  %v3745_v19 = vld [vmem:[%s4806_s3 + $0x20] ss:$12 sps:$4 sm:$0xff]  }
  0x1b   :  { %156 = vmatpush1.bf16.msra.mxu0 %v145_v9  ;;  %v3753_v20 = vld [vmem:[%s4806_s3 + $0x34] ss:$12 sps:$4 sm:$0xff]   ;;  %v3764_v22 = vld [vmem:[%s4806_s3 + $0x38] ss:$12 sps:$4 sm:$0xff]   ;;  %v3786_v26 = vld [vmem:[%s4806_s3 + $0x50] ss:$12 sps:$4 sm:$0xff]  }
  0x1c   :  { %509 = vmatprep.subr.bf16.mxu0 %v3715_v13  ;;  %v3772_v23 = vld [vmem:[%s4806_s3 + $0x4c] ss:$12 sps:$4 sm:$0xff]   ;;  %v3778_v24 = vld [vmem:[%s4806_s3 + $0x48] ss:$12 sps:$4 sm:$0xff]   ;;  %v3795_v27 = vld [vmem:[%s4806_s3 + $0x64] ss:$12 sps:$4 sm:$0xff]  }
  0x1d   :  { %2959 = vmatpush3.bf16.msra.mxu1 %v151_v11  ;;  %v3323_v25 = vld [vmem:[%s4803_s0 + $0x10] sm:$0xff]   ;;  %v3801_v28 = vld [vmem:[%s4806_s3 + $0x60] ss:$12 sps:$4 sm:$0xff]   ;;  %v3816_v30 = vld [vmem:[%s4806_s3 + $0x7c] ss:$12 sps:$4 sm:$0xff]   ;;  %4824 = vst [vmem:[#allocation8_spill] sm:$0xff] %v3880_v41 }
  0x1e   :  { %2680 = vmatmul.mubr.msk.bf16.vlgmr.msra.gmra.mrb[0].mxu0 %vm130_vm1, %v3304_v7  ;;  %2968 = vmatprep.subr.bf16.mxu1 %v4820_v16  ;;  %v3806_v29 = vld [vmem:[%s4806_s3 + $0x68] ss:$12 sps:$4 sm:$0xff]   ;;  %v3822_v31 = vld [vmem:[%s4806_s3 + $0x78] ss:$12 sps:$4 sm:$0xff]   ;;  %v3830_v33 = vld [vmem:[%s4806_s3 + $0x80] ss:$12 sps:$4 sm:$0xff]  }
  0x1f   :  { %195 = vmatprep.mubr.bf16.mxu0 %v4818_v1  ;;  %510 = vmatpush1.bf16.msra.mxu0 %v3720_v14  ;;  %v3839_v34 = vld [vmem:[%s4806_s3 + $0x94] ss:$12 sps:$4 sm:$0xff]   ;;  %v3845_v35 = vld [vmem:[%s4806_s3 + $0x90] ss:$12 sps:$4 sm:$0xff]   ;;  %v3851_v36 = vld [vmem:[%s4806_s3 + $0x98] ss:$12 sps:$4 sm:$0xff]  }
  0x20   :  { %2961 = vmatmul.mubr.msk.bf16.vlgmr.msra.gmra.mrb[0].mxu1 %vm130_vm1, %v3307_v12  ;;  %511 = vmatprep.subr.bf16.mxu0 %v3734_v17  ;;  %v3860_v37 = vld [vmem:[%s4806_s3 + $0xac] ss:$12 sps:$4 sm:$0xff]   ;;  %v3866_v38 = vld [vmem:[%s4806_s3 + $0xa8] ss:$12 sps:$4 sm:$0xff]   ;;  %v3871_v39 = vld [vmem:[%s4806_s3 + $0xb0] ss:$12 sps:$4 sm:$0xff]  }
  0x21   :  { %2969 = vmatpush3.bf16.msra.mxu1 %v3725_v15  ;;  %2964 = vmatprep.mubr.msk.bf16.mxu1 %vm130_vm1, %v3323_v25  ;;  %v4817_v42 = vsub.s32 0, %v3880_v41  ;;  %v69_v43 = vld [vmem:[%s4805_s2] sm:$0x7]  ;;  %v4816_v44 = vsub.s32 1, %v3880_v41  ;;  %v4815_v2 = vsub.s32 2, %v3880_v41  ;;  %vm2662_vm3 = vcmask 7168  }
  0x22   :  { %2970 = vmatprep.subr.bf16.mxu1 %v4820_v16  ;;  %v3923_v6 = vld [vmem:[%s4807_s4] ss:$0 sm:$0xff] }
  0x23   :  { %512 = vmatpush1.bf16.msra.mxu0 %v3740_v18  ;;  %v3889_v45 = vrot.slane %v69_v43, %v4817_v42  ;;  %v3893_v47 = vrot.slane %v69_v43, %v4816_v44  ;;  %v3918_v4 = vrot.slane %v69_v43, %v4815_v2 }
  0x24   :  { %513 = vmatprep.subr.bf16.mxu0 %v3753_v20 }
  0x25   :  { %2971 = vmatpush3.bf16.msra.mxu1 %v3745_v19 }
  0x26   :  { %2681 = vmatmul.mubr.msk.bf16.gmra.mrb[4].mxu0 %vm130_vm1, %v3307_v12  ;;  %2972 = vmatprep.subr.bf16.mxu1 %v4820_v16 }
  0x27   :  { %205 = vmatprep.mubr.bf16.mxu0 %v4818_v1  ;;  %514 = vmatpush1.bf16.msra.mxu0 %v3759_v21 }
  0x28   :  { %515 = vmatprep.subr.bf16.mxu0 %v3772_v23  ;;  %2965 = vmatmul.mubr.msk.bf16.gmra.mrb[4].mxu1 %vm130_vm1, %v3332_v32 }
  0x29   :  { %2973 = vmatpush3.bf16.msra.mxu1 %v3764_v22  ;;  %2984 = vmatprep.mubr.msk.bf16.mxu1 %vm3604_vm2, %v4820_v16 }
  0x2a   :  { %2974 = vmatprep.subr.bf16.mxu1 %v4820_v16 }
  0x2b   :  { %516 = vmatpush1.bf16.msra.mxu0 %v3778_v24 }
  0x2c   :  { %517 = vmatprep.subr.bf16.mxu0 %v3795_v27 }
  0x2d   :  { %2975 = vmatpush3.bf16.msra.mxu1 %v3786_v26 }
  0x2e   :  { %2682 = vmatmul.mubr.msk.bf16.gmra.mrb[8].mxu0 %vm130_vm1, %v3323_v25  ;;  %2976 = vmatprep.subr.bf16.mxu1 %v4820_v16 }
  0x2f   :  { %215 = vmatprep.mubr.bf16.mxu0 %v4818_v1  ;;  %518 = vmatpush1.bf16.msra.mxu0 %v3801_v28 }
  0x30   :  { %519 = vmatprep.subr.bf16.mxu0 %v3816_v30 }
  0x31   :  { %2977 = vmatpush3.bf16.msra.mxu1 %v3806_v29 }
  0x32   :  { %2978 = vmatprep.subr.bf16.mxu1 %v4820_v16 }
  0x33   :  { %520 = vmatpush1.bf16.msra.mxu0 %v3822_v31 }
  0x34   :  { %521 = vmatprep.subr.bf16.mxu0 %v3839_v34 }
  0x35   :  { %2979 = vmatpush3.bf16.msra.mxu1 %v3830_v33 }
  0x36   :  { %2683 = vmatmul.mubr.msk.bf16.gmra.mrb[12].mxu0 %vm130_vm1, %v3332_v32  ;;  %2980 = vmatprep.subr.bf16.mxu1 %v4820_v16 }
  0x37   :  { %541 = vmatprep.mubr.bf16.mxu0 %v4818_v1  ;;  %522 = vmatpush1.bf16.msra.mxu0 %v3845_v35 }
  0x38   :  { %523 = vmatprep.subr.bf16.mxu0 %v3860_v37 }
  0x39   :  { %2981 = vmatpush3.bf16.msra.mxu1 %v3851_v36 }
  0x3a   :  { %2982 = vmatprep.subr.bf16.mxu1 %v4820_v16 }
  0x3b   :  { %524 = vmatpush1.bf16.msra.mxu0 %v3866_v38 }
  0x3c   :  { %617 = vmatprep.subr.bf16.mxu0 %v3715_v13 }
  0x3d   :  { %2983 = vmatpush3.bf16.msra.mxu1 %v3871_v39 }
  0x3e   :  { %2988 = vmatprep.subr.bf16.mxu1 %v4820_v16 }
  0xf1   :  { %v187_v46 = vpop.f32.mrb[0].mxu0 }
  0xf2   :  { %v188_v48 = vadd.f32 %v187_v46, %v3889_v45  ;;  %v189_v49 = vpop.f32.mrb[1].mxu0 }
  0xf3   :  { %v3896_v50 = vpop.f32.mrb[2].mxu0  ;;  %v3900_v53 = vpop.f32.mrb[0].mxu1  ;;  %v190_v54 = vadd.f32 %v189_v49, %v3893_v47 }
  0xf4   :  { %v2688_v51 = vmul.f32 -1.442695, %v188_v48  ;;  %v3898_v52 = vpop.f32.mrb[3].mxu0  ;;  %v260_v55 = vpop.f32.mrb[1].mxu1 }
  0xf5   :  { %v3903_v56 = vpop.f32.mrb[2].mxu1  ;;  %v2689_v58 = vmul.f32 -1.442695, %v190_v54  ;;  %v261_v7 = vadd.f32 %v260_v55, %v3918_v4 }
  0xf6   :  { %3414 = vpow2.f32 %v2688_v51  ;;  %v3905_v57 = vpop.f32.mrb[3].mxu1 }
  0xf7   :  { %3416 = vpow2.f32 %v2689_v58 }
  0xf9   :  { %v3907_v59 = vpop.f32.mrb[4].mxu0 }
  0xfa   :  { %v3909_v60 = vpop.f32.mrb[5].mxu0 }
  0xfb   :  { %v3911_v61 = vpop.f32.mrb[6].mxu0  ;;  %v3976_v58 = vpop.f32.mrb[4].mxu1 }
  0xfc   :  { %v3913_v62 = vpop.f32.mrb[7].mxu0  ;;  %4825 = vst [vmem:[#allocation9_spill] sm:$0xff] %v3976_v58 }
 0x100   :  { %v3415_v63 = vpop.eup %3414 }
 0x101   :  { %v354_v0 = vadd.f32 1.0, %v3415_v63  ;;  %v3417_v3 = vpop.eup %3416  ;;  %v3966_v48 = vpop.f32.mrb[8].mxu0 }
 0x102   :  { %v360_v5 = vadd.f32 1.0, %v3417_v3  ;;  %v3968_v49 = vpop.f32.mrb[9].mxu0 }
 0x103   :  { %3418 = vrcp.f32 %v354_v0  ;;  %v3970_v51 = vpop.f32.mrb[10].mxu0  ;;  %v3980_v0 = vpop.f32.mrb[5].mxu1 }
 0x104   :  { %3420 = vrcp.f32 %v360_v5  ;;  %v3972_v54 = vpop.f32.mrb[11].mxu0  ;;  %v3984_v5 = vpop.f32.mrb[6].mxu1 }
 0x105   :  { %4827 = vst [vmem:[#allocation11_spill] sm:$0xff] %v3984_v5 }
 0x109   :  { %v3974_v55 = vpop.f32.mrb[12].mxu0 }
 0x10a   :  { %v3978_v63 = vpop.f32.mrb[13].mxu0 }
 0x10b   :  { %v3982_v3 = vpop.f32.mrb[14].mxu0 }
 0x10c   :  { %4826 = vst [vmem:[#allocation10_spill] sm:$0xff] %v3982_v3 }
 0x10d   :  { %v3419_v8 = vpop.eup %3418 }
 0x10e   :  { %v369_v9 = vmul.f32 %v3419_v8, %v3923_v6  ;;  %v3421_v11 = vpop.eup %3420  ;;  %v3988_v8 = vpop.f32.mrb[7].mxu1 }
 0x10f   :  { %v372_v12 = vsub.f32 1.0, %v3421_v11  ;;  %v374_v32 = vmul.f32 0.0, %v3421_v11 }
 0x110   :  { %v370_v10 = vadd.f32 %v369_v9, %v261_v7  ;;  %v3986_v7 = vpop.f32.mrb[15].mxu0  ;;  %v192_v9 = vadd.f32 %v3896_v50, %v3889_v45 }
 0x111   :  { %4828 = vst [vmem:[#allocation12_spill] sm:$0xff] %v3986_v7 }
 0x112   :  { %3422 = vtanh.f32 %v370_v10  ;;  %v194_v10 = vadd.f32 %v3898_v52, %v3893_v47 }
 0x11c   :  { %v3423_v25 = vpop.eup %3422 }
 0x11d   :  { %v373_v40 = vmul.f32 %v3423_v25, %v372_v12 }
 0x11f   :  { %v3927_v43 = vadd.f32 %v374_v32, %v373_v40 }
 0x121   :  { %v380_v46 = vpack.c.bf16 %v3927_v43, %v3927_v43 }
 0x123   :  { %542 = vmatmul.mubr.bf16.vlgmr.msra.gmra.mrb[16].mxu0 %v380_v46  ;;  %2985 = vmatmul.mubr.bf16.vlgmr.msra.gmra.mrb[8].mxu1 %v380_v46 }
 0x124   :  { %618 = vmatpush1.bf16.msra.mxu0 %v3720_v14  ;;  %2989 = vmatpush3.bf16.msra.mxu1 %v3725_v15 }
 0x125   :  { %619 = vmatprep.subr.bf16.mxu0 %v3734_v17  ;;  %2990 = vmatprep.subr.bf16.mxu1 %v4820_v16 }
 0x126   :  { %649 = vmatprep.mubr.bf16.mxu0 %v4818_v1  ;;  %3004 = vmatprep.mubr.msk.bf16.mxu1 %vm3604_vm2, %v4820_v16 }
 0x128   :  { %620 = vmatpush1.bf16.msra.mxu0 %v3740_v18  ;;  %2991 = vmatpush3.bf16.msra.mxu1 %v3745_v19 }
 0x129   :  { %621 = vmatprep.subr.bf16.mxu0 %v3753_v20  ;;  %2992 = vmatprep.subr.bf16.mxu1 %v4820_v16 }
 0x12c   :  { %622 = vmatpush1.bf16.msra.mxu0 %v3759_v21  ;;  %2993 = vmatpush3.bf16.msra.mxu1 %v3764_v22 }
 0x12d   :  { %623 = vmatprep.subr.bf16.mxu0 %v3772_v23  ;;  %2994 = vmatprep.subr.bf16.mxu1 %v4820_v16 }
 0x130   :  { %624 = vmatpush1.bf16.msra.mxu0 %v3778_v24  ;;  %2995 = vmatpush3.bf16.msra.mxu1 %v3786_v26 }
 0x131   :  { %625 = vmatprep.subr.bf16.mxu0 %v3795_v27  ;;  %2996 = vmatprep.subr.bf16.mxu1 %v4820_v16 }
 0x134   :  { %626 = vmatpush1.bf16.msra.mxu0 %v3801_v28  ;;  %2997 = vmatpush3.bf16.msra.mxu1 %v3806_v29 }
 0x135   :  { %627 = vmatprep.subr.bf16.mxu0 %v3816_v30  ;;  %2998 = vmatprep.subr.bf16.mxu1 %v4820_v16 }
 0x138   :  { %628 = vmatpush1.bf16.msra.mxu0 %v3822_v31  ;;  %2999 = vmatpush3.bf16.msra.mxu1 %v3830_v33 }
 0x139   :  { %629 = vmatprep.subr.bf16.mxu0 %v3839_v34  ;;  %3000 = vmatprep.subr.bf16.mxu1 %v4820_v16 }
 0x13c   :  { %630 = vmatpush1.bf16.msra.mxu0 %v3845_v35  ;;  %3001 = vmatpush3.bf16.msra.mxu1 %v3851_v36 }
 0x13d   :  { %631 = vmatprep.subr.bf16.mxu0 %v3860_v37  ;;  %3002 = vmatprep.subr.bf16.mxu1 %v4820_v16 }
 0x140   :  { %632 = vmatpush1.bf16.msra.mxu0 %v3866_v38  ;;  %3003 = vmatpush3.bf16.msra.mxu1 %v3871_v39 }
 0x141   :  { %725 = vmatprep.subr.bf16.mxu0 %v3715_v13  ;;  %3008 = vmatprep.subr.bf16.mxu1 %v4820_v16 }
 0x1f6   :  { %v543_v11 = vpop.f32.mrb[16].mxu0  ;;  %v584_v12 = vpop.f32.mrb[8].mxu1 }
 0x1f7   :  { %v590_v25 = vadd.f32 %v543_v11, %v192_v9  ;;  %v545_v32 = vpop.f32.mrb[17].mxu0  ;;  %v2986_v40 = vpop.f32.mrb[9].mxu1  ;;  %v604_v52 = vadd.f32 %v3923_v6, %v584_v12  ;;  %v264_v9 = vadd.f32 %v3905_v57, %v3918_v4  ;;  %v4829_v57 = vmov 0.0  }
 0x1f8   :  { %v597_v46 = vadd.f32 %v545_v32, %v194_v10  ;;  %v547_v2 = vpop.f32.mrb[18].mxu0  ;;  %v587_v44 = vpop.f32.mrb[10].mxu1  ;;  %v200_v11 = vadd.f32 %v3909_v60, %v3893_v47 }
 0x1f9   :  { %v2715_v42 = vmul.f32 -1.442695, %v590_v25  ;;  %v548_v1 = vpop.f32.mrb[19].mxu0  ;;  %v2987_v16 = vpop.f32.mrb[11].mxu1 }
 0x1fa   :  { %v2716_v41 = vmul.f32 -1.442695, %v597_v46 }
 0x1fb   :  { %3424 = vpow2.f32 %v2715_v42 }
 0x1fc   :  { %3426 = vpow2.f32 %v2716_v41 }
 0x205   :  { %v3425_v5 = vpop.eup %3424 }
 0x206   :  { %v594_v7 = vadd.f32 1.0, %v3425_v5  ;;  %v3427_v50 = vpop.eup %3426 }
 0x207   :  { %v601_v3 = vadd.f32 1.0, %v3427_v50 }
 0x208   :  { %3428 = vrcp.f32 %v594_v7 }
 0x209   :  { %3430 = vrcp.f32 %v601_v3  ;;  %v198_v3 = vadd.f32 %v3907_v59, %v3889_v45 }
 0x212   :  { %v3429_v58 = vpop.eup %3428 }
 0x213   :  { %v605_v10 = vmul.f32 %v3429_v58, %v604_v52  ;;  %v3431_v1 = vpop.eup %3430  ;;  %v4830_v58 = vmov 0  }
 0x214   :  { %v608_v16 = vsub.f32 1.0, %v3431_v1  ;;  %v610_v41 = vmul.f32 %v3431_v1, %v3927_v43 }
 0x215   :  { %v606_v44 = vadd.f32 %v605_v10, %v264_v9 }
 0x217   :  { %3432 = vtanh.f32 %v606_v44 }
 0x221   :  { %v3433_v42 = vpop.eup %3432 }
 0x222   :  { %v609_v2 = vmul.f32 %v3433_v42, %v608_v16 }
 0x224   :  { %v3998_v5 = vadd.f32 %v610_v41, %v609_v2 }
 0x226   :  { %v616_v7 = vpack.c.bf16 %v3998_v5, %v3998_v5 }
 0x228   :  { %650 = vmatmul.mubr.bf16.vlgmr.msra.gmra.mrb[20].mxu0 %v616_v7  ;;  %3005 = vmatmul.mubr.bf16.vlgmr.msra.gmra.mrb[12].mxu1 %v616_v7 }
 0x229   :  { %726 = vmatpush1.bf16.msra.mxu0 %v3720_v14  ;;  %3009 = vmatpush3.bf16.msra.mxu1 %v3725_v15 }
 0x22a   :  { %727 = vmatprep.subr.bf16.mxu0 %v3734_v17  ;;  %3010 = vmatprep.subr.bf16.mxu1 %v4829_v57 }
 0x22b   :  { %757 = vmatprep.mubr.bf16.mxu0 %v4830_v58  ;;  %3024 = vmatprep.mubr.msk.bf16.mxu1 %vm3604_vm2, %v4829_v57 }
 0x22d   :  { %728 = vmatpush1.bf16.msra.mxu0 %v3740_v18  ;;  %3011 = vmatpush3.bf16.msra.mxu1 %v3745_v19 }
 0x22e   :  { %729 = vmatprep.subr.bf16.mxu0 %v3753_v20  ;;  %3012 = vmatprep.subr.bf16.mxu1 %v4829_v57 }
 0x231   :  { %730 = vmatpush1.bf16.msra.mxu0 %v3759_v21  ;;  %3013 = vmatpush3.bf16.msra.mxu1 %v3764_v22 }
 0x232   :  { %731 = vmatprep.subr.bf16.mxu0 %v3772_v23  ;;  %3014 = vmatprep.subr.bf16.mxu1 %v4829_v57 }
 0x235   :  { %732 = vmatpush1.bf16.msra.mxu0 %v3778_v24  ;;  %3015 = vmatpush3.bf16.msra.mxu1 %v3786_v26 }
 0x236   :  { %733 = vmatprep.subr.bf16.mxu0 %v3795_v27  ;;  %3016 = vmatprep.subr.bf16.mxu1 %v4829_v57 }
 0x239   :  { %734 = vmatpush1.bf16.msra.mxu0 %v3801_v28  ;;  %3017 = vmatpush3.bf16.msra.mxu1 %v3806_v29 }
 0x23a   :  { %735 = vmatprep.subr.bf16.mxu0 %v3816_v30  ;;  %3018 = vmatprep.subr.bf16.mxu1 %v4829_v57 }
 0x23d   :  { %736 = vmatpush1.bf16.msra.mxu0 %v3822_v31  ;;  %3019 = vmatpush3.bf16.msra.mxu1 %v3830_v33 }
 0x23e   :  { %737 = vmatprep.subr.bf16.mxu0 %v3839_v34  ;;  %3020 = vmatprep.subr.bf16.mxu1 %v4829_v57 }
 0x241   :  { %738 = vmatpush1.bf16.msra.mxu0 %v3845_v35  ;;  %3021 = vmatpush3.bf16.msra.mxu1 %v3851_v36 }
 0x242   :  { %739 = vmatprep.subr.bf16.mxu0 %v3860_v37  ;;  %3022 = vmatprep.subr.bf16.mxu1 %v4829_v57 }
 0x245   :  { %740 = vmatpush1.bf16.msra.mxu0 %v3866_v38  ;;  %3023 = vmatpush3.bf16.msra.mxu1 %v3871_v39 }
 0x246   :  { %833 = vmatprep.subr.bf16.mxu0 %v3715_v13  ;;  %3028 = vmatprep.subr.bf16.mxu1 %v4829_v57 }
 0x2fb   :  { %v651_v12 = vpop.f32.mrb[20].mxu0  ;;  %v692_v25 = vpop.f32.mrb[12].mxu1 }
 0x2fc   :  { %v698_v32 = vadd.f32 %v651_v12, %v198_v3  ;;  %v653_v40 = vpop.f32.mrb[21].mxu0  ;;  %v3006_v46 = vpop.f32.mrb[13].mxu1  ;;  %v712_v60 = vadd.f32 %v3923_v6, %v692_v25  ;;  %v269_v3 = vadd.f32 %v3900_v53, %v3918_v4  ;;  %v202_v53 = vadd.f32 %v3911_v61, %v3889_v45 }
 0x2fd   :  { %v705_v50 = vadd.f32 %v653_v40, %v200_v11  ;;  %v655_v52 = vpop.f32.mrb[22].mxu0  ;;  %v695_v9 = vpop.f32.mrb[14].mxu1  ;;  %v204_v25 = vadd.f32 %v3913_v62, %v3893_v47 }
 0x2fe   :  { %v2717_v10 = vmul.f32 -1.442695, %v698_v32  ;;  %v656_v44 = vpop.f32.mrb[23].mxu0  ;;  %v3007_v1 = vpop.f32.mrb[15].mxu1 }
 0x2ff   :  { %v2718_v16 = vmul.f32 -1.442695, %v705_v50 }
 0x300   :  { %3434 = vpow2.f32 %v2717_v10 }
 0x301   :  { %3436 = vpow2.f32 %v2718_v16 }
 0x30a   :  { %v3435_v42 = vpop.eup %3434 }
 0x30b   :  { %v702_v2 = vadd.f32 1.0, %v3435_v42  ;;  %v3437_v59 = vpop.eup %3436 }
 0x30c   :  { %v709_v41 = vadd.f32 1.0, %v3437_v59 }
 0x30d   :  { %3438 = vrcp.f32 %v702_v2 }
 0x30e   :  { %3440 = vrcp.f32 %v709_v41 }
 0x317   :  { %v3439_v7 = vpop.eup %3438 }
 0x318   :  { %v713_v11 = vmul.f32 %v3439_v7, %v712_v60  ;;  %v3441_v32 = vpop.eup %3440 }
 0x319   :  { %v716_v40 = vsub.f32 1.0, %v3441_v32  ;;  %v718_v52 = vmul.f32 %v3441_v32, %v3998_v5 }
 0x31a   :  { %v714_v12 = vadd.f32 %v713_v11, %v269_v3 }
 0x31c   :  { %3442 = vtanh.f32 %v714_v12 }
 0x326   :  { %v3443_v46 = vpop.eup %3442 }
 0x327   :  { %v717_v50 = vmul.f32 %v3443_v46, %v716_v40 }
 0x329   :  { %v4045_v9 = vadd.f32 %v718_v52, %v717_v50  ;;  %v272_v52 = vadd.f32 %v3903_v56, %v3918_v4  ;;  %v208_v56 = vadd.f32 %v3966_v48, %v3889_v45 }
 0x32b   :  { %v724_v10 = vpack.c.bf16 %v4045_v9, %v4045_v9 }
 0x32d   :  { %758 = vmatmul.mubr.bf16.vlgmr.msra.gmra.mrb[24].mxu0 %v724_v10  ;;  %3025 = vmatmul.mubr.bf16.vlgmr.msra.gmra.mrb[16].mxu1 %v724_v10 }
 0x32e   :  { %834 = vmatpush1.bf16.msra.mxu0 %v3720_v14  ;;  %3029 = vmatpush3.bf16.msra.mxu1 %v3725_v15 }
 0x32f   :  { %835 = vmatprep.subr.bf16.mxu0 %v3734_v17  ;;  %3030 = vmatprep.subr.bf16.mxu1 %v4829_v57 }
 0x330   :  { %865 = vmatprep.mubr.bf16.mxu0 %v4830_v58  ;;  %3044 = vmatprep.mubr.msk.bf16.mxu1 %vm3604_vm2, %v4829_v57 }
 0x332   :  { %836 = vmatpush1.bf16.msra.mxu0 %v3740_v18  ;;  %3031 = vmatpush3.bf16.msra.mxu1 %v3745_v19 }
 0x333   :  { %837 = vmatprep.subr.bf16.mxu0 %v3753_v20  ;;  %3032 = vmatprep.subr.bf16.mxu1 %v4829_v57 }
 0x336   :  { %838 = vmatpush1.bf16.msra.mxu0 %v3759_v21  ;;  %3033 = vmatpush3.bf16.msra.mxu1 %v3764_v22 }
 0x337   :  { %839 = vmatprep.subr.bf16.mxu0 %v3772_v23  ;;  %3034 = vmatprep.subr.bf16.mxu1 %v4829_v57 }
 0x33a   :  { %840 = vmatpush1.bf16.msra.mxu0 %v3778_v24  ;;  %3035 = vmatpush3.bf16.msra.mxu1 %v3786_v26 }
 0x33b   :  { %841 = vmatprep.subr.bf16.mxu0 %v3795_v27  ;;  %3036 = vmatprep.subr.bf16.mxu1 %v4829_v57 }
 0x33e   :  { %842 = vmatpush1.bf16.msra.mxu0 %v3801_v28  ;;  %3037 = vmatpush3.bf16.msra.mxu1 %v3806_v29 }
 0x33f   :  { %843 = vmatprep.subr.bf16.mxu0 %v3816_v30  ;;  %3038 = vmatprep.subr.bf16.mxu1 %v4829_v57 }
 0x342   :  { %844 = vmatpush1.bf16.msra.mxu0 %v3822_v31  ;;  %3039 = vmatpush3.bf16.msra.mxu1 %v3830_v33 }
 0x343   :  { %845 = vmatprep.subr.bf16.mxu0 %v3839_v34  ;;  %3040 = vmatprep.subr.bf16.mxu1 %v4829_v57 }
 0x346   :  { %846 = vmatpush1.bf16.msra.mxu0 %v3845_v35  ;;  %3041 = vmatpush3.bf16.msra.mxu1 %v3851_v36 }
 0x347   :  { %847 = vmatprep.subr.bf16.mxu0 %v3860_v37  ;;  %3042 = vmatprep.subr.bf16.mxu1 %v4829_v57 }
 0x34a   :  { %848 = vmatpush1.bf16.msra.mxu0 %v3866_v38  ;;  %3043 = vmatpush3.bf16.msra.mxu1 %v3871_v39 }
 0x34b   :  { %941 = vmatprep.subr.bf16.mxu0 %v3715_v13  ;;  %3048 = vmatprep.subr.bf16.mxu1 %v4829_v57 }
 0x400   :  { %v759_v44 = vpop.f32.mrb[24].mxu0  ;;  %v800_v1 = vpop.f32.mrb[16].mxu1 }
 0x401   :  { %v806_v16 = vadd.f32 %v759_v44, %v202_v53  ;;  %v761_v42 = vpop.f32.mrb[25].mxu0  ;;  %v3026_v2 = vpop.f32.mrb[17].mxu1  ;;  %v820_v62 = vadd.f32 %v3923_v6, %v800_v1  ;;  %v210_v1 = vadd.f32 %v3968_v49, %v3893_v47 }
 0x402   :  { %v813_v59 = vadd.f32 %v761_v42, %v204_v25  ;;  %v763_v41 = vpop.f32.mrb[26].mxu0  ;;  %v803_v60 = vpop.f32.mrb[18].mxu1 }
 0x403   :  { %v2719_v7 = vmul.f32 -1.442695, %v806_v16  ;;  %v764_v3 = vpop.f32.mrb[27].mxu0  ;;  %v3027_v11 = vpop.f32.mrb[19].mxu1 }
 0x404   :  { %v2720_v12 = vmul.f32 -1.442695, %v813_v59 }
 0x405   :  { %3444 = vpow2.f32 %v2719_v7 }
 0x406   :  { %3446 = vpow2.f32 %v2720_v12 }
 0x40f   :  { %v3445_v32 = vpop.eup %3444 }
 0x410   :  { %v810_v40 = vadd.f32 1.0, %v3445_v32  ;;  %v3447_v61 = vpop.eup %3446 }
 0x411   :  { %v817_v46 = vadd.f32 1.0, %v3447_v61 }
 0x412   :  { %3448 = vrcp.f32 %v810_v40 }
 0x413   :  { %3450 = vrcp.f32 %v817_v46 }
 0x41c   :  { %v3449_v50 = vpop.eup %3448 }
 0x41d   :  { %v821_v10 = vmul.f32 %v3449_v50, %v820_v62  ;;  %v3451_v25 = vpop.eup %3450 }
 0x41e   :  { %v824_v44 = vsub.f32 1.0, %v3451_v25  ;;  %v826_v2 = vmul.f32 %v3451_v25, %v4045_v9 }
 0x41f   :  { %v822_v53 = vadd.f32 %v821_v10, %v272_v52 }
 0x421   :  { %3452 = vtanh.f32 %v822_v53 }
 0x42b   :  { %v3453_v16 = vpop.eup %3452 }
 0x42c   :  { %v825_v42 = vmul.f32 %v3453_v16, %v824_v44  ;;  %v277_v16 = vadd.f32 %v3980_v0, %v3918_v4  ;;  %v212_v0 = vadd.f32 %v3970_v51, %v3889_v45 }
 0x42e   :  { %v4092_v59 = vadd.f32 %v826_v2, %v825_v42 }
 0x430   :  { %v832_v41 = vpack.c.bf16 %v4092_v59, %v4092_v59 }
 0x432   :  { %866 = vmatmul.mubr.bf16.vlgmr.msra.gmra.mrb[28].mxu0 %v832_v41  ;;  %3045 = vmatmul.mubr.bf16.vlgmr.msra.gmra.mrb[20].mxu1 %v832_v41 }
 0x433   :  { %942 = vmatpush1.bf16.msra.mxu0 %v3720_v14  ;;  %3049 = vmatpush3.bf16.msra.mxu1 %v3725_v15 }
 0x434   :  { %943 = vmatprep.subr.bf16.mxu0 %v3734_v17  ;;  %3050 = vmatprep.subr.bf16.mxu1 %v4829_v57 }
 0x435   :  { %973 = vmatprep.mubr.bf16.mxu0 %v4830_v58  ;;  %3064 = vmatprep.mubr.msk.bf16.mxu1 %vm3604_vm2, %v4829_v57 }
 0x437   :  { %944 = vmatpush1.bf16.msra.mxu0 %v3740_v18  ;;  %3051 = vmatpush3.bf16.msra.mxu1 %v3745_v19 }
 0x438   :  { %945 = vmatprep.subr.bf16.mxu0 %v3753_v20  ;;  %3052 = vmatprep.subr.bf16.mxu1 %v4829_v57 }
 0x43b   :  { %946 = vmatpush1.bf16.msra.mxu0 %v3759_v21  ;;  %3053 = vmatpush3.bf16.msra.mxu1 %v3764_v22 }
 0x43c   :  { %947 = vmatprep.subr.bf16.mxu0 %v3772_v23  ;;  %3054 = vmatprep.subr.bf16.mxu1 %v4829_v57 }
 0x43f   :  { %948 = vmatpush1.bf16.msra.mxu0 %v3778_v24  ;;  %3055 = vmatpush3.bf16.msra.mxu1 %v3786_v26 }
 0x440   :  { %949 = vmatprep.subr.bf16.mxu0 %v3795_v27  ;;  %3056 = vmatprep.subr.bf16.mxu1 %v4829_v57 }
 0x443   :  { %950 = vmatpush1.bf16.msra.mxu0 %v3801_v28  ;;  %3057 = vmatpush3.bf16.msra.mxu1 %v3806_v29 }
 0x444   :  { %951 = vmatprep.subr.bf16.mxu0 %v3816_v30  ;;  %3058 = vmatprep.subr.bf16.mxu1 %v4829_v57 }
 0x447   :  { %952 = vmatpush1.bf16.msra.mxu0 %v3822_v31  ;;  %3059 = vmatpush3.bf16.msra.mxu1 %v3830_v33 }
 0x448   :  { %953 = vmatprep.subr.bf16.mxu0 %v3839_v34  ;;  %3060 = vmatprep.subr.bf16.mxu1 %v4829_v57 }
 0x44b   :  { %954 = vmatpush1.bf16.msra.mxu0 %v3845_v35  ;;  %3061 = vmatpush3.bf16.msra.mxu1 %v3851_v36 }
 0x44c   :  { %955 = vmatprep.subr.bf16.mxu0 %v3860_v37  ;;  %3062 = vmatprep.subr.bf16.mxu1 %v4829_v57 }
 0x44f   :  { %956 = vmatpush1.bf16.msra.mxu0 %v3866_v38  ;;  %3063 = vmatpush3.bf16.msra.mxu1 %v3871_v39 }
 0x450   :  { %1049 = vmatprep.subr.bf16.mxu0 %v3715_v13  ;;  %3068 = vmatprep.subr.bf16.mxu1 %v4829_v57 }
 0x505   :  { %v867_v60 = vpop.f32.mrb[28].mxu0  ;;  %v908_v7 = vpop.f32.mrb[20].mxu1 }
 0x506   :  { %v914_v3 = vadd.f32 %v867_v60, %v208_v56  ;;  %v869_v11 = vpop.f32.mrb[29].mxu0  ;;  %v3046_v12 = vpop.f32.mrb[21].mxu1  ;;  %v928_v49 = vadd.f32 %v3923_v6, %v908_v7  ;;  %v214_v7 = vadd.f32 %v3972_v54, %v3893_v47 }
 0x507   :  { %v921_v32 = vadd.f32 %v869_v11, %v210_v1  ;;  %v871_v40 = vpop.f32.mrb[30].mxu0  ;;  %v911_v61 = vpop.f32.mrb[22].mxu1 }
 0x508   :  { %v2721_v46 = vmul.f32 -1.442695, %v914_v3  ;;  %v872_v62 = vpop.f32.mrb[31].mxu0  ;;  %v3047_v50 = vpop.f32.mrb[23].mxu1 }
 0x509   :  { %v2722_v52 = vmul.f32 -1.442695, %v921_v32 }
 0x50a   :  { %3454 = vpow2.f32 %v2721_v46 }
 0x50b   :  { %3456 = vpow2.f32 %v2722_v52 }
 0x514   :  { %v3455_v10 = vpop.eup %3454 }
 0x515   :  { %v918_v53 = vadd.f32 1.0, %v3455_v10  ;;  %v3457_v48 = vpop.eup %3456 }
 0x516   :  { %v925_v25 = vadd.f32 1.0, %v3457_v48 }
 0x517   :  { %3458 = vrcp.f32 %v918_v53 }
 0x518   :  { %3460 = vrcp.f32 %v925_v25 }
 0x521   :  { %v3459_v44 = vpop.eup %3458 }
 0x522   :  { %v929_v42 = vmul.f32 %v3459_v44, %v928_v49  ;;  %v3461_v41 = vpop.eup %3460 }
 0x523   :  { %v932_v56 = vsub.f32 1.0, %v3461_v41  ;;  %v934_v3 = vmul.f32 %v3461_v41, %v4092_v59 }
 0x524   :  { %v930_v2 = vadd.f32 %v929_v42, %v277_v16 }
 0x526   :  { %3462 = vtanh.f32 %v930_v2  ;;  %v280_v2 = vadd.f32 %v3988_v8, %v3918_v4 }
 0x530   :  { %v3463_v1 = vpop.eup %3462 }
 0x531   :  { %v933_v60 = vmul.f32 %v3463_v1, %v932_v56 }
 0x533   :  { %v4139_v11 = vadd.f32 %v934_v3, %v933_v60 }
 0x535   :  { %v940_v12 = vpack.c.bf16 %v4139_v11, %v4139_v11 }
 0x537   :  { %974 = vmatmul.mubr.bf16.vlgmr.msra.gmra.mrb[32].mxu0 %v940_v12  ;;  %3065 = vmatmul.mubr.bf16.vlgmr.msra.gmra.mrb[24].mxu1 %v940_v12 }
 0x538   :  { %1050 = vmatpush1.bf16.msra.mxu0 %v3720_v14  ;;  %3069 = vmatpush3.bf16.msra.mxu1 %v3725_v15 }
 0x539   :  { %1051 = vmatprep.subr.bf16.mxu0 %v3734_v17  ;;  %3070 = vmatprep.subr.bf16.mxu1 %v4829_v57 }
 0x53a   :  { %1081 = vmatprep.mubr.bf16.mxu0 %v4830_v58  ;;  %3084 = vmatprep.mubr.msk.bf16.mxu1 %vm3604_vm2, %v4829_v57 }
 0x53c   :  { %1052 = vmatpush1.bf16.msra.mxu0 %v3740_v18  ;;  %3071 = vmatpush3.bf16.msra.mxu1 %v3745_v19 }
 0x53d   :  { %1053 = vmatprep.subr.bf16.mxu0 %v3753_v20  ;;  %3072 = vmatprep.subr.bf16.mxu1 %v4829_v57 }
 0x540   :  { %1054 = vmatpush1.bf16.msra.mxu0 %v3759_v21  ;;  %3073 = vmatpush3.bf16.msra.mxu1 %v3764_v22 }
 0x541   :  { %1055 = vmatprep.subr.bf16.mxu0 %v3772_v23  ;;  %3074 = vmatprep.subr.bf16.mxu1 %v4829_v57 }
 0x544   :  { %1056 = vmatpush1.bf16.msra.mxu0 %v3778_v24  ;;  %3075 = vmatpush3.bf16.msra.mxu1 %v3786_v26 }
 0x545   :  { %1057 = vmatprep.subr.bf16.mxu0 %v3795_v27  ;;  %3076 = vmatprep.subr.bf16.mxu1 %v4829_v57 }
 0x548   :  { %1058 = vmatpush1.bf16.msra.mxu0 %v3801_v28  ;;  %3077 = vmatpush3.bf16.msra.mxu1 %v3806_v29 }
 0x549   :  { %1059 = vmatprep.subr.bf16.mxu0 %v3816_v30  ;;  %3078 = vmatprep.subr.bf16.mxu1 %v4829_v57 }
 0x54c   :  { %1060 = vmatpush1.bf16.msra.mxu0 %v3822_v31  ;;  %3079 = vmatpush3.bf16.msra.mxu1 %v3830_v33 }
 0x54d   :  { %1061 = vmatprep.subr.bf16.mxu0 %v3839_v34  ;;  %3080 = vmatprep.subr.bf16.mxu1 %v4829_v57 }
 0x550   :  { %1062 = vmatpush1.bf16.msra.mxu0 %v3845_v35  ;;  %3081 = vmatpush3.bf16.msra.mxu1 %v3851_v36 }
 0x551   :  { %1063 = vmatprep.subr.bf16.mxu0 %v3860_v37  ;;  %3082 = vmatprep.subr.bf16.mxu1 %v4829_v57 }
 0x554   :  { %1064 = vmatpush1.bf16.msra.mxu0 %v3866_v38  ;;  %3083 = vmatpush3.bf16.msra.mxu1 %v3871_v39 }
 0x555   :  { %1157 = vmatprep.subr.bf16.mxu0 %v3715_v13  ;;  %3088 = vmatprep.subr.bf16.mxu1 %v4829_v57 }
 0x60a   :  { %v975_v32 = vpop.f32.mrb[32].mxu0  ;;  %v1016_v40 = vpop.f32.mrb[24].mxu1 }
 0x60b   :  { %v1022_v61 = vadd.f32 %v975_v32, %v212_v0  ;;  %v977_v46 = vpop.f32.mrb[33].mxu0  ;;  %v3066_v62 = vpop.f32.mrb[25].mxu1  ;;  %v1036_v54 = vadd.f32 %v3923_v6, %v1016_v40 }
 0x60c   :  { %v1029_v50 = vadd.f32 %v977_v46, %v214_v7  ;;  %v979_v52 = vpop.f32.mrb[34].mxu0  ;;  %v1019_v10 = vpop.f32.mrb[26].mxu1 }
 0x60d   :  { %v2723_v53 = vmul.f32 -1.442695, %v1022_v61  ;;  %v980_v48 = vpop.f32.mrb[35].mxu0  ;;  %v3067_v25 = vpop.f32.mrb[27].mxu1 }
 0x60e   :  { %v2724_v13 = vmul.f32 -1.442695, %v1029_v50  ;;  %v3349_v48 = vld [vmem:[%s4808_s5 + $0x20] ss:$12 sps:$4 sm:$0xff]   ;;  %v1269_v25 = vpack.c.bf16 %v3998_v5, %v3927_v43  ;;  %v3350_v43 = vld [vmem:[%s4808_s5 + $0x30] ss:$12 sps:$4 sm:$0xff]  }
 0x60f   :  { %3464 = vpow2.f32 %v2723_v53  ;;  %v3348_v53 = vld [vmem:[%s4808_s5 + $0x1c] ss:$12 sps:$4 sm:$0xff]   ;;  %v3356_v5 = vld [vmem:[%s4808_s5 + $0x4c] ss:$12 sps:$4 sm:$0xff]  }
 0x610   :  { %3466 = vpow2.f32 %v2724_v13  ;;  %v3346_v13 = vld [vmem:[%s4808_s5 + $0x18] ss:$12 sps:$4 sm:$0xff]  }
 0x619   :  { %v3465_v49 = vpop.eup %3464 }
 0x61a   :  { %v1026_v44 = vadd.f32 1.0, %v3465_v49  ;;  %v3467_v51 = vpop.eup %3466  ;;  %v3352_v49 = vld [vmem:[%s4808_s5 + $0x34] ss:$12 sps:$4 sm:$0xff]  }
 0x61b   :  { %v1033_v16 = vadd.f32 1.0, %v3467_v51  ;;  %v3357_v51 = vld [vmem:[%s4808_s5 + $0x50] ss:$12 sps:$4 sm:$0xff]  }
 0x61c   :  { %3468 = vrcp.f32 %v1026_v44  ;;  %v3353_v44 = vld [vmem:[%s4808_s5 + $0x38] ss:$12 sps:$4 sm:$0xff]  }
 0x61d   :  { %3470 = vrcp.f32 %v1033_v16  ;;  %v3354_v16 = vld [vmem:[%s4808_s5 + $0x48] ss:$12 sps:$4 sm:$0xff]  }
 0x626   :  { %v3469_v42 = vpop.eup %3468 }
 0x627   :  { %v1037_v41 = vmul.f32 %v3469_v42, %v1036_v54  ;;  %v3471_v1 = vpop.eup %3470  ;;  %v3360_v54 = vld [vmem:[%s4808_s5 + $0x64] ss:$12 sps:$4 sm:$0xff]   ;;  %v3361_v42 = vld [vmem:[%s4808_s5 + $0x68] ss:$12 sps:$4 sm:$0xff]  }
 0x628   :  { %v1040_v60 = vsub.f32 1.0, %v3471_v1  ;;  %v1042_v0 = vmul.f32 %v3471_v1, %v4139_v11  ;;  %v3362_v1 = vld [vmem:[%s4808_s5 + $0x78] ss:$12 sps:$4 sm:$0xff]  }
 0x629   :  { %v1038_v56 = vadd.f32 %v1037_v41, %v280_v2  ;;  %v3358_v2 = vld [vmem:[%s4808_s5 + $0x60] ss:$12 sps:$4 sm:$0xff]   ;;  %v3364_v41 = vld [vmem:[%s4808_s5 + $0x7c] ss:$12 sps:$4 sm:$0xff]  }
 0x62b   :  { %3472 = vtanh.f32 %v1038_v56  ;;  %v3365_v56 = vld [vmem:[%s4808_s5 + $0x80] ss:$12 sps:$4 sm:$0xff]  }
 0x635   :  { %v3473_v3 = vpop.eup %3472 }
 0x636   :  { %v1041_v12 = vmul.f32 %v3473_v3, %v1040_v60  ;;  %v3368_v60 = vld [vmem:[%s4808_s5 + $0x94] ss:$12 sps:$4 sm:$0xff]   ;;  %v3369_v3 = vld [vmem:[%s4808_s5 + $0x98] ss:$12 sps:$4 sm:$0xff]  }
 0x638   :  { %v4186_v7 = vadd.f32 %v1042_v0, %v1041_v12  ;;  %v3366_v12 = vld [vmem:[%s4808_s5 + $0x90] ss:$12 sps:$4 sm:$0xff]   ;;  %v3372_v0 = vld [vmem:[%s4808_s5 + $0xac] ss:$12 sps:$4 sm:$0xff]  }
 0x63a   :  { %v1048_v32 = vpack.c.bf16 %v4186_v7, %v4186_v7 }
 0x63c   :  { %1082 = vmatmul.mubr.bf16.vlgmr.msra.gmra.mrb[36].mxu0 %v1048_v32  ;;  %3085 = vmatmul.mubr.bf16.vlgmr.msra.gmra.mrb[28].mxu1 %v1048_v32  ;;  %v3373_v32 = vld [vmem:[%s4808_s5 + $0xb0] ss:$12 sps:$4 sm:$0xff]  }
 0x63d   :  { %1158 = vmatpush1.bf16.msra.mxu0 %v3720_v14  ;;  %3089 = vmatpush3.bf16.msra.mxu1 %v3725_v15  ;;  %v3344_v14 = vld [vmem:[%s4808_s5 + $0x4] ss:$12 sps:$4 sm:$0xff]   ;;  %v3345_v15 = vld [vmem:[%s4808_s5 + $0x8] ss:$12 sps:$4 sm:$0xff]  }
 0x63e   :  { %1159 = vmatprep.subr.bf16.mxu0 %v3734_v17  ;;  %3090 = vmatprep.subr.bf16.mxu1 %v4829_v57  ;;  %v218_v17 = vadd.f32 %v3974_v55, %v3889_v45 }
 0x63f   :  { %1189 = vmatprep.mubr.bf16.mxu0 %v4830_v58  ;;  %3104 = vmatprep.mubr.msk.bf16.mxu1 %vm3604_vm2, %v4829_v57 }
 0x641   :  { %1160 = vmatpush1.bf16.msra.mxu0 %v3740_v18  ;;  %3091 = vmatpush3.bf16.msra.mxu1 %v3745_v19  ;;  %v220_v18 = vadd.f32 %v3978_v63, %v3893_v47 }
 0x642   :  { %1161 = vmatprep.subr.bf16.mxu0 %v3753_v20  ;;  %3092 = vmatprep.subr.bf16.mxu1 %v4829_v57 }
 0x645   :  { %1162 = vmatpush1.bf16.msra.mxu0 %v3759_v21  ;;  %3093 = vmatpush3.bf16.msra.mxu1 %v3764_v22 }
 0x646   :  { %1163 = vmatprep.subr.bf16.mxu0 %v3772_v23  ;;  %3094 = vmatprep.subr.bf16.mxu1 %v4829_v57 }
 0x649   :  { %1164 = vmatpush1.bf16.msra.mxu0 %v3778_v24  ;;  %3095 = vmatpush3.bf16.msra.mxu1 %v3786_v26 }
 0x64a   :  { %1165 = vmatprep.subr.bf16.mxu0 %v3795_v27  ;;  %3096 = vmatprep.subr.bf16.mxu1 %v4829_v57 }
 0x64d   :  { %1166 = vmatpush1.bf16.msra.mxu0 %v3801_v28  ;;  %3097 = vmatpush3.bf16.msra.mxu1 %v3806_v29 }
 0x64e   :  { %1167 = vmatprep.subr.bf16.mxu0 %v3816_v30  ;;  %3098 = vmatprep.subr.bf16.mxu1 %v4829_v57 }
 0x651   :  { %1168 = vmatpush1.bf16.msra.mxu0 %v3822_v31  ;;  %3099 = vmatpush3.bf16.msra.mxu1 %v3830_v33 }
 0x652   :  { %1169 = vmatprep.subr.bf16.mxu0 %v3839_v34  ;;  %3100 = vmatprep.subr.bf16.mxu1 %v4829_v57 }
 0x655   :  { %1170 = vmatpush1.bf16.msra.mxu0 %v3845_v35  ;;  %3101 = vmatpush3.bf16.msra.mxu1 %v3851_v36 }
 0x656   :  { %1171 = vmatprep.subr.bf16.mxu0 %v3860_v37  ;;  %3102 = vmatprep.subr.bf16.mxu1 %v4829_v57 }
 0x659   :  { %1172 = vmatpush1.bf16.msra.mxu0 %v3866_v38  ;;  %3103 = vmatpush3.bf16.msra.mxu1 %v3871_v39  ;;  %v4831_v39 = vld [vmem:[#allocation9_spill] sm:$0xff] }
 0x65a   :  { %1450 = vmatprep.subr.bf16.mxu0 %v3344_v14  ;;  %3108 = vmatprep.subr.bf16.mxu1 %v3345_v15  ;;  %v285_v55 = vadd.f32 %v4831_v39, %v3918_v4  ;;  %v3370_v14 = vld [vmem:[%s4808_s5 + $0xa8] ss:$12 sps:$4 sm:$0xff]  }
 0x65b   :  { %v4392_v39 = vld [vmem:[#allocation5 + $0xb0] ss:$12 sps:$4 sm:$0xff]  }
 0x70f   :  { %v1083_v19 = vpop.f32.mrb[36].mxu0  ;;  %v1124_v20 = vpop.f32.mrb[28].mxu1 }
 0x710   :  { %v1130_v21 = vadd.f32 %v1083_v19, %v218_v17  ;;  %v1085_v22 = vpop.f32.mrb[37].mxu0  ;;  %v3086_v23 = vpop.f32.mrb[29].mxu1  ;;  %v1144_v37 = vadd.f32 %v3923_v6, %v1124_v20  ;;  %v3342_v6 = vld [vmem:[%s4808_s5] ss:$12 sps:$4 sm:$0xff]   ;;  %v1271_v17 = vpack.c.bf16 %v4186_v7, %v4139_v11  ;;  %v4330_v11 = vld [vmem:[#allocation5 + $0x18] ss:$12 sps:$4 sm:$0xff]  }
 0x711   :  { %v1137_v24 = vadd.f32 %v1085_v22, %v220_v18  ;;  %v1087_v26 = vpop.f32.mrb[38].mxu0  ;;  %v1127_v27 = vpop.f32.mrb[30].mxu1  ;;  %v4318_v18 = vld [vmem:[#allocation5 + $0x4] ss:$12 sps:$4 sm:$0xff]   ;;  %v4320_v19 = vld [vmem:[#allocation5] ss:$12 sps:$4 sm:$0xff]  }
 0x712   :  { %v2725_v28 = vmul.f32 -1.442695, %v1130_v21  ;;  %v1088_v29 = vpop.f32.mrb[39].mxu0  ;;  %v3087_v30 = vpop.f32.mrb[31].mxu1  ;;  %v4337_v20 = vld [vmem:[#allocation5 + $0x34] ss:$12 sps:$4 sm:$0xff]  }
 0x713   :  { %v2726_v31 = vmul.f32 -1.442695, %v1137_v24  ;;  %v4340_v21 = vld [vmem:[#allocation5 + $0x30] ss:$12 sps:$4 sm:$0xff]   ;;  %v4342_v22 = vld [vmem:[#allocation5 + $0x38] ss:$12 sps:$4 sm:$0xff]  }
 0x714   :  { %3474 = vpow2.f32 %v2725_v28  ;;  %v4347_v23 = vld [vmem:[#allocation5 + $0x4c] ss:$12 sps:$4 sm:$0xff]   ;;  %v4350_v24 = vld [vmem:[#allocation5 + $0x48] ss:$12 sps:$4 sm:$0xff]   ;;  %v4352_v26 = vld [vmem:[#allocation5 + $0x50] ss:$12 sps:$4 sm:$0xff]  }
 0x715   :  { %3476 = vpow2.f32 %v2726_v31  ;;  %v4357_v27 = vld [vmem:[#allocation5 + $0x64] ss:$12 sps:$4 sm:$0xff]   ;;  %v4360_v28 = vld [vmem:[#allocation5 + $0x60] ss:$12 sps:$4 sm:$0xff]   ;;  %v4362_v29 = vld [vmem:[#allocation5 + $0x68] ss:$12 sps:$4 sm:$0xff]  }
 0x716   :  { %v4367_v30 = vld [vmem:[#allocation5 + $0x7c] ss:$12 sps:$4 sm:$0xff]   ;;  %v4370_v31 = vld [vmem:[#allocation5 + $0x78] ss:$12 sps:$4 sm:$0xff]  }
 0x71e   :  { %v3475_v33 = vpop.eup %3474 }
 0x71f   :  { %v1134_v34 = vadd.f32 1.0, %v3475_v33  ;;  %v3477_v35 = vpop.eup %3476  ;;  %v4372_v33 = vld [vmem:[#allocation5 + $0x80] ss:$12 sps:$4 sm:$0xff]  }
 0x720   :  { %v1141_v36 = vadd.f32 1.0, %v3477_v35  ;;  %v4380_v35 = vld [vmem:[#allocation5 + $0x90] ss:$12 sps:$4 sm:$0xff]  }
 0x721   :  { %3478 = vrcp.f32 %v1134_v34  ;;  %v4377_v34 = vld [vmem:[#allocation5 + $0x94] ss:$12 sps:$4 sm:$0xff]  }
 0x722   :  { %3480 = vrcp.f32 %v1141_v36  ;;  %v4382_v36 = vld [vmem:[#allocation5 + $0x98] ss:$12 sps:$4 sm:$0xff]  }
 0x72b   :  { %v3479_v38 = vpop.eup %3478 }
 0x72c   :  { %v1145_v63 = vmul.f32 %v3479_v38, %v1144_v37  ;;  %v3481_v40 = vpop.eup %3480  ;;  %v4387_v37 = vld [vmem:[#allocation5 + $0xac] ss:$12 sps:$4 sm:$0xff]   ;;  %v4389_v38 = vld [vmem:[#allocation5 + $0xa8] ss:$12 sps:$4 sm:$0xff]  }
 0x72d   :  { %v1148_v61 = vsub.f32 1.0, %v3481_v40  ;;  %v1150_v50 = vmul.f32 %v3481_v40, %v4186_v7  ;;  %v4332_v7 = vld [vmem:[#allocation5 + $0x20] ss:$12 sps:$4 sm:$0xff]  }
 0x72e   :  { %v1146_v8 = vadd.f32 %v1145_v63, %v285_v55  ;;  %v4832_v55 = vld [vmem:[#allocation10_spill] sm:$0xff] }
 0x72f   :  { %v222_v63 = vadd.f32 %v4832_v55, %v3889_v45 }
 0x730   :  { %3482 = vtanh.f32 %v1146_v8  ;;  %v4833_v8 = vld [vmem:[#allocation12_spill] sm:$0xff] }
 0x731   :  { %v224_v40 = vadd.f32 %v4833_v8, %v3893_v47  ;;  %v1305_v47 = vld [vmem:[%s4809_s6] sm:$0x7] }
 0x73a   :  { %v3483_v46 = vpop.eup %3482 }
 0x73b   :  { %v1149_v62 = vmul.f32 %v3483_v46, %v1148_v61 }
 0x73d   :  { %v4237_v52 = vadd.f32 %v1150_v50, %v1149_v62 }
 0x73f   :  { %v1156_v10 = vpack.c.bf16 %v4237_v52, %v4237_v52 }
 0x741   :  { %1190 = vmatmul.mubr.bf16.vlgmr.msra.gmra.mrb[40].mxu0 %v1156_v10  ;;  %3105 = vmatmul.mubr.bf16.vlgmr.msra.gmra.mrb[32].mxu1 %v1156_v10 }
 0x742   :  { %1451 = vmatpush1.bf16.msra.mxu0 %v3342_v6  ;;  %3109 = vmatpush3.bf16.msra.mxu1 %v3345_v15  ;;  %v1270_v15 = vpack.c.bf16 %v4092_v59, %v4045_v9  ;;  %v4322_v9 = vld [vmem:[#allocation5 + $0x8] ss:$12 sps:$4 sm:$0xff]  }
 0x743   :  { %3124 = vmatprep.mubr.bf16.mxu1 %v1269_v25  ;;  %1452 = vmatprep.subr.bf16.mxu0 %v3348_v53  ;;  %v4327_v59 = vld [vmem:[#allocation5 + $0x1c] ss:$12 sps:$4 sm:$0xff]  }
 0x744   :  { %3110 = vmatprep.subr.bf16.mxu1 %v3349_v48  ;;  %1482 = vmatprep.mubr.bf16.mxu0 %v4830_v58 }
 0x746   :  { %1453 = vmatpush1.bf16.msra.mxu0 %v3346_v13  ;;  %3111 = vmatpush3.bf16.msra.mxu1 %v3349_v48 }
 0x747   :  { %1454 = vmatprep.subr.bf16.mxu0 %v3352_v49  ;;  %3112 = vmatprep.subr.bf16.mxu1 %v3353_v44 }
 0x74a   :  { %1455 = vmatpush1.bf16.msra.mxu0 %v3350_v43  ;;  %3113 = vmatpush3.bf16.msra.mxu1 %v3353_v44 }
 0x74b   :  { %1456 = vmatprep.subr.bf16.mxu0 %v3356_v5  ;;  %3114 = vmatprep.subr.bf16.mxu1 %v3357_v51 }
 0x74e   :  { %1457 = vmatpush1.bf16.msra.mxu0 %v3354_v16  ;;  %3115 = vmatpush3.bf16.msra.mxu1 %v3357_v51  ;;  %v3574_v16 = vld [vmem:[%s4807_s4] ss:$0 sm:$0xff] }
 0x74f   :  { %1458 = vmatprep.subr.bf16.mxu0 %v3360_v54  ;;  %3116 = vmatprep.subr.bf16.mxu1 %v3361_v42 }
 0x752   :  { %1459 = vmatpush1.bf16.msra.mxu0 %v3358_v2  ;;  %3117 = vmatpush3.bf16.msra.mxu1 %v3361_v42  ;;  %v4834_v2 = vld [vmem:[#allocation11_spill] sm:$0xff] }
 0x753   :  { %1460 = vmatprep.subr.bf16.mxu0 %v3364_v41  ;;  %3118 = vmatprep.subr.bf16.mxu1 %v3365_v56  ;;  %v288_v41 = vadd.f32 %v4834_v2, %v3918_v4 }
 0x756   :  { %1461 = vmatpush1.bf16.msra.mxu0 %v3362_v1  ;;  %3119 = vmatpush3.bf16.msra.mxu1 %v3365_v56  ;;  %v4835_v1 = vld [vmem:[#allocation8_spill] sm:$0xff] }
 0x757   :  { %1462 = vmatprep.subr.bf16.mxu0 %v3368_v60  ;;  %3120 = vmatprep.subr.bf16.mxu1 %v3369_v3  ;;  %v4836_v60 = vsub.s32 0, %v4835_v1 }
 0x75a   :  { %1463 = vmatpush1.bf16.msra.mxu0 %v3366_v12  ;;  %3121 = vmatpush3.bf16.msra.mxu1 %v3369_v3  ;;  %v4413_v3 = vrot.slane %v1305_v47, %v4836_v60  ;;  %v4838_v60 = vsub.s32 2, %v4835_v1 }
 0x75b   :  { %1464 = vmatprep.subr.bf16.mxu0 %v3372_v0  ;;  %3122 = vmatprep.subr.bf16.mxu1 %v3373_v32 }
 0x75e   :  { %1465 = vmatpush1.bf16.msra.mxu0 %v3370_v14  ;;  %3123 = vmatpush3.bf16.msra.mxu1 %v3373_v32  ;;  %v4837_v14 = vsub.s32 1, %v4835_v1 }
 0x75f   :  { %3132 = vmatprep.subr.bf16.mxu1 %v4829_v57  ;;  %1805 = vmatprep.subr.bf16.mxu0 %v4318_v18 }
 0x761   :  { %1483 = vmatmul.mubr.bf16.vlgmr.msra.gmra.mrb[44].mxu0 %v1269_v25  ;;  %3125 = vmatmul.mubr.bf16.vlgmr.msra.gmra.mrb[36].mxu1 %v1270_v15 }
 0x762   :  { %3128 = vmatprep.mubr.bf16.mxu1 %v1271_v17  ;;  %1492 = vmatprep.mubr.bf16.mxu0 %v4830_v58 }
 0x763   :  { %1806 = vmatpush1.bf16.msra.mxu0 %v4320_v19  ;;  %3133 = vmatpush3.bf16.msra.mxu1 %v4322_v9 }
 0x764   :  { %3134 = vmatprep.subr.bf16.mxu1 %v4829_v57  ;;  %1807 = vmatprep.subr.bf16.mxu0 %v4327_v59 }
 0x767   :  { %1808 = vmatpush1.bf16.msra.mxu0 %v4330_v11  ;;  %3135 = vmatpush3.bf16.msra.mxu1 %v4332_v7 }
 0x768   :  { %3136 = vmatprep.subr.bf16.mxu1 %v4829_v57  ;;  %1809 = vmatprep.subr.bf16.mxu0 %v4337_v20 }
 0x769   :  { %1493 = vmatmul.mubr.bf16.gmra.mrb[48].mxu0 %v1270_v15  ;;  %v4419_v15 = vrot.slane %v1305_v47, %v4837_v14 }
 0x76a   :  { %1502 = vmatprep.mubr.bf16.mxu0 %v4830_v58 }
 0x76b   :  { %1810 = vmatpush1.bf16.msra.mxu0 %v4340_v21  ;;  %3137 = vmatpush3.bf16.msra.mxu1 %v4342_v22 }
 0x76c   :  { %3138 = vmatprep.subr.bf16.mxu1 %v4829_v57  ;;  %1811 = vmatprep.subr.bf16.mxu0 %v4347_v23 }
 0x76f   :  { %1812 = vmatpush1.bf16.msra.mxu0 %v4350_v24  ;;  %3139 = vmatpush3.bf16.msra.mxu1 %v4352_v26 }
 0x770   :  { %3140 = vmatprep.subr.bf16.mxu1 %v4829_v57  ;;  %1813 = vmatprep.subr.bf16.mxu0 %v4357_v27 }
 0x771   :  { %1503 = vmatmul.mubr.bf16.gmra.mrb[52].mxu0 %v1271_v17 }
 0x772   :  { %1512 = vmatprep.mubr.bf16.mxu0 %v4830_v58 }
 0x773   :  { %1814 = vmatpush1.bf16.msra.mxu0 %v4360_v28  ;;  %3141 = vmatpush3.bf16.msra.mxu1 %v4362_v29 }
 0x774   :  { %3142 = vmatprep.subr.bf16.mxu1 %v4829_v57  ;;  %1815 = vmatprep.subr.bf16.mxu0 %v4367_v30 }
 0x777   :  { %1816 = vmatpush1.bf16.msra.mxu0 %v4370_v31  ;;  %3143 = vmatpush3.bf16.msra.mxu1 %v4372_v33 }
 0x778   :  { %3144 = vmatprep.subr.bf16.mxu1 %v4829_v57  ;;  %1817 = vmatprep.subr.bf16.mxu0 %v4377_v34 }
 0x77b   :  { %1818 = vmatpush1.bf16.msra.mxu0 %v4380_v35  ;;  %3145 = vmatpush3.bf16.msra.mxu1 %v4382_v36 }
 0x77c   :  { %3146 = vmatprep.subr.bf16.mxu1 %v4829_v57  ;;  %1819 = vmatprep.subr.bf16.mxu0 %v4387_v37 }
 0x77f   :  { %1820 = vmatpush1.bf16.msra.mxu0 %v4389_v38  ;;  %3147 = vmatpush3.bf16.msra.mxu1 %v4392_v39 }
 0x780   :  { %1912 = vmatprep.subr.bf16.mxu0 %v4318_v18  ;;  %3152 = vmatprep.subr.bf16.mxu1 %v4829_v57 }
 0x814   :  { %v1191_v61 = vpop.f32.mrb[40].mxu0  ;;  %v1232_v46 = vpop.f32.mrb[32].mxu1 }
 0x815   :  { %v1238_v62 = vadd.f32 %v1191_v61, %v222_v63  ;;  %v1193_v50 = vpop.f32.mrb[41].mxu0  ;;  %v3106_v6 = vpop.f32.mrb[33].mxu1  ;;  %v1252_v54 = vadd.f32 %v3574_v16, %v1232_v46 }
 0x816   :  { %v1245_v10 = vadd.f32 %v1193_v50, %v224_v40  ;;  %v1195_v53 = vpop.f32.mrb[42].mxu0  ;;  %v1235_v48 = vpop.f32.mrb[34].mxu1 }
 0x817   :  { %v2727_v25 = vmul.f32 -1.442695, %v1238_v62  ;;  %v1196_v13 = vpop.f32.mrb[43].mxu0  ;;  %v3107_v49 = vpop.f32.mrb[35].mxu1 }
 0x818   :  { %v2728_v44 = vmul.f32 -1.442695, %v1245_v10 }
 0x819   :  { %3484 = vpow2.f32 %v2727_v25 }
 0x81a   :  { %3486 = vpow2.f32 %v2728_v44 }
 0x823   :  { %v3485_v43 = vpop.eup %3484 }
 0x824   :  { %v1242_v5 = vadd.f32 1.0, %v3485_v43  ;;  %v3487_v45 = vpop.eup %3486 }
 0x825   :  { %v1249_v51 = vadd.f32 1.0, %v3487_v45 }
 0x826   :  { %3488 = vrcp.f32 %v1242_v5 }
 0x827   :  { %3490 = vrcp.f32 %v1249_v51 }
 0x830   :  { %v3489_v42 = vpop.eup %3488 }
 0x831   :  { %v1253_v56 = vmul.f32 %v3489_v42, %v1252_v54  ;;  %v3491_v50 = vpop.eup %3490 }
 0x832   :  { %v1256_v25 = vsub.f32 1.0, %v3491_v50  ;;  %v1258_v43 = vmul.f32 %v3491_v50, %v4237_v52 }
 0x833   :  { %v1254_v12 = vadd.f32 %v1253_v56, %v288_v41 }
 0x834   :  { %v1484_v0 = vpop.f32.mrb[44].mxu0  ;;  %v4415_v32 = vpop.f32.mrb[36].mxu1 }
 0x835   :  { %3492 = vtanh.f32 %v1254_v12  ;;  %v1485_v17 = vadd.f32 %v1484_v0, %v4413_v3  ;;  %v1486_v55 = vpop.f32.mrb[45].mxu0  ;;  %v1557_v63 = vpop.f32.mrb[37].mxu1  ;;  %v4454_v12 = vrot.slane %v1305_v47, %v4838_v60  ;;  %v4459_v0 = vld [vmem:[%s4811_s8] ss:$0 sm:$0xff] }
 0x836   :  { %v4422_v4 = vpop.f32.mrb[46].mxu0  ;;  %v4424_v8 = vpop.f32.mrb[38].mxu1  ;;  %v1487_v62 = vadd.f32 %v1486_v55, %v4419_v15 }
 0x837   :  { %v2753_v40 = vmul.f32 -1.442695, %v1485_v17  ;;  %v4426_v61 = vpop.f32.mrb[47].mxu0  ;;  %v4428_v46 = vpop.f32.mrb[39].mxu1  ;;  %v1558_v17 = vadd.f32 %v1557_v63, %v4454_v12  ;;  %v1489_v60 = vadd.f32 %v4422_v4, %v4413_v3 }
 0x838   :  { %v2754_v6 = vmul.f32 -1.442695, %v1487_v62 }
 0x839   :  { %3494 = vpow2.f32 %v2753_v40 }
 0x83a   :  { %3496 = vpow2.f32 %v2754_v6 }
 0x83c   :  { %v4431_v10 = vpop.f32.mrb[48].mxu0 }
 0x83d   :  { %v4433_v53 = vpop.f32.mrb[49].mxu0 }
 0x83e   :  { %v4435_v48 = vpop.f32.mrb[50].mxu0 }
 0x83f   :  { %v3493_v13 = vpop.eup %3492  ;;  %v4437_v49 = vpop.f32.mrb[51].mxu0 }
 0x840   :  { %v1257_v44 = vmul.f32 %v3493_v13, %v1256_v25 }
 0x842   :  { %v1259_v5 = vadd.f32 %v1258_v43, %v1257_v44 }
 0x843   :  { %v3495_v45 = vpop.eup %3494 }
 0x844   :  { %v1651_v51 = vadd.f32 1.0, %v3495_v45  ;;  %v4440_v16 = vpop.f32.mrb[52].mxu0  ;;  %v1272_v54 = vpack.c.bf16 %v1259_v5, %v4237_v52  ;;  %v3497_v56 = vpop.eup %3496 }
 0x845   :  { %v4443_v42 = vpop.f32.mrb[53].mxu0  ;;  %v1657_v52 = vadd.f32 1.0, %v3497_v56 }
 0x846   :  { %3498 = vrcp.f32 %v1651_v51  ;;  %v4445_v2 = vpop.f32.mrb[54].mxu0  ;;  %1513 = vmatmul.mubr.bf16.gmra.mrb[56].mxu0 %v1272_v54  ;;  %3129 = vmatmul.mubr.bf16.gmra.mrb[40].mxu1 %v1272_v54 }
 0x847   :  { %v4447_v41 = vpop.f32.mrb[55].mxu0  ;;  %1837 = vmatprep.mubr.bf16.mxu0 %v4830_v58  ;;  %3148 = vmatprep.mubr.msk.bf16.mxu1 %vm3604_vm2, %v4829_v57  ;;  %3500 = vrcp.f32 %v1657_v52  ;;  %v1491_v52 = vadd.f32 %v4426_v61, %v4419_v15 }
 0x850   :  { %v3499_v14 = vpop.eup %3498 }
 0x851   :  { %v1666_v55 = vmul.f32 %v3499_v14, %v4459_v0  ;;  %v3501_v62 = vpop.eup %3500 }
 0x852   :  { %v1669_v50 = vsub.f32 1.0, %v3501_v62  ;;  %v1671_v1 = vmul.f32 0.0, %v3501_v62 }
 0x853   :  { %v1667_v40 = vadd.f32 %v1666_v55, %v1558_v17 }
 0x855   :  { %3502 = vtanh.f32 %v1667_v40 }
 0x85f   :  { %v3503_v6 = vpop.eup %3502 }
 0x860   :  { %v1670_v47 = vmul.f32 %v3503_v6, %v1669_v50 }
 0x862   :  { %v4463_v25 = vadd.f32 %v1671_v1, %v1670_v47 }
 0x864   :  { %v1676_v13 = vpack.c.bf16 %v4463_v25, %v4463_v25 }
 0x866   :  { %1838 = vmatmul.mubr.bf16.vlgmr.msra.gmra.mrb[60].mxu0 %v1676_v13  ;;  %3149 = vmatmul.mubr.bf16.vlgmr.msra.gmra.mrb[44].mxu1 %v1676_v13 }
 0x867   :  { %1913 = vmatpush1.bf16.msra.mxu0 %v4320_v19  ;;  %3153 = vmatpush3.bf16.msra.mxu1 %v4322_v9 }
 0x868   :  { %1914 = vmatprep.subr.bf16.mxu0 %v4327_v59  ;;  %3154 = vmatprep.subr.bf16.mxu1 %v4829_v57 }
 0x869   :  { %1944 = vmatprep.mubr.bf16.mxu0 %v4830_v58  ;;  %3168 = vmatprep.mubr.msk.bf16.mxu1 %vm3604_vm2, %v4829_v57 }
 0x86b   :  { %1915 = vmatpush1.bf16.msra.mxu0 %v4330_v11  ;;  %3155 = vmatpush3.bf16.msra.mxu1 %v4332_v7 }
 0x86c   :  { %1916 = vmatprep.subr.bf16.mxu0 %v4337_v20  ;;  %3156 = vmatprep.subr.bf16.mxu1 %v4829_v57 }
 0x86f   :  { %1917 = vmatpush1.bf16.msra.mxu0 %v4340_v21  ;;  %3157 = vmatpush3.bf16.msra.mxu1 %v4342_v22 }
 0x870   :  { %1918 = vmatprep.subr.bf16.mxu0 %v4347_v23  ;;  %3158 = vmatprep.subr.bf16.mxu1 %v4829_v57 }
 0x873   :  { %1919 = vmatpush1.bf16.msra.mxu0 %v4350_v24  ;;  %3159 = vmatpush3.bf16.msra.mxu1 %v4352_v26 }
 0x874   :  { %1920 = vmatprep.subr.bf16.mxu0 %v4357_v27  ;;  %3160 = vmatprep.subr.bf16.mxu1 %v4829_v57 }
 0x877   :  { %1921 = vmatpush1.bf16.msra.mxu0 %v4360_v28  ;;  %3161 = vmatpush3.bf16.msra.mxu1 %v4362_v29 }
 0x878   :  { %1922 = vmatprep.subr.bf16.mxu0 %v4367_v30  ;;  %3162 = vmatprep.subr.bf16.mxu1 %v4829_v57 }
 0x87b   :  { %1923 = vmatpush1.bf16.msra.mxu0 %v4370_v31  ;;  %3163 = vmatpush3.bf16.msra.mxu1 %v4372_v33 }
 0x87c   :  { %1924 = vmatprep.subr.bf16.mxu0 %v4377_v34  ;;  %3164 = vmatprep.subr.bf16.mxu1 %v4829_v57 }
 0x87f   :  { %1925 = vmatpush1.bf16.msra.mxu0 %v4380_v35  ;;  %3165 = vmatpush3.bf16.msra.mxu1 %v4382_v36 }
 0x880   :  { %1926 = vmatprep.subr.bf16.mxu0 %v4387_v37  ;;  %3166 = vmatprep.subr.bf16.mxu1 %v4829_v57 }
 0x883   :  { %1927 = vmatpush1.bf16.msra.mxu0 %v4389_v38  ;;  %3167 = vmatpush3.bf16.msra.mxu1 %v4392_v39 }
 0x884   :  { %2019 = vmatprep.subr.bf16.mxu0 %v4318_v18  ;;  %3172 = vmatprep.subr.bf16.mxu1 %v4829_v57 }
 0x919   :  { %v4502_v63 = vpop.f32.mrb[56].mxu0  ;;  %v4504_v44 = vpop.f32.mrb[40].mxu1 }
 0x91a   :  { %4839 = vst [vmem:[#allocation9_spill] sm:$0xff] %v4502_v63  ;;  %4840 = vst [vmem:[#allocation10_spill] sm:$0xff] %v4504_v44  ;;  %v4506_v43 = vpop.f32.mrb[57].mxu0  ;;  %v4508_v5 = vpop.f32.mrb[41].mxu1 }
 0x91b   :  { %4841 = vst [vmem:[#allocation12_spill] sm:$0xff] %v4506_v43  ;;  %v4510_v45 = vpop.f32.mrb[58].mxu0  ;;  %v4512_v51 = vpop.f32.mrb[42].mxu1 }
 0x91c   :  { %4842 = vst [vmem:[#allocation11_spill] sm:$0xff] %v4510_v45  ;;  %4843 = vst [vmem:[#allocation8_spill] sm:$0xff] %v4512_v51  ;;  %v4514_v54 = vpop.f32.mrb[59].mxu0  ;;  %v4516_v56 = vpop.f32.mrb[43].mxu1 }
 0x91d   :  { %4844 = vst [vmem:[#allocation13_spill] sm:$0xff] %v4514_v54 }
 0x939   :  { %v1839_v14 = vpop.f32.mrb[60].mxu0  ;;  %v1880_v17 = vpop.f32.mrb[44].mxu1 }
 0x93a   :  { %v1886_v55 = vadd.f32 %v1839_v14, %v1489_v60  ;;  %v1841_v40 = vpop.f32.mrb[61].mxu0  ;;  %v3150_v62 = vpop.f32.mrb[45].mxu1  ;;  %v1900_v61 = vadd.f32 %v4459_v0, %v1880_v17  ;;  %v1561_v60 = vadd.f32 %v4428_v46, %v4454_v12  ;;  %v1495_v46 = vadd.f32 %v4431_v10, %v4413_v3 }
 0x93b   :  { %v1893_v50 = vadd.f32 %v1841_v40, %v1491_v52  ;;  %v1843_v6 = vpop.f32.mrb[62].mxu0  ;;  %v1883_v1 = vpop.f32.mrb[46].mxu1 }
 0x93c   :  { %v2780_v47 = vmul.f32 -1.442695, %v1886_v55  ;;  %v1844_v13 = vpop.f32.mrb[63].mxu0  ;;  %v3151_v51 = vpop.f32.mrb[47].mxu1 }
 0x93d   :  { %v2781_v54 = vmul.f32 -1.442695, %v1893_v50 }
 0x93e   :  { %3504 = vpow2.f32 %v2780_v47 }
 0x93f   :  { %3506 = vpow2.f32 %v2781_v54 }
 0x948   :  { %v3505_v45 = vpop.eup %3504 }
 0x949   :  { %v1890_v44 = vadd.f32 1.0, %v3505_v45  ;;  %v3507_v4 = vpop.eup %3506 }
 0x94a   :  { %v1897_v43 = vadd.f32 1.0, %v3507_v4 }
 0x94b   :  { %3508 = vrcp.f32 %v1890_v44 }
 0x94c   :  { %3510 = vrcp.f32 %v1897_v43 }
 0x955   :  { %v3509_v63 = vpop.eup %3508 }
 0x956   :  { %v1901_v52 = vmul.f32 %v3509_v63, %v1900_v61  ;;  %v3511_v55 = vpop.eup %3510 }
 0x957   :  { %v1904_v51 = vsub.f32 1.0, %v3511_v55  ;;  %v1906_v54 = vmul.f32 %v3511_v55, %v4463_v25  ;;  %v1497_v25 = vadd.f32 %v4433_v53, %v4419_v15 }
 0x958   :  { %v1902_v14 = vadd.f32 %v1901_v52, %v1561_v60 }
 0x95a   :  { %3512 = vtanh.f32 %v1902_v14 }
 0x964   :  { %v3513_v40 = vpop.eup %3512 }
 0x965   :  { %v1905_v62 = vmul.f32 %v3513_v40, %v1904_v51 }
 0x967   :  { %v4526_v45 = vadd.f32 %v1906_v54, %v1905_v62  ;;  %v1566_v62 = vadd.f32 %v4415_v32, %v4454_v12  ;;  %v1499_v32 = vadd.f32 %v4435_v48, %v4413_v3 }
 0x969   :  { %v1911_v44 = vpack.c.bf16 %v4526_v45, %v4526_v45 }
 0x96b   :  { %1945 = vmatmul.mubr.bf16.vlgmr.msra.gmra.mrb[64].mxu0 %v1911_v44  ;;  %3169 = vmatmul.mubr.bf16.vlgmr.msra.gmra.mrb[48].mxu1 %v1911_v44 }
 0x96c   :  { %2020 = vmatpush1.bf16.msra.mxu0 %v4320_v19  ;;  %3173 = vmatpush3.bf16.msra.mxu1 %v4322_v9 }
 0x96d   :  { %2021 = vmatprep.subr.bf16.mxu0 %v4327_v59  ;;  %3174 = vmatprep.subr.bf16.mxu1 %v4829_v57 }
 0x96e   :  { %2051 = vmatprep.mubr.bf16.mxu0 %v4830_v58  ;;  %3188 = vmatprep.mubr.msk.bf16.mxu1 %vm3604_vm2, %v4829_v57 }
 0x970   :  { %2022 = vmatpush1.bf16.msra.mxu0 %v4330_v11  ;;  %3175 = vmatpush3.bf16.msra.mxu1 %v4332_v7 }
 0x971   :  { %2023 = vmatprep.subr.bf16.mxu0 %v4337_v20  ;;  %3176 = vmatprep.subr.bf16.mxu1 %v4829_v57 }
 0x974   :  { %2024 = vmatpush1.bf16.msra.mxu0 %v4340_v21  ;;  %3177 = vmatpush3.bf16.msra.mxu1 %v4342_v22 }
 0x975   :  { %2025 = vmatprep.subr.bf16.mxu0 %v4347_v23  ;;  %3178 = vmatprep.subr.bf16.mxu1 %v4829_v57 }
 0x978   :  { %2026 = vmatpush1.bf16.msra.mxu0 %v4350_v24  ;;  %3179 = vmatpush3.bf16.msra.mxu1 %v4352_v26 }
 0x979   :  { %2027 = vmatprep.subr.bf16.mxu0 %v4357_v27  ;;  %3180 = vmatprep.subr.bf16.mxu1 %v4829_v57 }
 0x97c   :  { %2028 = vmatpush1.bf16.msra.mxu0 %v4360_v28  ;;  %3181 = vmatpush3.bf16.msra.mxu1 %v4362_v29 }
 0x97d   :  { %2029 = vmatprep.subr.bf16.mxu0 %v4367_v30  ;;  %3182 = vmatprep.subr.bf16.mxu1 %v4829_v57 }
 0x980   :  { %2030 = vmatpush1.bf16.msra.mxu0 %v4370_v31  ;;  %3183 = vmatpush3.bf16.msra.mxu1 %v4372_v33 }
 0x981   :  { %2031 = vmatprep.subr.bf16.mxu0 %v4377_v34  ;;  %3184 = vmatprep.subr.bf16.mxu1 %v4829_v57 }
 0x984   :  { %2032 = vmatpush1.bf16.msra.mxu0 %v4380_v35  ;;  %3185 = vmatpush3.bf16.msra.mxu1 %v4382_v36 }
 0x985   :  { %2033 = vmatprep.subr.bf16.mxu0 %v4387_v37  ;;  %3186 = vmatprep.subr.bf16.mxu1 %v4829_v57 }
 0x988   :  { %2034 = vmatpush1.bf16.msra.mxu0 %v4389_v38  ;;  %3187 = vmatpush3.bf16.msra.mxu1 %v4392_v39 }
 0x989   :  { %2126 = vmatprep.subr.bf16.mxu0 %v4318_v18  ;;  %3192 = vmatprep.subr.bf16.mxu1 %v4829_v57 }
 0xa3e   :  { %v1946_v63 = vpop.f32.mrb[64].mxu0  ;;  %v1987_v43 = vpop.f32.mrb[48].mxu1 }
 0xa3f   :  { %v1993_v17 = vadd.f32 %v1946_v63, %v1495_v46  ;;  %v1948_v50 = vpop.f32.mrb[65].mxu0  ;;  %v3170_v6 = vpop.f32.mrb[49].mxu1  ;;  %v2007_v53 = vadd.f32 %v4459_v0, %v1987_v43 }
 0xa40   :  { %v2000_v1 = vadd.f32 %v1948_v50, %v1497_v25  ;;  %v1950_v47 = vpop.f32.mrb[66].mxu0  ;;  %v1990_v13 = vpop.f32.mrb[50].mxu1 }
 0xa41   :  { %v2782_v4 = vmul.f32 -1.442695, %v1993_v17  ;;  %v1951_v61 = vpop.f32.mrb[67].mxu0  ;;  %v3171_v60 = vpop.f32.mrb[51].mxu1 }
 0xa42   :  { %v2783_v52 = vmul.f32 -1.442695, %v2000_v1 }
 0xa43   :  { %3514 = vpow2.f32 %v2782_v4 }
 0xa44   :  { %3516 = vpow2.f32 %v2783_v52 }
 0xa4d   :  { %v3515_v14 = vpop.eup %3514 }
 0xa4e   :  { %v1997_v55 = vadd.f32 1.0, %v3515_v14  ;;  %v3517_v10 = vpop.eup %3516 }
 0xa4f   :  { %v2004_v51 = vadd.f32 1.0, %v3517_v10 }
 0xa50   :  { %3518 = vrcp.f32 %v1997_v55 }
 0xa51   :  { %3520 = vrcp.f32 %v2004_v51 }
 0xa5a   :  { %v3519_v40 = vpop.eup %3518 }
 0xa5b   :  { %v2008_v54 = vmul.f32 %v3519_v40, %v2007_v53  ;;  %v3521_v46 = vpop.eup %3520 }
 0xa5c   :  { %v2011_v25 = vsub.f32 1.0, %v3521_v46  ;;  %v2013_v50 = vmul.f32 %v3521_v46, %v4526_v45  ;;  %v1501_v45 = vadd.f32 %v4437_v49, %v4419_v15  ;;  %v1569_v46 = vadd.f32 %v4424_v8, %v4454_v12 }
 0xa5d   :  { %v2009_v44 = vadd.f32 %v2008_v54, %v1566_v62  ;;  %v1505_v8 = vadd.f32 %v4440_v16, %v4413_v3 }
 0xa5f   :  { %3522 = vtanh.f32 %v2009_v44 }
 0xa69   :  { %v3523_v63 = vpop.eup %3522 }
 0xa6a   :  { %v2012_v17 = vmul.f32 %v3523_v63, %v2011_v25 }
 0xa6c   :  { %v4573_v6 = vadd.f32 %v2013_v50, %v2012_v17 }
 0xa6e   :  { %v2018_v1 = vpack.c.bf16 %v4573_v6, %v4573_v6 }
 0xa70   :  { %2052 = vmatmul.mubr.bf16.vlgmr.msra.gmra.mrb[68].mxu0 %v2018_v1  ;;  %3189 = vmatmul.mubr.bf16.vlgmr.msra.gmra.mrb[52].mxu1 %v2018_v1 }
 0xa71   :  { %2127 = vmatpush1.bf16.msra.mxu0 %v4320_v19  ;;  %3193 = vmatpush3.bf16.msra.mxu1 %v4322_v9 }
 0xa72   :  { %2128 = vmatprep.subr.bf16.mxu0 %v4327_v59  ;;  %3194 = vmatprep.subr.bf16.mxu1 %v4829_v57 }
 0xa73   :  { %2158 = vmatprep.mubr.bf16.mxu0 %v4830_v58  ;;  %3208 = vmatprep.mubr.msk.bf16.mxu1 %vm3604_vm2, %v4829_v57 }
 0xa75   :  { %2129 = vmatpush1.bf16.msra.mxu0 %v4330_v11  ;;  %3195 = vmatpush3.bf16.msra.mxu1 %v4332_v7 }
 0xa76   :  { %2130 = vmatprep.subr.bf16.mxu0 %v4337_v20  ;;  %3196 = vmatprep.subr.bf16.mxu1 %v4829_v57 }
 0xa79   :  { %2131 = vmatpush1.bf16.msra.mxu0 %v4340_v21  ;;  %3197 = vmatpush3.bf16.msra.mxu1 %v4342_v22 }
 0xa7a   :  { %2132 = vmatprep.subr.bf16.mxu0 %v4347_v23  ;;  %3198 = vmatprep.subr.bf16.mxu1 %v4829_v57 }
 0xa7d   :  { %2133 = vmatpush1.bf16.msra.mxu0 %v4350_v24  ;;  %3199 = vmatpush3.bf16.msra.mxu1 %v4352_v26 }
 0xa7e   :  { %2134 = vmatprep.subr.bf16.mxu0 %v4357_v27  ;;  %3200 = vmatprep.subr.bf16.mxu1 %v4829_v57 }
 0xa81   :  { %2135 = vmatpush1.bf16.msra.mxu0 %v4360_v28  ;;  %3201 = vmatpush3.bf16.msra.mxu1 %v4362_v29 }
 0xa82   :  { %2136 = vmatprep.subr.bf16.mxu0 %v4367_v30  ;;  %3202 = vmatprep.subr.bf16.mxu1 %v4829_v57 }
 0xa85   :  { %2137 = vmatpush1.bf16.msra.mxu0 %v4370_v31  ;;  %3203 = vmatpush3.bf16.msra.mxu1 %v4372_v33 }
 0xa86   :  { %2138 = vmatprep.subr.bf16.mxu0 %v4377_v34  ;;  %3204 = vmatprep.subr.bf16.mxu1 %v4829_v57 }
 0xa89   :  { %2139 = vmatpush1.bf16.msra.mxu0 %v4380_v35  ;;  %3205 = vmatpush3.bf16.msra.mxu1 %v4382_v36 }
 0xa8a   :  { %2140 = vmatprep.subr.bf16.mxu0 %v4387_v37  ;;  %3206 = vmatprep.subr.bf16.mxu1 %v4829_v57 }
 0xa8d   :  { %2141 = vmatpush1.bf16.msra.mxu0 %v4389_v38  ;;  %3207 = vmatpush3.bf16.msra.mxu1 %v4392_v39 }
 0xa8e   :  { %2233 = vmatprep.subr.bf16.mxu0 %v4318_v18  ;;  %3212 = vmatprep.subr.bf16.mxu1 %v4829_v57 }
 0xb43   :  { %v2053_v43 = vpop.f32.mrb[68].mxu0  ;;  %v2094_v47 = vpop.f32.mrb[52].mxu1 }
 0xb44   :  { %v2100_v13 = vadd.f32 %v2053_v43, %v1499_v32  ;;  %v2055_v4 = vpop.f32.mrb[69].mxu0  ;;  %v3190_v61 = vpop.f32.mrb[53].mxu1  ;;  %v2114_v49 = vadd.f32 %v4459_v0, %v2094_v47 }
 0xb45   :  { %v2107_v60 = vadd.f32 %v2055_v4, %v1501_v45  ;;  %v2057_v52 = vpop.f32.mrb[70].mxu0  ;;  %v2097_v14 = vpop.f32.mrb[54].mxu1 }
 0xb46   :  { %v2784_v55 = vmul.f32 -1.442695, %v2100_v13  ;;  %v2058_v10 = vpop.f32.mrb[71].mxu0  ;;  %v3191_v51 = vpop.f32.mrb[55].mxu1 }
 0xb47   :  { %v2785_v53 = vmul.f32 -1.442695, %v2107_v60 }
 0xb48   :  { %3524 = vpow2.f32 %v2784_v55 }
 0xb49   :  { %3526 = vpow2.f32 %v2785_v53 }
 0xb52   :  { %v3525_v40 = vpop.eup %3524 }
 0xb53   :  { %v2104_v62 = vadd.f32 1.0, %v3525_v40  ;;  %v3527_v48 = vpop.eup %3526 }
 0xb54   :  { %v2111_v54 = vadd.f32 1.0, %v3527_v48 }
 0xb55   :  { %3528 = vrcp.f32 %v2104_v62 }
 0xb56   :  { %3530 = vrcp.f32 %v2111_v54 }
 0xb5f   :  { %v3529_v44 = vpop.eup %3528 }
 0xb60   :  { %v2115_v25 = vmul.f32 %v3529_v44, %v2114_v49  ;;  %v3531_v17 = vpop.eup %3530 }
 0xb61   :  { %v2118_v50 = vsub.f32 1.0, %v3531_v17  ;;  %v2120_v45 = vmul.f32 %v3531_v17, %v4573_v6  ;;  %v1507_v6 = vadd.f32 %v4443_v42, %v4419_v15 }
 0xb62   :  { %v2116_v63 = vadd.f32 %v2115_v25, %v1569_v46  ;;  %v1574_v46 = vadd.f32 %v4508_v5, %v4454_v12  ;;  %v1509_v5 = vadd.f32 %v4445_v2, %v4413_v3 }
 0xb64   :  { %3532 = vtanh.f32 %v2116_v63 }
 0xb6e   :  { %v3533_v1 = vpop.eup %3532 }
 0xb6f   :  { %v2119_v32 = vmul.f32 %v3533_v1, %v2118_v50 }
 0xb71   :  { %v4620_v43 = vadd.f32 %v2120_v45, %v2119_v32 }
 0xb73   :  { %v2125_v13 = vpack.c.bf16 %v4620_v43, %v4620_v43 }
 0xb75   :  { %2159 = vmatmul.mubr.bf16.vlgmr.msra.gmra.mrb[72].mxu0 %v2125_v13  ;;  %3209 = vmatmul.mubr.bf16.vlgmr.msra.gmra.mrb[56].mxu1 %v2125_v13 }
 0xb76   :  { %2234 = vmatpush1.bf16.msra.mxu0 %v4320_v19  ;;  %3213 = vmatpush3.bf16.msra.mxu1 %v4322_v9 }
 0xb77   :  { %2235 = vmatprep.subr.bf16.mxu0 %v4327_v59  ;;  %3214 = vmatprep.subr.bf16.mxu1 %v4829_v57 }
 0xb78   :  { %2265 = vmatprep.mubr.bf16.mxu0 %v4830_v58  ;;  %3228 = vmatprep.mubr.msk.bf16.mxu1 %vm3604_vm2, %v4829_v57 }
 0xb7a   :  { %2236 = vmatpush1.bf16.msra.mxu0 %v4330_v11  ;;  %3215 = vmatpush3.bf16.msra.mxu1 %v4332_v7 }
 0xb7b   :  { %2237 = vmatprep.subr.bf16.mxu0 %v4337_v20  ;;  %3216 = vmatprep.subr.bf16.mxu1 %v4829_v57 }
 0xb7e   :  { %2238 = vmatpush1.bf16.msra.mxu0 %v4340_v21  ;;  %3217 = vmatpush3.bf16.msra.mxu1 %v4342_v22 }
 0xb7f   :  { %2239 = vmatprep.subr.bf16.mxu0 %v4347_v23  ;;  %3218 = vmatprep.subr.bf16.mxu1 %v4829_v57 }
 0xb82   :  { %2240 = vmatpush1.bf16.msra.mxu0 %v4350_v24  ;;  %3219 = vmatpush3.bf16.msra.mxu1 %v4352_v26 }
 0xb83   :  { %2241 = vmatprep.subr.bf16.mxu0 %v4357_v27  ;;  %3220 = vmatprep.subr.bf16.mxu1 %v4829_v57 }
 0xb86   :  { %2242 = vmatpush1.bf16.msra.mxu0 %v4360_v28  ;;  %3221 = vmatpush3.bf16.msra.mxu1 %v4362_v29 }
 0xb87   :  { %2243 = vmatprep.subr.bf16.mxu0 %v4367_v30  ;;  %3222 = vmatprep.subr.bf16.mxu1 %v4829_v57 }
 0xb8a   :  { %2244 = vmatpush1.bf16.msra.mxu0 %v4370_v31  ;;  %3223 = vmatpush3.bf16.msra.mxu1 %v4372_v33 }
 0xb8b   :  { %2245 = vmatprep.subr.bf16.mxu0 %v4377_v34  ;;  %3224 = vmatprep.subr.bf16.mxu1 %v4829_v57 }
 0xb8e   :  { %2246 = vmatpush1.bf16.msra.mxu0 %v4380_v35  ;;  %3225 = vmatpush3.bf16.msra.mxu1 %v4382_v36 }
 0xb8f   :  { %2247 = vmatprep.subr.bf16.mxu0 %v4387_v37  ;;  %3226 = vmatprep.subr.bf16.mxu1 %v4829_v57 }
 0xb92   :  { %2248 = vmatpush1.bf16.msra.mxu0 %v4389_v38  ;;  %3227 = vmatpush3.bf16.msra.mxu1 %v4392_v39 }
 0xb93   :  { %2340 = vmatprep.subr.bf16.mxu0 %v4318_v18  ;;  %3232 = vmatprep.subr.bf16.mxu1 %v4829_v57 }
 0xc48   :  { %v2160_v47 = vpop.f32.mrb[72].mxu0  ;;  %v2201_v4 = vpop.f32.mrb[56].mxu1 }
 0xc49   :  { %v2207_v61 = vadd.f32 %v2160_v47, %v1505_v8  ;;  %v2162_v60 = vpop.f32.mrb[73].mxu0  ;;  %v3210_v52 = vpop.f32.mrb[57].mxu1  ;;  %v2221_v42 = vadd.f32 %v4459_v0, %v2201_v4 }
 0xc4a   :  { %v2214_v14 = vadd.f32 %v2162_v60, %v1507_v6  ;;  %v2164_v55 = vpop.f32.mrb[74].mxu0  ;;  %v2204_v10 = vpop.f32.mrb[58].mxu1 }
 0xc4b   :  { %v2786_v51 = vmul.f32 -1.442695, %v2207_v61  ;;  %v2165_v53 = vpop.f32.mrb[75].mxu0  ;;  %v3211_v40 = vpop.f32.mrb[59].mxu1 }
 0xc4c   :  { %v2787_v62 = vmul.f32 -1.442695, %v2214_v14 }
 0xc4d   :  { %3534 = vpow2.f32 %v2786_v51 }
 0xc4e   :  { %3536 = vpow2.f32 %v2787_v62 }
 0xc57   :  { %v3535_v48 = vpop.eup %3534 }
 0xc58   :  { %v2211_v54 = vadd.f32 1.0, %v3535_v48  ;;  %v3537_v16 = vpop.eup %3536 }
 0xc59   :  { %v2218_v49 = vadd.f32 1.0, %v3537_v16  ;;  %v1577_v16 = vadd.f32 %v4516_v56, %v4454_v12 }
 0xc5a   :  { %3538 = vrcp.f32 %v2211_v54 }
 0xc5b   :  { %3540 = vrcp.f32 %v2218_v49 }
 0xc64   :  { %v3539_v44 = vpop.eup %3538 }
 0xc65   :  { %v2222_v25 = vmul.f32 %v3539_v44, %v2221_v42  ;;  %v3541_v17 = vpop.eup %3540 }
 0xc66   :  { %v2225_v50 = vsub.f32 1.0, %v3541_v17  ;;  %v2227_v45 = vmul.f32 %v3541_v17, %v4620_v43  ;;  %v1511_v43 = vadd.f32 %v4447_v41, %v4419_v15 }
 0xc67   :  { %v2223_v63 = vadd.f32 %v2222_v25, %v1574_v46 }
 0xc69   :  { %3542 = vtanh.f32 %v2223_v63 }
 0xc73   :  { %v3543_v1 = vpop.eup %3542 }
 0xc74   :  { %v2226_v32 = vmul.f32 %v3543_v1, %v2225_v50 }
 0xc76   :  { %v4667_v13 = vadd.f32 %v2227_v45, %v2226_v32 }
 0xc78   :  { %v2232_v8 = vpack.c.bf16 %v4667_v13, %v4667_v13 }
 0xc7a   :  { %2266 = vmatmul.mubr.bf16.vlgmr.msra.gmra.mrb[76].mxu0 %v2232_v8  ;;  %3229 = vmatmul.mubr.bf16.vlgmr.msra.gmra.mrb[60].mxu1 %v2232_v8 }
 0xc7b   :  { %2341 = vmatpush1.bf16.msra.mxu0 %v4320_v19  ;;  %3233 = vmatpush3.bf16.msra.mxu1 %v4322_v9 }
 0xc7c   :  { %2342 = vmatprep.subr.bf16.mxu0 %v4327_v59  ;;  %3234 = vmatprep.subr.bf16.mxu1 %v4829_v57 }
 0xc7d   :  { %2372 = vmatprep.mubr.bf16.mxu0 %v4830_v58  ;;  %3248 = vmatprep.mubr.msk.bf16.mxu1 %vm3604_vm2, %v4829_v57 }
 0xc7f   :  { %2343 = vmatpush1.bf16.msra.mxu0 %v4330_v11  ;;  %3235 = vmatpush3.bf16.msra.mxu1 %v4332_v7 }
 0xc80   :  { %2344 = vmatprep.subr.bf16.mxu0 %v4337_v20  ;;  %3236 = vmatprep.subr.bf16.mxu1 %v4829_v57 }
 0xc83   :  { %2345 = vmatpush1.bf16.msra.mxu0 %v4340_v21  ;;  %3237 = vmatpush3.bf16.msra.mxu1 %v4342_v22 }
 0xc84   :  { %2346 = vmatprep.subr.bf16.mxu0 %v4347_v23  ;;  %3238 = vmatprep.subr.bf16.mxu1 %v4829_v57 }
 0xc87   :  { %2347 = vmatpush1.bf16.msra.mxu0 %v4350_v24  ;;  %3239 = vmatpush3.bf16.msra.mxu1 %v4352_v26 }
 0xc88   :  { %2348 = vmatprep.subr.bf16.mxu0 %v4357_v27  ;;  %3240 = vmatprep.subr.bf16.mxu1 %v4829_v57 }
 0xc8b   :  { %2349 = vmatpush1.bf16.msra.mxu0 %v4360_v28  ;;  %3241 = vmatpush3.bf16.msra.mxu1 %v4362_v29 }
 0xc8c   :  { %2350 = vmatprep.subr.bf16.mxu0 %v4367_v30  ;;  %3242 = vmatprep.subr.bf16.mxu1 %v4829_v57 }
 0xc8f   :  { %2351 = vmatpush1.bf16.msra.mxu0 %v4370_v31  ;;  %3243 = vmatpush3.bf16.msra.mxu1 %v4372_v33 }
 0xc90   :  { %2352 = vmatprep.subr.bf16.mxu0 %v4377_v34  ;;  %3244 = vmatprep.subr.bf16.mxu1 %v4829_v57 }
 0xc93   :  { %2353 = vmatpush1.bf16.msra.mxu0 %v4380_v35  ;;  %3245 = vmatpush3.bf16.msra.mxu1 %v4382_v36 }
 0xc94   :  { %2354 = vmatprep.subr.bf16.mxu0 %v4387_v37  ;;  %3246 = vmatprep.subr.bf16.mxu1 %v4829_v57 }
 0xc97   :  { %2355 = vmatpush1.bf16.msra.mxu0 %v4389_v38  ;;  %3247 = vmatpush3.bf16.msra.mxu1 %v4392_v39 }
 0xc98   :  { %2447 = vmatprep.subr.bf16.mxu0 %v4318_v18  ;;  %3252 = vmatprep.subr.bf16.mxu1 %v4829_v57 }
 0xd4d   :  { %v2267_v6 = vpop.f32.mrb[76].mxu0  ;;  %v2308_v47 = vpop.f32.mrb[60].mxu1 }
 0xd4e   :  { %v2314_v4 = vadd.f32 %v2267_v6, %v1509_v5  ;;  %v2269_v61 = vpop.f32.mrb[77].mxu0  ;;  %v3230_v60 = vpop.f32.mrb[61].mxu1  ;;  %v2328_v41 = vadd.f32 %v4459_v0, %v2308_v47 }
 0xd4f   :  { %v2321_v52 = vadd.f32 %v2269_v61, %v1511_v43  ;;  %v2271_v14 = vpop.f32.mrb[78].mxu0  ;;  %v2311_v55 = vpop.f32.mrb[62].mxu1  ;;  %v3407_v61 = vld [vmem:[%s4812_s9 + $0x8] sm:$0xff]   ;;  %v3408_v60 = vld [vmem:[%s4812_s9 + $0x10] sm:$0xff]  }
 0xd50   :  { %v2788_v10 = vmul.f32 -1.442695, %v2314_v4  ;;  %v2272_v51 = vpop.f32.mrb[79].mxu0  ;;  %v3231_v53 = vpop.f32.mrb[63].mxu1  ;;  %v3406_v4 = vld [vmem:[%s4812_s9] sm:$0xff]   ;;  %v3411_v55 = vld [vmem:[%s4812_s9 + $0x28] sm:$0xff]  }
 0xd51   :  { %v2789_v18 = vmul.f32 -1.442695, %v2321_v52  ;;  %v3409_v52 = vld [vmem:[%s4812_s9 + $0x18] sm:$0xff]   ;;  %v3410_v14 = vld [vmem:[%s4812_s9 + $0x20] sm:$0xff]  }
 0xd52   :  { %3544 = vpow2.f32 %v2788_v10  ;;  %v3412_v10 = vld [vmem:[%s4812_s9 + $0x30] sm:$0xff]   ;;  %v3413_v51 = vld [vmem:[%s4812_s9 + $0x38] sm:$0xff]  }
 0xd53   :  { %3546 = vpow2.f32 %v2789_v18  ;;  %v4848_v53 = vld [vmem:[#allocation11_spill] sm:$0xff] }
 0xd54   :  { %v1519_v18 = vadd.f32 %v4848_v53, %v4413_v3 }
 0xd5c   :  { %v3545_v40 = vpop.eup %3544 }
 0xd5d   :  { %v2318_v62 = vadd.f32 1.0, %v3545_v40  ;;  %v3547_v2 = vpop.eup %3546  ;;  %v4849_v40 = vld [vmem:[#allocation13_spill] sm:$0xff] }
 0xd5e   :  { %v2325_v48 = vadd.f32 1.0, %v3547_v2 }
 0xd5f   :  { %3548 = vrcp.f32 %v2318_v62  ;;  %v1521_v62 = vadd.f32 %v4849_v40, %v4419_v15 }
 0xd60   :  { %3550 = vrcp.f32 %v2325_v48 }
 0xd69   :  { %v3549_v54 = vpop.eup %3548 }
 0xd6a   :  { %v2329_v49 = vmul.f32 %v3549_v54, %v2328_v41  ;;  %v3551_v44 = vpop.eup %3550 }
 0xd6b   :  { %v2332_v46 = vsub.f32 1.0, %v3551_v44  ;;  %v2334_v17 = vmul.f32 %v3551_v44, %v4667_v13 }
 0xd6c   :  { %v2330_v42 = vadd.f32 %v2329_v49, %v1577_v16 }
 0xd6e   :  { %3552 = vtanh.f32 %v2330_v42 }
 0xd78   :  { %v3553_v25 = vpop.eup %3552 }
 0xd79   :  { %v2333_v63 = vmul.f32 %v3553_v25, %v2332_v46 }
 0xd7b   :  { %v4714_v50 = vadd.f32 %v2334_v17, %v2333_v63 }
 0xd7d   :  { %v2339_v1 = vpack.c.bf16 %v4714_v50, %v4714_v50 }
 0xd7f   :  { %2373 = vmatmul.mubr.bf16.vlgmr.msra.gmra.mrb[80].mxu0 %v2339_v1  ;;  %3249 = vmatmul.mubr.bf16.vlgmr.msra.gmra.mrb[64].mxu1 %v2339_v1 }
 0xd80   :  { %2448 = vmatpush1.bf16.msra.mxu0 %v4320_v19  ;;  %3253 = vmatpush3.bf16.msra.mxu1 %v4322_v9  ;;  %v4846_v9 = vld [vmem:[#allocation12_spill] sm:$0xff] }
 0xd81   :  { %2449 = vmatprep.subr.bf16.mxu0 %v4327_v59  ;;  %3254 = vmatprep.subr.bf16.mxu1 %v4829_v57  ;;  %v1517_v59 = vadd.f32 %v4846_v9, %v4419_v15 }
 0xd82   :  { %2479 = vmatprep.mubr.bf16.mxu0 %v4830_v58  ;;  %3268 = vmatprep.mubr.msk.bf16.mxu1 %vm3604_vm2, %v4829_v57  ;;  %v4845_v58 = vld [vmem:[#allocation9_spill] sm:$0xff] }
 0xd83   :  { %v1515_v19 = vadd.f32 %v4845_v58, %v4413_v3 }
 0xd84   :  { %2450 = vmatpush1.bf16.msra.mxu0 %v4330_v11  ;;  %3255 = vmatpush3.bf16.msra.mxu1 %v4332_v7 }
 0xd85   :  { %2451 = vmatprep.subr.bf16.mxu0 %v4337_v20  ;;  %3256 = vmatprep.subr.bf16.mxu1 %v4829_v57 }
 0xd88   :  { %2452 = vmatpush1.bf16.msra.mxu0 %v4340_v21  ;;  %3257 = vmatpush3.bf16.msra.mxu1 %v4342_v22 }
 0xd89   :  { %2453 = vmatprep.subr.bf16.mxu0 %v4347_v23  ;;  %3258 = vmatprep.subr.bf16.mxu1 %v4829_v57 }
 0xd8c   :  { %2454 = vmatpush1.bf16.msra.mxu0 %v4350_v24  ;;  %3259 = vmatpush3.bf16.msra.mxu1 %v4352_v26 }
 0xd8d   :  { %2455 = vmatprep.subr.bf16.mxu0 %v4357_v27  ;;  %3260 = vmatprep.subr.bf16.mxu1 %v4829_v57 }
 0xd90   :  { %2456 = vmatpush1.bf16.msra.mxu0 %v4360_v28  ;;  %3261 = vmatpush3.bf16.msra.mxu1 %v4362_v29 }
 0xd91   :  { %2457 = vmatprep.subr.bf16.mxu0 %v4367_v30  ;;  %3262 = vmatprep.subr.bf16.mxu1 %v4829_v57 }
 0xd94   :  { %2458 = vmatpush1.bf16.msra.mxu0 %v4370_v31  ;;  %3263 = vmatpush3.bf16.msra.mxu1 %v4372_v33 }
 0xd95   :  { %2459 = vmatprep.subr.bf16.mxu0 %v4377_v34  ;;  %3264 = vmatprep.subr.bf16.mxu1 %v4829_v57 }
 0xd98   :  { %2460 = vmatpush1.bf16.msra.mxu0 %v4380_v35  ;;  %3265 = vmatpush3.bf16.msra.mxu1 %v4382_v36 }
 0xd99   :  { %2461 = vmatprep.subr.bf16.mxu0 %v4387_v37  ;;  %3266 = vmatprep.subr.bf16.mxu1 %v4829_v57 }
 0xd9c   :  { %2462 = vmatpush1.bf16.msra.mxu0 %v4389_v38  ;;  %3267 = vmatpush3.bf16.msra.mxu1 %v4392_v39  ;;  %v4847_v38 = vld [vmem:[#allocation10_spill] sm:$0xff] }
 0xd9d   :  { %3272 = vmatprep.subr.bf16.mxu0 %v4829_v57  ;;  %v1582_v39 = vadd.f32 %v4847_v38, %v4454_v12 }
 0xe52   :  { %v2374_v11 = vpop.f32.mrb[80].mxu0  ;;  %v2415_v7 = vpop.f32.mrb[64].mxu1 }
 0xe53   :  { %v2421_v20 = vadd.f32 %v2374_v11, %v1515_v19  ;;  %v2376_v21 = vpop.f32.mrb[81].mxu0  ;;  %v3250_v22 = vpop.f32.mrb[65].mxu1  ;;  %v2435_v36 = vadd.f32 %v4459_v0, %v2415_v7  ;;  %v4850_v19 = vld [vmem:[#allocation8_spill] sm:$0xff] }
 0xe54   :  { %v2428_v23 = vadd.f32 %v2376_v21, %v1517_v59  ;;  %v2378_v24 = vpop.f32.mrb[82].mxu0  ;;  %v2418_v26 = vpop.f32.mrb[66].mxu1  ;;  %v1585_v9 = vadd.f32 %v4850_v19, %v4454_v12 }
 0xe55   :  { %v2790_v27 = vmul.f32 -1.442695, %v2421_v20  ;;  %v2379_v28 = vpop.f32.mrb[83].mxu0  ;;  %v3251_v29 = vpop.f32.mrb[67].mxu1 }
 0xe56   :  { %v2791_v30 = vmul.f32 -1.442695, %v2428_v23 }
 0xe57   :  { %3554 = vpow2.f32 %v2790_v27  ;;  %v2794_v27 = vld [vmem:[#allocation4] ss:$0 sm:$0xff] }
 0xe58   :  { %3556 = vpow2.f32 %v2791_v30 }
 0xe61   :  { %v3555_v31 = vpop.eup %3554 }
 0xe62   :  { %v2425_v33 = vadd.f32 1.0, %v3555_v31  ;;  %v3557_v34 = vpop.eup %3556 }
 0xe63   :  { %v2432_v35 = vadd.f32 1.0, %v3557_v34 }
 0xe64   :  { %3558 = vrcp.f32 %v2425_v33 }
 0xe65   :  { %3560 = vrcp.f32 %v2432_v35 }
 0xe6e   :  { %v3559_v37 = vpop.eup %3558 }
 0xe6f   :  { %v2436_v56 = vmul.f32 %v3559_v37, %v2435_v36  ;;  %v3561_v45 = vpop.eup %3560 }
 0xe70   :  { %v2439_v13 = vsub.f32 1.0, %v3561_v45  ;;  %v2441_v43 = vmul.f32 %v3561_v45, %v4714_v50 }
 0xe71   :  { %v2437_v32 = vadd.f32 %v2436_v56, %v1582_v39 }
 0xe73   :  { %3562 = vtanh.f32 %v2437_v32 }
 0xe7d   :  { %v3563_v8 = vpop.eup %3562 }
 0xe7e   :  { %v2440_v5 = vmul.f32 %v3563_v8, %v2439_v13 }
 0xe80   :  { %v2442_v6 = vadd.f32 %v2441_v43, %v2440_v5 }
 0xe82   :  { %v2446_v47 = vpack.c.bf16 %v2442_v6, %v2442_v6 }
 0xe84   :  { %2480 = vmatmul.mubr.bf16.vlgmr.msra.gmra.mrb[84].mxu0 %v2446_v47  ;;  %3269 = vmatmul.mubr.bf16.vlgmr.msra.gmra.mrb[68].mxu1 %v2446_v47 }
 0xe85   :  { %3288 = vmatprep.mubr.msk.bf16.mxu0 %vm3604_vm2, %v4829_v57  ;;  %3273 = vmatpush3.bf16.msra.mxu0 %v3406_v4 }
 0xe86   :  { %3274 = vmatprep.subr.bf16.mxu0 %v4829_v57 }
 0xe89   :  { %3275 = vmatpush3.bf16.msra.mxu0 %v3407_v61 }
 0xe8a   :  { %3276 = vmatprep.subr.bf16.mxu0 %v4829_v57 }
 0xe8d   :  { %3277 = vmatpush3.bf16.msra.mxu0 %v3408_v60 }
 0xe8e   :  { %3278 = vmatprep.subr.bf16.mxu0 %v4829_v57 }
 0xe91   :  { %3279 = vmatpush3.bf16.msra.mxu0 %v3409_v52 }
 0xe92   :  { %3280 = vmatprep.subr.bf16.mxu0 %v4829_v57 }
 0xe95   :  { %3281 = vmatpush3.bf16.msra.mxu0 %v3410_v14 }
 0xe96   :  { %3282 = vmatprep.subr.bf16.mxu0 %v4829_v57 }
 0xe99   :  { %3283 = vmatpush3.bf16.msra.mxu0 %v3411_v55 }
 0xe9a   :  { %3284 = vmatprep.subr.bf16.mxu0 %v4829_v57 }
 0xe9d   :  { %3285 = vmatpush3.bf16.msra.mxu0 %v3412_v10 }
 0xe9e   :  { %3286 = vmatprep.subr.bf16.mxu0 %v4829_v57 }
 0xea1   :  { %3287 = vmatpush3.bf16.msra.mxu0 %v3413_v51 }
 0xf57   :  { %v2481_v2 = vpop.f32.mrb[84].mxu0  ;;  %v2522_v48 = vpop.f32.mrb[68].mxu1 }
 0xf58   :  { %v2528_v41 = vadd.f32 %v2481_v2, %v1519_v18  ;;  %v2483_v54 = vpop.f32.mrb[85].mxu0  ;;  %v3270_v16 = vpop.f32.mrb[69].mxu1  ;;  %v2542_v15 = vadd.f32 %v4459_v0, %v2522_v48 }
 0xf59   :  { %v2535_v49 = vadd.f32 %v2483_v54, %v1521_v62  ;;  %v2485_v42 = vpop.f32.mrb[86].mxu0  ;;  %v2525_v44 = vpop.f32.mrb[70].mxu1 }
 0xf5a   :  { %v2792_v46 = vmul.f32 -1.442695, %v2528_v41  ;;  %v2486_v25 = vpop.f32.mrb[87].mxu0  ;;  %v3271_v63 = vpop.f32.mrb[71].mxu1 }
 0xf5b   :  { %v2793_v57 = vmul.f32 -1.442695, %v2535_v49 }
 0xf5c   :  { %3564 = vpow2.f32 %v2792_v46 }
 0xf5d   :  { %3566 = vpow2.f32 %v2793_v57 }
 0xf66   :  { %v3565_v17 = vpop.eup %3564 }
 0xf67   :  { %v2532_v50 = vadd.f32 1.0, %v3565_v17  ;;  %v3567_v3 = vpop.eup %3566 }
 0xf68   :  { %v2539_v1 = vadd.f32 1.0, %v3567_v3 }
 0xf69   :  { %3568 = vrcp.f32 %v2532_v50 }
 0xf6a   :  { %3570 = vrcp.f32 %v2539_v1 }
 0xf73   :  { %v3569_v58 = vpop.eup %3568 }
 0xf74   :  { %v2543_v59 = vmul.f32 %v3569_v58, %v2542_v15  ;;  %v3571_v7 = vpop.eup %3570 }
 0xf75   :  { %v2546_v20 = vsub.f32 1.0, %v3571_v7  ;;  %v2548_v23 = vmul.f32 %v3571_v7, %v2442_v6 }
 0xf76   :  { %v2544_v11 = vadd.f32 %v2543_v59, %v1585_v9 }
 0xf78   :  { %3572 = vtanh.f32 %v2544_v11 }
 0xf82   :  { %v3573_v21 = vpop.eup %3572 }
 0xf83   :  { %v2547_v22 = vmul.f32 %v3573_v21, %v2546_v20 }
 0xf85   :  { %v2549_v24 = vadd.f32 %v2548_v23, %v2547_v22 }
 0xf87   :  { %v2550_v26 = vpack.c.bf16 %v2549_v24, %v2549_v24 }
 0xf89   :  { %3289 = vmatmul.mubr.bf16.vlgmr.msra.gmra.mrb[88].mxu0 %v2550_v26 }
0x105c   :  { %v2656_v28 = vpop.f32.mrb[88].mxu0 }
0x105d   :  { %v2657_v0 = vadd.f32 %v2794_v27, %v2656_v28  ;;  %v3290_v29 = vpop.f32.mrb[89].mxu0 }
0x105e   :  { %v2659_v30 = vpop.f32.mrb[90].mxu0 }
0x105f   :  { %2663 = vst.msk [vmem:[%s4814_s11] sm:$0xff] %vm2662_vm3, %v2657_v0  ;;  %v3291_v12 = vpop.f32.mrb[91].mxu0 }
0x1060   :  { %2668 = vsyncpa [#allocation6], 1 }

</bundles_post_ra>
